<compile_context>
chip_gen: v6e
topology: v6e:2x2x1
jax: 0.10.0
libtpu: 0.0.40
codegen_flags: <defaults>
</compile_context>

<pallas_src>
import jax
import jax.numpy as jnp
from jax import lax
from jax.experimental import pallas as pl
from jax.experimental.pallas import tpu as pltpu


_BATCH_FUSE_MAX = 8   # above this, the b^2-sized block-diag W1 is not worth it


def _make_kernel(m, batch, d, l_tile, cdt, out_dtype, fuse_batch):
    two_d = 2 * d

    def kernel(*refs):
        x_refs = refs[:m]                                    # m x (batch, d, TL)
        w1_ref, b1_ref, w2bd_ref, b2_ref, o_ref, hs_ref, hacc_ref = refs[m:]

        w1 = w1_ref[...]                                     # fc1 weights (cdt)
        b1c = b1_ref[...]                                    # (rows, 1) f32

        # ---- fc1 + SiLU, batch-summed per group, into the VMEM scratch -----
        for g in range(m):                                   # static unroll, m small
            if fuse_batch:
                # Free view (batch, d, TL) -> (batch*d, TL); one dot with the
                # batch-block-diagonal W1^T covers the whole batch at once.
                xg = x_refs[g][...].reshape(batch * d, l_tile).astype(cdt)
                h = jnp.dot(w1, xg, preferred_element_type=jnp.float32)
                h = h + b1c
                h = h * jax.nn.sigmoid(h)                    # SiLU in f32
                hsum = h[0:two_d, :]
                for bi in range(1, batch):                   # sum sublane chunks
                    hsum = hsum + h[bi * two_d:(bi + 1) * two_d, :]
            else:
                # Large batch: f32 accumulator in VMEM; fori_loop bounds live
                # ranges and keeps the program small.
                hacc_ref[...] = jnp.zeros_like(hacc_ref)

                def body(bi, carry, g=g):
                    xg = x_refs[g][bi].astype(cdt)           # (d, TL)
                    h = jnp.dot(w1, xg, preferred_element_type=jnp.float32) + b1c
                    hacc_ref[...] += h * jax.nn.sigmoid(h)
                    return carry

                lax.fori_loop(0, batch, body, 0, unroll=2)
                hsum = hacc_ref[...]
            hs_ref[g * two_d:(g + 1) * two_d, :] = hsum.astype(cdt)

        # ---- fc2 (batch mean folded into weights): ONE block-diag dot ------
        y = jnp.dot(w2bd_ref[...], hs_ref[...],
                    preferred_element_type=jnp.float32)      # (m*d, TL) f32
        y = y + b2_ref[...]
        # Single small transpose -> lane-dense, unmasked (TL, m*d) store.
        o_ref[...] = y.T.astype(out_dtype)

    return kernel


def _pick_l_tile(l, m, batch, d, *, budget_bytes=20 << 20, max_tile=1024,
                 min_steps=2):
    """Largest lane tile that (a) keeps per-step VMEM under budget, (b) gives
    >= min_steps grid steps when l allows (2 TensorCores on v7x), and
    (c) prefers multiples of 128 that divide l."""
    per_l = (2 * m * batch * d * 4     # double-buffered x blocks
             + 2 * m * d * 4           # double-buffered output block
             + m * 2 * d * 4           # hs scratch (f32 upper bound)
             + 2 * d * 4)              # hacc scratch
    cap = max(128, min(max_tile, (budget_bytes // per_l) // 128 * 128))
    if l <= 128:
        return l
    if l <= cap * min_steps:
        t = max(128, (l // min_steps) // 128 * 128)
    else:
        t = cap
    for cand in range(t, 127, -128):   # prefer a divisor of l
        if l % cand == 0:
            return cand
    return t                           # ragged edge handled via pl.cdiv grid


def input_filter_forward(x, params, d_model, *, compute_dtype=jnp.bfloat16,
                         l_tile=None):
    """x: (batch, n*d_model, l).  Returns (1, l, (n-2)*d_model) in x.dtype."""
    w1, b1, w2, b2 = params            # (d,2d), (2d,), (2d,d), (d,)
    batch, nd, l = x.shape
    n = nd // d_model
    assert n * d_model == nd and n >= 3, "need at least 3 channel groups"
    assert d_model % 8 == 0, "d_model must be a multiple of 8 (f32 sublane tile)"
    m = n - 2
    d = d_model
    cdt = jnp.dtype(compute_dtype)
    fuse_batch = batch <= _BATCH_FUSE_MAX

    if l_tile is None:
        l_tile = _pick_l_tile(l, m, batch, d)
    grid = (pl.cdiv(l, l_tile),)

    # --- tiny host-side weight prep (would happen once at module init) ------
    w1t = jnp.transpose(w1)                                  # (2d, d)
    w2t = jnp.transpose(w2) * (1.0 / batch)                  # (d, 2d), mean folded
    if fuse_batch:
        w1k = jax.scipy.linalg.block_diag(*([w1t] * batch)).astype(cdt)  # (b*2d, b*d)
        b1c = jnp.tile(b1, batch).reshape(batch * 2 * d, 1)
    else:
        w1k = w1t.astype(cdt)                                # (2d, d)
        b1c = b1.reshape(2 * d, 1)
    w2bd = jax.scipy.linalg.block_diag(*([w2t] * m)).astype(cdt)         # (m*d, m*2d)
    b2c = jnp.tile(b2, m).reshape(m * d, 1)

    # One BlockSpec per kept group: exact reads from the original (b, n*d, l)
    # layout (dropped groups never DMA'd), l stays on lanes.
    x_specs = [
        pl.BlockSpec((batch, d, l_tile), (lambda i, g=g: (0, g + 1, i)))
        for g in range(m)
    ]
    w_specs = [
        pl.BlockSpec(w1k.shape, lambda i: (0, 0)),
        pl.BlockSpec(b1c.shape, lambda i: (0, 0)),
        pl.BlockSpec(w2bd.shape, lambda i: (0, 0)),
        pl.BlockSpec(b2c.shape, lambda i: (0, 0)),
    ]
    out_spec = pl.BlockSpec((l_tile, m * d), lambda i: (i, 0))

    hacc_shape = (2 * d, l_tile) if not fuse_batch else (8, 128)
    scratch_shapes = [
        pltpu.VMEM((m * 2 * d, l_tile), cdt),       # batch-summed SiLU activations
        pltpu.VMEM(hacc_shape, jnp.float32),        # f32 accumulator (large-batch path)
    ]

    # Rough per-step VMEM bound (double-buffered ins/outs + scratch) -> limit.
    est = (2 * m * batch * d * l_tile * 4 + 2 * l_tile * m * d * 4
           + (m * 2 * d + 2 * d) * l_tile * 4 + (1 << 20))
    vmem_limit = int(min(64 << 20, max(32 << 20, 2 * est)))

    cost = pl.CostEstimate(
        flops=4 * d * d * m * l * (batch + 1),       # fc1 (per sample) + fc2 (once)
        transcendentals=2 * d * m * batch * l,       # sigmoid count
        bytes_accessed=4 * l * m * d * (batch + 1),  # kept x read + output write
    )

    out = pl.pallas_call(
        _make_kernel(m, batch, d, l_tile, cdt, x.dtype, fuse_batch),
        out_shape=jax.ShapeDtypeStruct((l, m * d), x.dtype),
        grid=grid,
        in_specs=x_specs + w_specs,
        out_specs=out_spec,
        scratch_shapes=scratch_shapes,
        compiler_params=pltpu.CompilerParams(
            dimension_semantics=("parallel",),
            vmem_limit_bytes=vmem_limit),
        cost_estimate=cost,
    )(*([x] * m), w1k, b1c, w2bd, b2c)

    # (l, m*d) -> (1, l, m*d): pure reshape, no data movement.
    return out.reshape(1, l, m * d)


def _reference(x, params, d_model):
    w1, b1, w2, b2 = params
    b, nd, l = x.shape
    n = nd // d_model
    xr = x.reshape(b, n, d_model, l)
    xr = jnp.transpose(xr, (0, 3, 1, 2))[:, :, 1:-1, :]      # (b, l, m, d)
    h = xr @ w1 + b1
    h = h * jax.nn.sigmoid(h)
    y = h @ w2 + b2                                          # (b, l, m, d)
    z = jnp.mean(y, axis=0, keepdims=True)                   # (1, l, m, d)
    return z.reshape(1, l, -1)


def init_params(key, d_model):
    # Deterministic init mimicking nn.Linear uniform(-1/sqrt(fan_in), +).
    k1, k2, k3, k4 = jax.random.split(key, 4)
    lim1 = 1.0 / jnp.sqrt(d_model)
    lim2 = 1.0 / jnp.sqrt(2.0 * d_model)
    w1 = jax.random.uniform(k1, (d_model, 2 * d_model), jnp.float32, -lim1, lim1)
    b1 = jax.random.uniform(k2, (2 * d_model,), jnp.float32, -lim1, lim1)
    w2 = jax.random.uniform(k3, (2 * d_model, d_model), jnp.float32, -lim2, lim2)
    b2 = jax.random.uniform(k4, (d_model,), jnp.float32, -lim2, lim2)
    # TODO(synk): fc2_logvar / reparameterize are unused in forward(); not implemented.
    return (w1, b1, w2, b2)


if __name__ == "__main__":
    d_model = 32
    n = 6              # forward keeps groups 1..n-2 -> m = 4, m*d = 128 lanes
    key = jax.random.PRNGKey(0)
    kx, kp, kx2, kx3 = jax.random.split(key, 4)
    params = init_params(kp, d_model)

    # --- main config: batch=2, l=512 (2 "parallel" grid steps, fused path) --
    batch, l = 2, 512
    x = jax.random.normal(kx, (batch, n * d_model, l), dtype=jnp.float32)
    ref = _reference(x, params, d_model)

    out_bf16 = jax.block_until_ready(input_filter_forward(x, params, d_model))
    assert out_bf16.shape == (1, l, (n - 2) * d_model), out_bf16.shape
    err = float(jnp.max(jnp.abs(out_bf16 - ref)))
    assert err < 5e-2, f"bf16 path max abs err {err}"

    out_f32 = jax.block_until_ready(
        input_filter_forward(x, params, d_model, compute_dtype=jnp.float32))
    assert jnp.allclose(out_f32, ref, atol=2e-4, rtol=2e-4), \
        float(jnp.max(jnp.abs(out_f32 - ref)))

    # --- ragged l (cdiv grid + padded edge block), checked exactly in f32 ---
    l2 = 320
    x2 = jax.random.normal(kx2, (batch, n * d_model, l2), dtype=jnp.float32)
    ref2 = _reference(x2, params, d_model)
    out2 = jax.block_until_ready(
        input_filter_forward(x2, params, d_model, compute_dtype=jnp.float32))
    assert out2.shape == (1, l2, (n - 2) * d_model), out2.shape
    assert jnp.allclose(out2, ref2, atol=2e-4, rtol=2e-4), \
        float(jnp.max(jnp.abs(out2 - ref2)))

    # --- large batch (> 8): fori_loop fallback path, checked exactly in f32 --
    batch3, l3 = 10, 256
    x3 = jax.random.normal(kx3, (batch3, n * d_model, l3), dtype=jnp.float32)
    ref3 = _reference(x3, params, d_model)
    out3 = jax.block_until_ready(
        input_filter_forward(x3, params, d_model, compute_dtype=jnp.float32))
    assert jnp.allclose(out3, ref3, atol=2e-4, rtol=2e-4), \
        float(jnp.max(jnp.abs(out3 - ref3)))

    print("KERNEL_OK")
</pallas_src>

<mosaic_0001>
module attributes {stable_mosaic.version = 11 : i64} {
  func.func @kernel(%arg0: i32, %arg1: memref<2x32x256xf32, #tpu.memory_space<vmem>>, %arg2: memref<2x32x256xf32, #tpu.memory_space<vmem>>, %arg3: memref<2x32x256xf32, #tpu.memory_space<vmem>>, %arg4: memref<2x32x256xf32, #tpu.memory_space<vmem>>, %arg5: memref<128x64xbf16, #tpu.memory_space<vmem>>, %arg6: memref<128x1xf32, #tpu.memory_space<vmem>>, %arg7: memref<128x256xbf16, #tpu.memory_space<vmem>>, %arg8: memref<128x1xf32, #tpu.memory_space<vmem>>, %arg9: memref<256x128xf32, #tpu.memory_space<vmem>>, %arg10: memref<256x256xbf16, #tpu.memory_space<vmem>>, %arg11: memref<8x128xf32, #tpu.memory_space<vmem>>) attributes {dimension_semantics = [#tpu.dimension_semantics<parallel>], iteration_bounds = array<i64: 2>, scalar_prefetch = 0 : i64, scratch_operands = 2 : i64, tpu.core_type = #tpu.core_type<tc>, window_params = [{transform_indices = @transform_0, window_bounds = array<i64: 2, 32, 256>}, {transform_indices = @transform_1, window_bounds = array<i64: 2, 32, 256>}, {transform_indices = @transform_2, window_bounds = array<i64: 2, 32, 256>}, {transform_indices = @transform_3, window_bounds = array<i64: 2, 32, 256>}, {pipeline_mode = #tpu.pipeline_mode<synchronous>, transform_indices = @transform_4, window_bounds = array<i64: 128, 64>}, {pipeline_mode = #tpu.pipeline_mode<synchronous>, transform_indices = @transform_5, window_bounds = array<i64: 128, 1>}, {pipeline_mode = #tpu.pipeline_mode<synchronous>, transform_indices = @transform_6, window_bounds = array<i64: 128, 256>}, {pipeline_mode = #tpu.pipeline_mode<synchronous>, transform_indices = @transform_7, window_bounds = array<i64: 128, 1>}, {transform_indices = @transform_8, window_bounds = array<i64: 256, 128>}]} {
    %c0 = arith.constant 0 : index
    %c0_0 = arith.constant 0 : index
    %0 = vector.load %arg5[%c0, %c0_0] : memref<128x64xbf16, #tpu.memory_space<vmem>>, vector<128x64xbf16>
    %c0_1 = arith.constant 0 : index
    %c0_2 = arith.constant 0 : index
    %1 = vector.load %arg6[%c0_1, %c0_2] : memref<128x1xf32, #tpu.memory_space<vmem>>, vector<128x1xf32>
    %c0_3 = arith.constant 0 : index
    %c0_4 = arith.constant 0 : index
    %c0_5 = arith.constant 0 : index
    %2 = vector.load %arg1[%c0_3, %c0_4, %c0_5] : memref<2x32x256xf32, #tpu.memory_space<vmem>>, vector<2x32x256xf32>
    %3 = vector.shape_cast %2 : vector<2x32x256xf32> to vector<64x256xf32>
    %4 = arith.truncf %3 : vector<64x256xf32> to vector<64x256xbf16>
    %cst = arith.constant dense<0.000000e+00> : vector<128x256xf32>
    %5 = tpu.matmul %0, %4, %cst {dimension_numbers = #tpu.dot_dimension_numbers<[1], [0], [0], [1], [0, 0, 1, 1], [], []>} : vector<128x64xbf16>, vector<64x256xbf16>, vector<128x256xf32> -> vector<128x256xf32>
    %6 = vector.broadcast %1 : vector<128x1xf32> to vector<128x256xf32>
    %7 = arith.addf %5, %6 : vector<128x256xf32>
    %8 = arith.negf %7 : vector<128x256xf32>
    %9 = math.exp %8 : vector<128x256xf32>
    %cst_6 = arith.constant 1.000000e+00 : f32
    %10 = vector.broadcast %cst_6 : f32 to vector<128x256xf32>
    %11 = arith.addf %10, %9 : vector<128x256xf32>
    %12 = arith.divf %10, %11 : vector<128x256xf32>
    %13 = arith.mulf %7, %12 : vector<128x256xf32>
    %14 = vector.extract_strided_slice %13 {offsets = [0, 0], sizes = [64, 256], strides = [1, 1]} : vector<128x256xf32> to vector<64x256xf32>
    %15 = vector.extract_strided_slice %13 {offsets = [64, 0], sizes = [64, 256], strides = [1, 1]} : vector<128x256xf32> to vector<64x256xf32>
    %16 = arith.addf %14, %15 : vector<64x256xf32>
    %17 = arith.truncf %16 : vector<64x256xf32> to vector<64x256xbf16>
    %c0_7 = arith.constant 0 : index
    %c0_8 = arith.constant 0 : index
    %18 = vector.load %arg10[%c0_7, %c0_8] : memref<256x256xbf16, #tpu.memory_space<vmem>>, vector<64x256xbf16>
    tpu.vector_store %arg10[%c0_7, %c0_8], %17 {strides = array<i32>} : memref<256x256xbf16, #tpu.memory_space<vmem>>, vector<64x256xbf16>,
    %c0_9 = arith.constant 0 : index
    %c0_10 = arith.constant 0 : index
    %c0_11 = arith.constant 0 : index
    %19 = vector.load %arg2[%c0_9, %c0_10, %c0_11] : memref<2x32x256xf32, #tpu.memory_space<vmem>>, vector<2x32x256xf32>
    %20 = vector.shape_cast %19 : vector<2x32x256xf32> to vector<64x256xf32>
    %21 = arith.truncf %20 : vector<64x256xf32> to vector<64x256xbf16>
    %cst_12 = arith.constant dense<0.000000e+00> : vector<128x256xf32>
    %22 = tpu.matmul %0, %21, %cst_12 {dimension_numbers = #tpu.dot_dimension_numbers<[1], [0], [0], [1], [0, 0, 1, 1], [], []>} : vector<128x64xbf16>, vector<64x256xbf16>, vector<128x256xf32> -> vector<128x256xf32>
    %23 = vector.broadcast %1 : vector<128x1xf32> to vector<128x256xf32>
    %24 = arith.addf %22, %23 : vector<128x256xf32>
    %25 = arith.negf %24 : vector<128x256xf32>
    %26 = math.exp %25 : vector<128x256xf32>
    %cst_13 = arith.constant 1.000000e+00 : f32
    %27 = vector.broadcast %cst_13 : f32 to vector<128x256xf32>
    %28 = arith.addf %27, %26 : vector<128x256xf32>
    %29 = arith.divf %27, %28 : vector<128x256xf32>
    %30 = arith.mulf %24, %29 : vector<128x256xf32>
    %31 = vector.extract_strided_slice %30 {offsets = [0, 0], sizes = [64, 256], strides = [1, 1]} : vector<128x256xf32> to vector<64x256xf32>
    %32 = vector.extract_strided_slice %30 {offsets = [64, 0], sizes = [64, 256], strides = [1, 1]} : vector<128x256xf32> to vector<64x256xf32>
    %33 = arith.addf %31, %32 : vector<64x256xf32>
    %34 = arith.truncf %33 : vector<64x256xf32> to vector<64x256xbf16>
    %c64 = arith.constant 64 : index
    %c0_14 = arith.constant 0 : index
    %35 = vector.load %arg10[%c64, %c0_14] : memref<256x256xbf16, #tpu.memory_space<vmem>>, vector<64x256xbf16>
    tpu.vector_store %arg10[%c64, %c0_14], %34 {strides = array<i32>} : memref<256x256xbf16, #tpu.memory_space<vmem>>, vector<64x256xbf16>,
    %c0_15 = arith.constant 0 : index
    %c0_16 = arith.constant 0 : index
    %c0_17 = arith.constant 0 : index
    %36 = vector.load %arg3[%c0_15, %c0_16, %c0_17] : memref<2x32x256xf32, #tpu.memory_space<vmem>>, vector<2x32x256xf32>
    %37 = vector.shape_cast %36 : vector<2x32x256xf32> to vector<64x256xf32>
    %38 = arith.truncf %37 : vector<64x256xf32> to vector<64x256xbf16>
    %cst_18 = arith.constant dense<0.000000e+00> : vector<128x256xf32>
    %39 = tpu.matmul %0, %38, %cst_18 {dimension_numbers = #tpu.dot_dimension_numbers<[1], [0], [0], [1], [0, 0, 1, 1], [], []>} : vector<128x64xbf16>, vector<64x256xbf16>, vector<128x256xf32> -> vector<128x256xf32>
    %40 = vector.broadcast %1 : vector<128x1xf32> to vector<128x256xf32>
    %41 = arith.addf %39, %40 : vector<128x256xf32>
    %42 = arith.negf %41 : vector<128x256xf32>
    %43 = math.exp %42 : vector<128x256xf32>
    %cst_19 = arith.constant 1.000000e+00 : f32
    %44 = vector.broadcast %cst_19 : f32 to vector<128x256xf32>
    %45 = arith.addf %44, %43 : vector<128x256xf32>
    %46 = arith.divf %44, %45 : vector<128x256xf32>
    %47 = arith.mulf %41, %46 : vector<128x256xf32>
    %48 = vector.extract_strided_slice %47 {offsets = [0, 0], sizes = [64, 256], strides = [1, 1]} : vector<128x256xf32> to vector<64x256xf32>
    %49 = vector.extract_strided_slice %47 {offsets = [64, 0], sizes = [64, 256], strides = [1, 1]} : vector<128x256xf32> to vector<64x256xf32>
    %50 = arith.addf %48, %49 : vector<64x256xf32>
    %51 = arith.truncf %50 : vector<64x256xf32> to vector<64x256xbf16>
    %c128 = arith.constant 128 : index
    %c0_20 = arith.constant 0 : index
    %52 = vector.load %arg10[%c128, %c0_20] : memref<256x256xbf16, #tpu.memory_space<vmem>>, vector<64x256xbf16>
    tpu.vector_store %arg10[%c128, %c0_20], %51 {strides = array<i32>} : memref<256x256xbf16, #tpu.memory_space<vmem>>, vector<64x256xbf16>,
    %c0_21 = arith.constant 0 : index
    %c0_22 = arith.constant 0 : index
    %c0_23 = arith.constant 0 : index
    %53 = vector.load %arg4[%c0_21, %c0_22, %c0_23] : memref<2x32x256xf32, #tpu.memory_space<vmem>>, vector<2x32x256xf32>
    %54 = vector.shape_cast %53 : vector<2x32x256xf32> to vector<64x256xf32>
    %55 = arith.truncf %54 : vector<64x256xf32> to vector<64x256xbf16>
    %cst_24 = arith.constant dense<0.000000e+00> : vector<128x256xf32>
    %56 = tpu.matmul %0, %55, %cst_24 {dimension_numbers = #tpu.dot_dimension_numbers<[1], [0], [0], [1], [0, 0, 1, 1], [], []>} : vector<128x64xbf16>, vector<64x256xbf16>, vector<128x256xf32> -> vector<128x256xf32>
    %57 = vector.broadcast %1 : vector<128x1xf32> to vector<128x256xf32>
    %58 = arith.addf %56, %57 : vector<128x256xf32>
    %59 = arith.negf %58 : vector<128x256xf32>
    %60 = math.exp %59 : vector<128x256xf32>
    %cst_25 = arith.constant 1.000000e+00 : f32
    %61 = vector.broadcast %cst_25 : f32 to vector<128x256xf32>
    %62 = arith.addf %61, %60 : vector<128x256xf32>
    %63 = arith.divf %61, %62 : vector<128x256xf32>
    %64 = arith.mulf %58, %63 : vector<128x256xf32>
    %65 = vector.extract_strided_slice %64 {offsets = [0, 0], sizes = [64, 256], strides = [1, 1]} : vector<128x256xf32> to vector<64x256xf32>
    %66 = vector.extract_strided_slice %64 {offsets = [64, 0], sizes = [64, 256], strides = [1, 1]} : vector<128x256xf32> to vector<64x256xf32>
    %67 = arith.addf %65, %66 : vector<64x256xf32>
    %68 = arith.truncf %67 : vector<64x256xf32> to vector<64x256xbf16>
    %c192 = arith.constant 192 : index
    %c0_26 = arith.constant 0 : index
    %69 = vector.load %arg10[%c192, %c0_26] : memref<256x256xbf16, #tpu.memory_space<vmem>>, vector<64x256xbf16>
    tpu.vector_store %arg10[%c192, %c0_26], %68 {strides = array<i32>} : memref<256x256xbf16, #tpu.memory_space<vmem>>, vector<64x256xbf16>,
    %c0_27 = arith.constant 0 : index
    %c0_28 = arith.constant 0 : index
    %70 = vector.load %arg7[%c0_27, %c0_28] : memref<128x256xbf16, #tpu.memory_space<vmem>>, vector<128x256xbf16>
    %c0_29 = arith.constant 0 : index
    %c0_30 = arith.constant 0 : index
    %71 = vector.load %arg10[%c0_29, %c0_30] : memref<256x256xbf16, #tpu.memory_space<vmem>>, vector<256x256xbf16>
    %cst_31 = arith.constant dense<0.000000e+00> : vector<128x256xf32>
    %72 = tpu.matmul %70, %71, %cst_31 {dimension_numbers = #tpu.dot_dimension_numbers<[1], [0], [0], [1], [0, 0, 1, 1], [], []>} : vector<128x256xbf16>, vector<256x256xbf16>, vector<128x256xf32> -> vector<128x256xf32>
    %c0_32 = arith.constant 0 : index
    %c0_33 = arith.constant 0 : index
    %73 = vector.load %arg8[%c0_32, %c0_33] : memref<128x1xf32, #tpu.memory_space<vmem>>, vector<128x1xf32>
    %74 = vector.broadcast %73 : vector<128x1xf32> to vector<128x256xf32>
    %75 = arith.addf %72, %74 : vector<128x256xf32>
    %76 = tpu.transpose %75, [1, 0] : vector<128x256xf32> -> vector<256x128xf32>
    %c0_34 = arith.constant 0 : index
    %c0_35 = arith.constant 0 : index
    %77 = vector.load %arg9[%c0_34, %c0_35] : memref<256x128xf32, #tpu.memory_space<vmem>>, vector<256x128xf32>
    tpu.vector_store %arg9[%c0_34, %c0_35], %76 {strides = array<i32>} : memref<256x128xf32, #tpu.memory_space<vmem>>, vector<256x128xf32>,
    return
  }
  func.func @transform_0(%arg0: i32) -> (i32, i32, i32) {
    %c0_i32 = arith.constant 0 : i32
    %c1_i32 = arith.constant 1 : i32
    %c0_i32_0 = arith.constant 0 : i32
    return %c0_i32, %c1_i32, %arg0 : i32, i32, i32
  }
  func.func @transform_1(%arg0: i32) -> (i32, i32, i32) {
    %c0_i32 = arith.constant 0 : i32
    %c2_i32 = arith.constant 2 : i32
    %c0_i32_0 = arith.constant 0 : i32
    return %c0_i32, %c2_i32, %arg0 : i32, i32, i32
  }
  func.func @transform_2(%arg0: i32) -> (i32, i32, i32) {
    %c0_i32 = arith.constant 0 : i32
    %c3_i32 = arith.constant 3 : i32
    %c0_i32_0 = arith.constant 0 : i32
    return %c0_i32, %c3_i32, %arg0 : i32, i32, i32
  }
  func.func @transform_3(%arg0: i32) -> (i32, i32, i32) {
    %c0_i32 = arith.constant 0 : i32
    %c4_i32 = arith.constant 4 : i32
    %c0_i32_0 = arith.constant 0 : i32
    return %c0_i32, %c4_i32, %arg0 : i32, i32, i32
  }
  func.func @transform_4(%arg0: i32) -> (i32, i32) {
    %c0_i32 = arith.constant 0 : i32
    %c0_i32_0 = arith.constant 0 : i32
    %c0_i32_1 = arith.constant 0 : i32
    return %c0_i32, %c0_i32_0 : i32, i32
  }
  func.func @transform_5(%arg0: i32) -> (i32, i32) {
    %c0_i32 = arith.constant 0 : i32
    %c0_i32_0 = arith.constant 0 : i32
    %c0_i32_1 = arith.constant 0 : i32
    return %c0_i32, %c0_i32_0 : i32, i32
  }
  func.func @transform_6(%arg0: i32) -> (i32, i32) {
    %c0_i32 = arith.constant 0 : i32
    %c0_i32_0 = arith.constant 0 : i32
    %c0_i32_1 = arith.constant 0 : i32
    return %c0_i32, %c0_i32_0 : i32, i32
  }
  func.func @transform_7(%arg0: i32) -> (i32, i32) {
    %c0_i32 = arith.constant 0 : i32
    %c0_i32_0 = arith.constant 0 : i32
    %c0_i32_1 = arith.constant 0 : i32
    return %c0_i32, %c0_i32_0 : i32, i32
  }
  func.func @transform_8(%arg0: i32) -> (i32, i32) {
    %c0_i32 = arith.constant 0 : i32
    %c0_i32_0 = arith.constant 0 : i32
    return %arg0, %c0_i32 : i32, i32
  }
}

</mosaic_0001>

<bundles_post_ra>
// kernel: tpu_custom_call.1
= control target key start
LH: loop header
LB: loop body
LE: loop exit
PB: predicated region body
PF: predicated region fallthrough
CT: control target
= control target key end

     0   :  { %s6299_s0 = inlined_call_operand.hbm [shape: f32[2,192,512], index: 0, kind: input, shape index: {}]   ;;  %s6300_s1 = inlined_call_operand.hbm [shape: f32[2,192,512], index: 1, kind: input, shape index: {}]   ;;  %s6301_s2 = inlined_call_operand.hbm [shape: f32[2,192,512], index: 2, kind: input, shape index: {}]   ;;  %s6302_s3 = inlined_call_operand.hbm [shape: f32[2,192,512], index: 3, kind: input, shape index: {}]   ;;  %s6303_s4 = inlined_call_operand.vmem [shape: bf16[128,64], index: 4, kind: input, shape index: {}]   ;;  %s6304_s5 = inlined_call_operand.vmem [shape: f32[128,1], index: 5, kind: input, shape index: {}]   ;;  %s6305_s6 = inlined_call_operand.vmem [shape: bf16[128,256], index: 6, kind: input, shape index: {}]   ;;  %s6306_s7 = inlined_call_operand.vmem [shape: f32[128,1], index: 7, kind: input, shape index: {}]   ;;  %s6307_s8 = inlined_call_operand.hbm [shape: f32[512,128], index: 8, kind: output, shape index: {}]  }
   0x1   :  { %6441 = sst [smem:[#allocation144_spill]] %s6299_s0 }
   0x2   :  { %6442 = sst [smem:[#allocation145_spill]] %s6300_s1 }
   0x3   :  { %13 = vsyncpa [#allocation5], 0 }
   0x4   :  { %15 = vsyncpa [#allocation5 + $0x1], 0 }
   0x5   :  { %16 = vsyncpa [#allocation8], 0 }
   0x6   :  { %18 = vsyncpa [#allocation8 + $0x1], 0 }
   0x7   :  { %19 = vsyncpa [#allocation11], 0 }
   0x8   :  { %21 = vsyncpa [#allocation11 + $0x1], 0 }
   0x9   :  { %22 = vsyncpa [#allocation6], 0 }
   0xa   :  { %24 = vsyncpa [#allocation6 + $0x1], 0  ;;  %s4376_s27 = smov 0   ;;  %s4378_s28 = smov 0  }
   0xb   :  { %s4380_s29 = smov 0   ;;  %s4382_s30 = smov 0  }
   0xc LB: > { %6443 = sst [smem:[#allocation29_spill]] %s4293_s29  ;;  %s4397_s9 = sadd.s32 4294967295, %s4297_s30   ;;  %s4297_s30 = sphi %s4382_s30, %s6759_s30   ;;  %s4293_s29 = sphi %s4380_s29, %s6761_s29   ;;  %s4289_s28 = sphi %s4378_s28, %s6763_s28   ;;  %s4285_s27 = sphi %s4376_s27, %s6762_s27  }
   0xd   : > { %s3214_s10 = sadd.s32 4294967294, %s4297_s30   ;;  %s4401_s11 = sadd.s32 1, %s4297_s30  }
   0xe   : > { %6444 = sst [smem:[#allocation30_spill]] %s4401_s11  ;;  %s37_s12 = sadd.s32 1, %s4293_s29 }
   0xf   : > { %s34_s13 = ssub.s32 %s4297_s30, %s4401_s11  ;;  %p44_p0 = scmp.ne.s32.totalorder %s4293_s29, %s4289_s28 }
  0x10   : > { %p35_p1 = scmp.eq.s32.totalorder %s34_s13, 0  ;;  %p45_p2 = scmp.eq.s32.totalorder %s4297_s30, 0 }
  0x11   : > { %p50_p3 = scmp.ne.s32.totalorder %s4289_s28, %s4285_s27  ;;  %p51_p4 = scmp.eq.s32.totalorder %s4397_s9, 0 }
  0x12   : > { %s4413_s14 = scalar_select %p35_p1, %s4293_s29, %s37_s12  }
  0x13   : > { %p4415_p5 = por %p45_p2, %p44_p0  ;;  %p4419_p6 = por %p51_p4, %p50_p3 }
  0x14   : > { %6445 = sst [smem:[#allocation31_spill]] %s4413_s14  ;;  %p236_p7 = scmp.eq.s32.totalorder %s4397_s9, 1 }
  0x15   : > { %p242_p8 = scmp.eq.s32.totalorder %s3214_s10, 1  ;;  %p3216_p11 = scmp.ge.s32.totalorder %s4297_s30, 2 }
  0x16   : > { %p4424_p9 = por %p236_p7, %p44_p0 }
  0x17   : > { %p4428_p10 = por %p242_p8, %p50_p3  ;;  %270 = sbr.rel (%p3216_p11) target bundleno = 83 (0x53), region = 32 }
  0x19   : > { %s6449_s18 = scalar_select %p4428_p10, 1, 0 }
  0x1b   : > { %6450 = sst [smem:[#allocation32_spill]] %s6449_s18 }
  0x1c   : > { %s4436_s19 = sand.u32 1, %s4293_s29   ;;  %s4439_s20 = sshll.u32 %s4297_s30, 8 }
  0x1d   : > { %s4442_s21 = sshll.u32 %s4436_s19, 7  ;;  %s6451_s0 = sld [smem:[#allocation144_spill]] }
  0x1e   : > { %s278_s26 = scalar_lea.vmem [#allocation4], %s4442_s21  ;;  %s4299_s14 = smov 12288  }
  0x1f   : > { %s298_s10 = sshll.u32 %s278_s26, 4  ;;  %3574 = sst [smem:[#allocation14]] (%p4415_p5), %s4299_s14  ;;  %s299_s10 = int_to_ptr.vmem [resolvable:$true] %s298_s10 }
  0x20   : > { %s3573_s12 = scalar_select %p4415_p5, [#allocation0], [#allocation21] }
  0x21   : > { %s4300_s29 = smov 1024   ;;  %s4301_s22 = smov 4  }
  0x22   : > { %s290_s13 = sld [smem:[%s3573_s12]]   ;;  %s4302_s23 = smov 512  }
  0x23   : > { %s3105_s24 = scalar_lea.hbm %s6451_s0, %s4439_s20  ;;  %3575 = sst [smem:[#allocation14 + $0x1]] (%p4415_p5), %s4300_s29 }
  0x24   : > { %s3106_s25 = scalar_lea.hbm %s3105_s24, 2048  ;;  %3576 = sst [smem:[#allocation14 + $0x2]] (%p4415_p5), %s4301_s22 }
  0x25   : > { %3577 = sst [smem:[#allocation14 + $0x3]] (%p4415_p5), %s4302_s23  ;;  %s4303_s24 = smov 256  }
  0x26   : > { %3578 = sst [smem:[#allocation14 + $0x4]] (%p4415_p5), %s4303_s24  ;;  %s4304_s0 = smov 16  }
  0x27   : > { %3579 = sst [smem:[#allocation14 + $0x5]] (%p4415_p5), %s4304_s0  ;;  %s275_s11 = scalar_lea.sflag [#allocation5], %s4436_s19 }
  0x28   : > { %s3220_s26 = sshll.u32 %s290_s13, 26  ;;  %s4305_s18 = smov 131072  }
  0x29   : > { %s3221_s12 = sadd.s32 134217728, %s3220_s26 }
  0x2a   : > { %3580 = dma.general (%p4415_p5), %s3106_s25, 2048, %s299_s10, %s275_s11, %s4305_s18, [#allocation14], %s3221_s12, 0  }
  0x2b   : > { %s321_s29 = sand.u32 1, %s4297_s30   ;;  %s6452_s1 = sld [smem:[#allocation145_spill]] }
  0x2c   : > { %s325_s23 = scalar_lea.vmem [#allocation7], %s4442_s21  ;;  %s4306_s25 = smov 12288  }
  0x2d   : > { %s345_s24 = sshll.u32 %s325_s23, 4  ;;  %3582 = sst [smem:[#allocation16]] (%p4415_p5), %s4306_s25  ;;  %s346_s24 = int_to_ptr.vmem [resolvable:$true] %s345_s24 }
  0x2e   : > { %s3581_s11 = scalar_select %p4415_p5, [#allocation0], [#allocation22] }
  0x2f   : > { %s4307_s10 = smov 1024   ;;  %s4308_s26 = smov 4  }
  0x30   : > { %s337_s18 = sld [smem:[%s3581_s11]]   ;;  %s4309_s12 = smov 512  }
  0x31   : > { %s3112_s13 = scalar_lea.hbm %s6452_s1, %s4439_s20  ;;  %3583 = sst [smem:[#allocation16 + $0x1]] (%p4415_p5), %s4307_s10 }
  0x32   : > { %s3113_s0 = scalar_lea.hbm %s3112_s13, 4096  ;;  %3584 = sst [smem:[#allocation16 + $0x2]] (%p4415_p5), %s4308_s26 }
  0x33   : > { %3585 = sst [smem:[#allocation16 + $0x3]] (%p4415_p5), %s4309_s12  ;;  %s4310_s14 = smov 256  }
  0x34   : > { %3586 = sst [smem:[#allocation16 + $0x4]] (%p4415_p5), %s4310_s14  ;;  %s4311_s13 = smov 16  }
  0x35   : > { %3587 = sst [smem:[#allocation16 + $0x5]] (%p4415_p5), %s4311_s13  ;;  %s322_s11 = scalar_lea.sflag [#allocation8], %s321_s29 }
  0x36   : > { %s3225_s22 = sshll.u32 %s337_s18, 26  ;;  %s4312_s1 = smov 131072  }
  0x37   : > { %s3226_s23 = sadd.s32 134217728, %s3225_s22 }
  0x38   : > { %3588 = dma.general (%p4415_p5), %s3113_s0, 2048, %s346_s24, %s322_s11, %s4312_s1, [#allocation16], %s3226_s23, 0  }
  0x39   : > { %s3119_s26 = scalar_lea.hbm %s6301_s2, %s4439_s20  ;;  %s372_s12 = scalar_lea.vmem [#allocation9], %s4442_s21 }
  0x3a   : > { %s3120_s18 = scalar_lea.hbm %s3119_s26, 6144  ;;  %s392_s14 = sshll.u32 %s372_s12, 4  ;;  %s393_s14 = int_to_ptr.vmem [resolvable:$true] %s392_s14 }
  0x3b   : > { %s3589_s29 = scalar_select %p4415_p5, [#allocation0], [#allocation23] }
  0x3c   : > { %s4313_s0 = smov 12288   ;;  %s4314_s24 = smov 1024  }
  0x3d   : > { %s384_s1 = sld [smem:[%s3589_s29]]   ;;  %s4315_s22 = smov 4  }
  0x3e   : > { %3590 = sst [smem:[#allocation18]] (%p4415_p5), %s4313_s0  ;;  %s4316_s13 = smov 512  }
  0x3f   : > { %3591 = sst [smem:[#allocation18 + $0x1]] (%p4415_p5), %s4314_s24  ;;  %s4317_s23 = smov 256  }
  0x40   : > { %3592 = sst [smem:[#allocation18 + $0x2]] (%p4415_p5), %s4315_s22  ;;  %s4318_s10 = smov 16  }
  0x41   : > { %3593 = sst [smem:[#allocation18 + $0x3]] (%p4415_p5), %s4316_s13  ;;  %s4319_s12 = smov 131072  }
  0x42   : > { %3594 = sst [smem:[#allocation18 + $0x4]] (%p4415_p5), %s4317_s23 }
  0x43   : > { %s3230_s25 = sshll.u32 %s384_s1, 26  ;;  %3595 = sst [smem:[#allocation18 + $0x5]] (%p4415_p5), %s4318_s10 }
  0x44   : > { %s3231_s26 = sadd.s32 134217728, %s3230_s25 }
  0x45   : > { %3596 = dma.general (%p4415_p5), %s3120_s18, 2048, %s393_s14, %s322_s11, %s4319_s12, [#allocation18], %s3231_s26, 0  }
  0x46   : > { %s3126_s24 = scalar_lea.hbm %s6302_s3, %s4439_s20  ;;  %s419_s22 = scalar_lea.vmem [#allocation10], %s4442_s21 }
  0x47   : > { %s3127_s1 = scalar_lea.hbm %s3126_s24, 8192  ;;  %s439_s13 = sshll.u32 %s419_s22, 4  ;;  %s440_s13 = int_to_ptr.vmem [resolvable:$true] %s439_s13 }
  0x48   : > { %s3597_s23 = scalar_select %p4415_p5, [#allocation0], [#allocation24] }
  0x49   : > { %s4320_s11 = smov 12288   ;;  %s4321_s18 = smov 1024  }
  0x4a   : > { %s431_s25 = sld [smem:[%s3597_s23]]   ;;  %s4322_s14 = smov 4  }
  0x4b   : > { %3598 = sst [smem:[#allocation20]] (%p4415_p5), %s4320_s11  ;;  %s4323_s20 = smov 512  }
  0x4c   : > { %3599 = sst [smem:[#allocation20 + $0x1]] (%p4415_p5), %s4321_s18  ;;  %s4324_s21 = smov 256  }
  0x4d   : > { %3600 = sst [smem:[#allocation20 + $0x2]] (%p4415_p5), %s4322_s14  ;;  %s4325_s26 = smov 16  }
  0x4e   : > { %3601 = sst [smem:[#allocation20 + $0x3]] (%p4415_p5), %s4323_s20  ;;  %s416_s29 = scalar_lea.sflag [#allocation11], %s4436_s19 }
  0x4f   : > { %3602 = sst [smem:[#allocation20 + $0x4]] (%p4415_p5), %s4324_s21  ;;  %s4326_s0 = smov 131072  }
  0x50   : > { %s3235_s10 = sshll.u32 %s431_s25, 26  ;;  %3603 = sst [smem:[#allocation20 + $0x5]] (%p4415_p5), %s4325_s26 }
  0x51   : > { %s3236_s12 = sadd.s32 134217728, %s3235_s10 }
  0x52   : > { %3604 = dma.general (%p4415_p5), %s3127_s1, 2048, %s440_s13, %s416_s29, %s4326_s0, [#allocation20], %s3236_s12, 0  }
  0x53 PF: > { %p3237_p12 = scmp.ge.s32.totalorder %s4297_s30, 1  ;;  %p460_p13 = scmp.lt.s32.totalorder %s4297_s30, 3 }
  0x55   : > { %p461_p0 = pnand %p3237_p12, %p460_p13 }
  0x57   : > { %464 = sbr.rel (%p461_p0) target bundleno = 1021 (0x3fd), region = 52 }
  0x5c   : > { %s4534_s24 = sand.u32 1, %s4289_s28  }
  0x5d   : > { %s3238_s22 = sshll.u32 %s4534_s24, 7  ;;  %s467_s23 = scalar_lea.sflag [#allocation5], %s4534_s24 }
  0x5e   : > { %s4538_s25 = scalar_lea.vmem [#allocation4], %s3238_s22 }
  0x5f   : > { %4268 = dma.done.wait (%p4419_p6), %s467_s23, 2048  }
  0x60   : > { %4270 = vsyncadd (%p4419_p6), %s467_s23, 4294965248  ;;  %s475_s15 = sand.u32 1, %s4397_s9   ;;  %s4545_s1 = scalar_lea.vmem [#allocation7], %s3238_s22 }
  0x61   : > { %s476_s19 = scalar_lea.sflag [#allocation8], %s475_s15 }
  0x62   : > { %4272 = dma.done.wait (%p4419_p6), %s476_s19, 4096  }
  0x63   : > { %4274 = vsyncadd (%p4419_p6), %s476_s19, 4294963200  ;;  %s4551_s13 = scalar_lea.vmem [#allocation9], %s3238_s22  ;;  %s494_s11 = scalar_lea.sflag [#allocation11], %s4534_s24 }
  0x64   : > { %s4554_s18 = scalar_lea.vmem [#allocation10], %s3238_s22 }
  0x65   : > { %4276 = dma.done.wait (%p4419_p6), %s494_s11, 2048  }
  0x66   : > { %4278 = vsyncadd (%p4419_p6), %s494_s11, 4294965248  ;;  %v4327_v0 = vmov 0   ;;  %v596_v1 = vld [vmem:[%s4538_s25 + $0x68] sm:$0xff]  ;;  %v598_v2 = vld [vmem:[%s4538_s25 + $0x78] sm:$0xff]  ;;  %vm727_vm0 = vcmask 523264   ;;  %s3242_s12 = sshll.u32 %s4534_s24, 8 }
  0x67   : > { %784 = vmatprep.mubr.bf16.mxu0 %v4327_v0  ;;  %824 = vmatprep.mubr.bf16.mxu1 %v4327_v0  ;;  %v595_v3 = vld [vmem:[%s4538_s25 + $0x60] sm:$0xff]  ;;  %v606_v4 = vpack.c.bf16 %v598_v2, %v596_v1  ;;  %v597_v5 = vld [vmem:[%s4538_s25 + $0x70] sm:$0xff]  ;;  %v592_v6 = vld [vmem:[%s4538_s25 + $0x48] sm:$0xff]  ;;  %s6215_s29 = scalar_lea.vmem [#allocation12], %s3242_s12  ;;  %s3532_s0 = sshll.u32 %s4397_s9, 12 }
  0x68   : > { %3679 = vset.pattern.permute.xlu0 %v4327_v0  ;;  %3680 = vset.pattern.permute.xlu1 %v4327_v0  ;;  %v594_v7 = vld [vmem:[%s4538_s25 + $0x58] sm:$0xff]  ;;  %v605_v8 = vpack.c.bf16 %v597_v5, %v595_v3  ;;  %v591_v10 = vld [vmem:[%s4538_s25 + $0x40] sm:$0xff]  ;;  %v593_v11 = vld [vmem:[%s4538_s25 + $0x50] sm:$0xff]  ;;  %s3067_s22 = sshll.u32 %s6215_s29, 4  ;;  %s6252_s15 = scalar_lea.hbm %s6307_s8, %s3532_s0  ;;  %s6254_s22 = int_to_ptr.vmem [resolvable:$true] %s3067_s22 }
  0x69   : > { %v604_v9 = vpack.c.bf16 %v594_v7, %v592_v6  ;;  %v588_v12 = vld [vmem:[%s4538_s25 + $0x28] sm:$0xff]  ;;  %760 = vmatprep.subr.bf16.mxu0 %v606_v4  ;;  %3565 = vmatprep.subr.bf16.mxu1 %v606_v4  ;;  %v590_v13 = vld [vmem:[%s4538_s25 + $0x38] sm:$0xff]  ;;  %v603_v14 = vpack.c.bf16 %v593_v11, %v591_v10  ;;  %v587_v15 = vld [vmem:[%s4538_s25 + $0x20] sm:$0xff]  ;;  %s3054_s19 = scalar_lea.sflag [#allocation6], %s4534_s24  ;;  %s4328_s9 = smov [#allocation12]  }
  0x6a   : > { %761 = vmatpush1.bf16.msra.mxu0 %v605_v8  ;;  %3569 = vmatpush1.bf16.msra.mxu1 %v605_v8  ;;  %v589_v16 = vld [vmem:[%s4538_s25 + $0x30] sm:$0xff]  ;;  %v602_v17 = vpack.c.bf16 %v590_v13, %v588_v12  ;;  %v584_v18 = vld [vmem:[%s4538_s25 + $0x8] sm:$0xff]  ;;  %v586_v19 = vld [vmem:[%s4538_s25 + $0x18] sm:$0xff] }
  0x6b   : > { %762 = vmatprep.subr.bf16.mxu0 %v604_v9  ;;  %3566 = vmatprep.subr.bf16.mxu1 %v604_v9  ;;  %v601_v20 = vpack.c.bf16 %v589_v16, %v587_v15  ;;  %v583_v21 = vld [vmem:[%s4538_s25] sm:$0xff]  ;;  %v600_v22 = vpack.c.bf16 %v586_v19, %v584_v18  ;;  %v585_v23 = vld [vmem:[%s4538_s25 + $0x10] sm:$0xff]  ;;  %v1174_v24 = vld [vmem:[%s4545_s1 + $0x68] sm:$0xff] }
  0x6c   : > { %v1176_v25 = vld [vmem:[%s4545_s1 + $0x78] sm:$0xff]  ;;  %v599_v26 = vpack.c.bf16 %v585_v23, %v583_v21  ;;  %v1173_v27 = vld [vmem:[%s4545_s1 + $0x60] sm:$0xff]  ;;  %v1175_v31 = vld [vmem:[%s4545_s1 + $0x70] sm:$0xff] }
  0x6d   : > { %v4586_v28 = vld [vmem:[%s6303_s4] sm:$0xff]   ;;  %v1184_v30 = vpack.c.bf16 %v1176_v25, %v1174_v24  ;;  %v1170_v32 = vld [vmem:[%s4545_s1 + $0x48] sm:$0xff]  ;;  %v1172_v33 = vld [vmem:[%s4545_s1 + $0x58] sm:$0xff]  ;;  %v1183_v38 = vpack.c.bf16 %v1175_v31, %v1173_v27 }
  0x6e   : > { %763 = vmatpush1.bf16.msra.mxu0 %v603_v14  ;;  %3570 = vmatpush1.bf16.msra.mxu1 %v603_v14  ;;  %v4591_v29 = vld [vmem:[%s6303_s4 + $0x20] sm:$0xff]   ;;  %v1607_v34 = vld [vmem:[%s4551_s13 + $0x68] sm:$0xff]  ;;  %v1171_v36 = vld [vmem:[%s4545_s1 + $0x50] sm:$0xff]  ;;  %v1182_v43 = vpack.c.bf16 %v1172_v33, %v1170_v32 }
  0x6f   : > { %764 = vmatprep.subr.bf16.mxu0 %v602_v17  ;;  %3567 = vmatprep.subr.bf16.mxu1 %v602_v17  ;;  %v1169_v35 = vld [vmem:[%s4545_s1 + $0x40] sm:$0xff]  ;;  %v1609_v37 = vld [vmem:[%s4551_s13 + $0x78] sm:$0xff]  ;;  %v1608_v41 = vld [vmem:[%s4551_s13 + $0x70] sm:$0xff] }
  0x70   : > { %v1617_v39 = vpack.c.bf16 %v1609_v37, %v1607_v34  ;;  %v1606_v40 = vld [vmem:[%s4551_s13 + $0x60] sm:$0xff]  ;;  %v1603_v42 = vld [vmem:[%s4551_s13 + $0x48] sm:$0xff]  ;;  %v1168_v45 = vld [vmem:[%s4545_s1 + $0x38] sm:$0xff]  ;;  %v1181_v51 = vpack.c.bf16 %v1171_v36, %v1169_v35 }
  0x71   : > { %v1166_v44 = vld [vmem:[%s4545_s1 + $0x28] sm:$0xff]  ;;  %v1605_v46 = vld [vmem:[%s4551_s13 + $0x58] sm:$0xff]  ;;  %v1616_v47 = vpack.c.bf16 %v1608_v41, %v1606_v40  ;;  %v1602_v48 = vld [vmem:[%s4551_s13 + $0x40] sm:$0xff] }
  0x72   : > { %765 = vmatpush1.bf16.msra.mxu0 %v601_v20  ;;  %3571 = vmatpush1.bf16.msra.mxu1 %v601_v20  ;;  %v1615_v49 = vpack.c.bf16 %v1605_v46, %v1603_v42  ;;  %v1604_v50 = vld [vmem:[%s4551_s13 + $0x50] sm:$0xff]  ;;  %v4617_v52 = vld [vmem:[%s6303_s4 + $0x8] sm:$0xff]   ;;  %v1180_v54 = vpack.c.bf16 %v1168_v45, %v1166_v44  ;;  %v1165_v55 = vld [vmem:[%s4545_s1 + $0x20] sm:$0xff] }
  0x73   : > { %766 = vmatprep.subr.bf16.mxu0 %v600_v22  ;;  %3568 = vmatprep.subr.bf16.mxu1 %v600_v22  ;;  %v4622_v53 = vld [vmem:[%s6303_s4 + $0x28] sm:$0xff]   ;;  %v1167_v56 = vld [vmem:[%s4545_s1 + $0x30] sm:$0xff]  ;;  %v1614_v57 = vpack.c.bf16 %v1604_v50, %v1602_v48  ;;  %v1601_v60 = vld [vmem:[%s4551_s13 + $0x38] sm:$0xff] }
  0x74   : > { %v1162_v58 = vld [vmem:[%s4545_s1 + $0x8] sm:$0xff]  ;;  %v1164_v61 = vld [vmem:[%s4545_s1 + $0x18] sm:$0xff]  ;;  %v1598_v62 = vld [vmem:[%s4551_s13 + $0x20] sm:$0xff]  ;;  %v1179_v3 = vpack.c.bf16 %v1167_v56, %v1165_v55 }
  0x75   : > { %v1599_v59 = vld [vmem:[%s4551_s13 + $0x28] sm:$0xff]  ;;  %v1600_v63 = vld [vmem:[%s4551_s13 + $0x30] sm:$0xff]  ;;  %v1597_v2 = vld [vmem:[%s4551_s13 + $0x18] sm:$0xff]  ;;  %v1178_v6 = vpack.c.bf16 %v1164_v61, %v1162_v58 }
  0x76   : > { %767 = vmatpush1.bf16.msra.mxu0 %v599_v26  ;;  %3572 = vmatpush1.bf16.msra.mxu1 %v599_v26  ;;  %v1595_v1 = vld [vmem:[%s4551_s13 + $0x8] sm:$0xff]  ;;  %v1613_v4 = vpack.c.bf16 %v1601_v60, %v1599_v59  ;;  %v573_v5 = vld [vmem:[%s6304_s5 + $0x30] sm:$0xff]  ;;  %v1161_v7 = vld [vmem:[%s4545_s1] sm:$0xff]  ;;  %v1612_v9 = vpack.c.bf16 %v1600_v63, %v1598_v62 }
  0x77   : > { %1193 = vmatprep.subr.bf16.mxu1 %v1184_v30  ;;  %1626 = vmatprep.subr.bf16.mxu0 %v1617_v39  ;;  %v1163_v8 = vld [vmem:[%s4545_s1 + $0x10] sm:$0xff]  ;;  %v1594_v10 = vld [vmem:[%s4551_s13] sm:$0xff]  ;;  %v1611_v11 = vpack.c.bf16 %v1597_v2, %v1595_v1  ;;  %v2040_v13 = vld [vmem:[%s4554_s18 + $0x68] sm:$0xff]  ;;  %s4225_s1 = scalar_lea.vmem %s6254_s22, 4096 }
  0x78   : > { %639 = vperm.xlu0 %3679, %v573_v5   ;;  %v1596_v12 = vld [vmem:[%s4551_s13 + $0x10] sm:$0xff]  ;;  %v2042_v14 = vld [vmem:[%s4554_s18 + $0x78] sm:$0xff]  ;;  %v1177_v16 = vpack.c.bf16 %v1163_v8, %v1161_v7  ;;  %v571_v23 = vld [vmem:[%s6304_s5 + $0x20] sm:$0xff]  ;;  %p4226_p1 = scmp.ne.s32.totalorder %s6254_s22, %s4225_s1  ;;  %s4229_s13 = sshll.u32 %s4328_s9, 4  ;;  %s4230_s13 = int_to_ptr.vmem [resolvable:$false] %s4229_s13 }
  0x79   : > { %3251 = vmatmul.mubr.msk.bf16.vlgmr.msra.gmra.mxu0 %vm727_vm0, %v4586_v28  ;;  %3255 = vmatmul.mubr.msk.bf16.vlgmr.msra.gmra.mxu1 %vm727_vm0, %v4591_v29  ;;  %v581_v15 = vld [vmem:[%s6304_s5 + $0x70] sm:$0xff]  ;;  %v574_v17 = vld [vmem:[%s6304_s5 + $0x38] sm:$0xff]  ;;  %v1610_v18 = vpack.c.bf16 %v1596_v12, %v1594_v10  ;;  %v2050_v19 = vpack.c.bf16 %v2042_v14, %v2040_v13  ;;  %v572_v24 = vld [vmem:[%s6304_s5 + $0x28] sm:$0xff]  ;;  %p4232_p4 = scmp.lt.s32.totalorder %s6254_s22, %s4230_s13 }
  0x7a   : > { %1194 = vmatpush1.bf16.msra.mxu1 %v1183_v38  ;;  %794 = vmatprep.mubr.bf16.mxu0 %v4327_v0  ;;  %v4658_v20 = vld [vmem:[%s6303_s4 + $0x10] sm:$0xff]   ;;  %v582_v22 = vld [vmem:[%s6304_s5 + $0x78] sm:$0xff]  ;;  %v579_v25 = vld [vmem:[%s6304_s5 + $0x60] sm:$0xff]  ;;  %p4227_p2 = pnand %p4226_p1, %p4424_p9 }
  0x7b   : > { %834 = vmatprep.mubr.bf16.mxu1 %v4327_v0  ;;  %1195 = vmatprep.subr.bf16.mxu1 %v1182_v43  ;;  %v4663_v21 = vld [vmem:[%s6303_s4 + $0x30] sm:$0xff]   ;;  %v4686_v26 = vld [vmem:[%s6303_s4 + $0x18] sm:$0xff]   ;;  %v580_v30 = vld [vmem:[%s6304_s5 + $0x68] sm:$0xff] }
  0x7c   : > { %1627 = vmatpush1.bf16.msra.mxu0 %v1616_v47  ;;  %679 = vperm.xlu1 %3680, %v581_v15   ;;  %v4691_v27 = vld [vmem:[%s6303_s4 + $0x38] sm:$0xff]   ;;  %v569_v31 = vld [vmem:[%s6304_s5 + $0x10] sm:$0xff]  ;;  %v2039_v32 = vld [vmem:[%s4554_s18 + $0x60] sm:$0xff]  ;;  %p4228_p3 = pneg %p4227_p2 }
  0x7d   : > { %1628 = vmatprep.subr.bf16.mxu0 %v1615_v49  ;;  %644 = vperm.xlu0 %3679, %v574_v17   ;;  %v2041_v33 = vld [vmem:[%s4554_s18 + $0x70] sm:$0xff]  ;;  %v2036_v34 = vld [vmem:[%s4554_s18 + $0x48] sm:$0xff]  ;;  %v2038_v35 = vld [vmem:[%s4554_s18 + $0x58] sm:$0xff] }
  0x7e   : > { %1196 = vmatpush1.bf16.msra.mxu1 %v1181_v51  ;;  %v570_v36 = vld [vmem:[%s6304_s5 + $0x18] sm:$0xff]  ;;  %v577_v37 = vld [vmem:[%s6304_s5 + $0x50] sm:$0xff]  ;;  %v2049_v38 = vpack.c.bf16 %v2041_v33, %v2039_v32  ;;  %v2048_v39 = vpack.c.bf16 %v2038_v35, %v2036_v34  ;;  %v2035_v40 = vld [vmem:[%s4554_s18 + $0x40] sm:$0xff] }
  0x7f   : > { %1197 = vmatprep.subr.bf16.mxu1 %v1180_v54  ;;  %v2037_v41 = vld [vmem:[%s4554_s18 + $0x50] sm:$0xff]  ;;  %v2032_v42 = vld [vmem:[%s4554_s18 + $0x28] sm:$0xff]  ;;  %v2034_v43 = vld [vmem:[%s4554_s18 + $0x38] sm:$0xff] }
  0x80   : > { %1629 = vmatpush1.bf16.msra.mxu0 %v1614_v57  ;;  %684 = vperm.xlu1 %3680, %v582_v22   ;;  %v578_v44 = vld [vmem:[%s6304_s5 + $0x58] sm:$0xff]  ;;  %v567_v45 = vld [vmem:[%s6304_s5] sm:$0xff]  ;;  %v2047_v46 = vpack.c.bf16 %v2037_v41, %v2035_v40  ;;  %v2046_v47 = vpack.c.bf16 %v2034_v43, %v2032_v42  ;;  %v2033_v49 = vld [vmem:[%s4554_s18 + $0x30] sm:$0xff] }
  0x81   : > { %3252 = vmatmul.mubr.msk.bf16.gmra.mxu0 %vm727_vm0, %v4617_v52  ;;  %3256 = vmatmul.mubr.msk.bf16.gmra.mxu1 %vm727_vm0, %v4622_v53  ;;  %v2031_v48 = vld [vmem:[%s4554_s18 + $0x20] sm:$0xff]  ;;  %v568_v50 = vld [vmem:[%s6304_s5 + $0x8] sm:$0xff]  ;;  %v2030_v55 = vld [vmem:[%s4554_s18 + $0x18] sm:$0xff] }
  0x82   : > { %804 = vmatprep.mubr.bf16.mxu0 %v4327_v0  ;;  %844 = vmatprep.mubr.bf16.mxu1 %v4327_v0  ;;  %v575_v51 = vld [vmem:[%s6304_s5 + $0x40] sm:$0xff]  ;;  %v2028_v54 = vld [vmem:[%s4554_s18 + $0x8] sm:$0xff]  ;;  %v2045_v56 = vpack.c.bf16 %v2033_v49, %v2031_v48  ;;  %v2029_v59 = vld [vmem:[%s4554_s18 + $0x10] sm:$0xff] }
  0x83   : > { %1198 = vmatpush1.bf16.msra.mxu1 %v1179_v3  ;;  %1630 = vmatprep.subr.bf16.mxu0 %v1613_v4  ;;  %v2044_v57 = vpack.c.bf16 %v2030_v55, %v2028_v54  ;;  %v2027_v58 = vld [vmem:[%s4554_s18] sm:$0xff]  ;;  %v576_v60 = vld [vmem:[%s6304_s5 + $0x48] sm:$0xff]  ;;  %v2510_v1 = vld [vmem:[%s6306_s7 + $0x10] sm:$0xff]  ;;  %s4231_s18 = scalar_lea.vmem %s4230_s13, 8192 }
  0x84   : > { %1199 = vmatprep.subr.bf16.mxu1 %v1178_v6  ;;  %1631 = vmatpush1.bf16.msra.mxu0 %v1612_v9  ;;  %v2508_v61 = vld [vmem:[%s6306_s7] sm:$0xff]  ;;  %v2043_v62 = vpack.c.bf16 %v2029_v59, %v2027_v58  ;;  %v2509_v63 = vld [vmem:[%s6306_s7 + $0x8] sm:$0xff]  ;;  %v2511_v2 = vld [vmem:[%s6306_s7 + $0x18] sm:$0xff]  ;;  %p4233_p5 = scmp.lt.s32.totalorder %s4231_s18, %s4225_s1 }
  0x85   : > { %1632 = vmatprep.subr.bf16.mxu0 %v1611_v11  ;;  %629 = vperm.xlu0 %3679, %v571_v23   ;;  %v2512_v3 = vld [vmem:[%s6306_s7 + $0x20] sm:$0xff]  ;;  %v2513_v4 = vld [vmem:[%s6306_s7 + $0x28] sm:$0xff]  ;;  %v2514_v5 = vld [vmem:[%s6306_s7 + $0x30] sm:$0xff] }
  0x86   : > { %634 = vperm.xlu1 %3680, %v572_v24   ;;  %v2515_v6 = vld [vmem:[%s6306_s7 + $0x38] sm:$0xff]  ;;  %v2516_v7 = vld [vmem:[%s6306_s7 + $0x40] sm:$0xff]  ;;  %v2517_v8 = vld [vmem:[%s6306_s7 + $0x48] sm:$0xff]  ;;  %p4234_p6 = por %p4233_p5, %p4232_p4 }
  0x87   : > { %1200 = vmatpush1.bf16.msra.mxu1 %v1177_v16  ;;  %v2518_v9 = vld [vmem:[%s6306_s7 + $0x50] sm:$0xff]  ;;  %v2519_v10 = vld [vmem:[%s6306_s7 + $0x58] sm:$0xff]  ;;  %v2520_v11 = vld [vmem:[%s6306_s7 + $0x60] sm:$0xff] }
  0x88   : > { %1633 = vmatpush1.bf16.msra.mxu0 %v1610_v18  ;;  %2059 = vmatprep.subr.bf16.mxu1 %v2050_v19  ;;  %v2521_v12 = vld [vmem:[%s6306_s7 + $0x68] sm:$0xff]  ;;  %v2522_v13 = vld [vmem:[%s6306_s7 + $0x70] sm:$0xff]  ;;  %v2523_v14 = vld [vmem:[%s6306_s7 + $0x78] sm:$0xff]  ;;  %p4235_p7 = pnand %p4234_p6, %p4228_p3 }
  0x89   : > { %3253 = vmatmul.mubr.msk.bf16.gmra.mxu0 %vm727_vm0, %v4658_v20  ;;  %3257 = vmatmul.mubr.msk.bf16.gmra.mxu1 %vm727_vm0, %v4663_v21 }
  0x8a   : > { %814 = vmatprep.mubr.bf16.mxu0 %v4327_v0  ;;  %854 = vmatprep.mubr.bf16.mxu1 %v4327_v0 }
  0x8b   : > { %669 = vperm.xlu0 %3679, %v579_v25   ;;  %674 = vperm.xlu1 %3680, %v580_v30  }
  0x8f   : > { %619 = vperm.xlu0 %3679, %v569_v31   ;;  %624 = vperm.xlu1 %3680, %v570_v36  }
  0x91   : > { %3254 = vmatmul.mubr.msk.bf16.gmra.mxu0 %vm727_vm0, %v4686_v26  ;;  %3258 = vmatmul.mubr.msk.bf16.gmra.mxu1 %vm727_vm0, %v4691_v27 }
  0x92   : > { %1217 = vmatprep.mubr.bf16.mxu1 %v4327_v0  ;;  %1650 = vmatprep.mubr.bf16.mxu0 %v4327_v0 }
  0x93   : > { %659 = vperm.xlu0 %3679, %v577_v37   ;;  %664 = vperm.xlu1 %3680, %v578_v44  }
  0x97   : > { %609 = vperm.xlu0 %3679, %v567_v45   ;;  %614 = vperm.xlu1 %3680, %v568_v50  }
  0x99   : > { %3299 = vmatmul.mubr.msk.bf16.vlgmr.msra.gmra.mxu1 %vm727_vm0, %v4586_v28  ;;  %3347 = vmatmul.mubr.msk.bf16.vlgmr.msra.gmra.mxu0 %vm727_vm0, %v4586_v28 }
  0x9a   : > { %2060 = vmatpush1.bf16.msra.mxu1 %v2049_v38  ;;  %1227 = vmatprep.mubr.bf16.mxu1 %v4327_v0 }
  0x9b   : > { %1660 = vmatprep.mubr.bf16.mxu0 %v4327_v0  ;;  %2061 = vmatprep.subr.bf16.mxu1 %v2048_v39 }
  0x9c   : > { %649 = vperm.xlu0 %3679, %v575_v51   ;;  %654 = vperm.xlu1 %3680, %v576_v60  }
  0x9e   : > { %2062 = vmatpush1.bf16.msra.mxu1 %v2047_v46 }
  0x9f   : > { %2063 = vmatprep.subr.bf16.mxu1 %v2046_v47 }
  0xa0   : > { %2526 = vperm.xlu0 %3679, %v2508_v61   ;;  %2531 = vperm.xlu1 %3680, %v2509_v63  }
  0xa1   : > { %3300 = vmatmul.mubr.msk.bf16.gmra.mxu1 %vm727_vm0, %v4617_v52  ;;  %3348 = vmatmul.mubr.msk.bf16.gmra.mxu0 %vm727_vm0, %v4617_v52 }
  0xa2   : > { %1237 = vmatprep.mubr.bf16.mxu1 %v4327_v0  ;;  %1670 = vmatprep.mubr.bf16.mxu0 %v4327_v0 }
  0xa3   : > { %2064 = vmatpush1.bf16.msra.mxu1 %v2045_v56 }
  0xa4   : > { %2065 = vmatprep.subr.bf16.mxu1 %v2044_v57  ;;  %2536 = vperm.xlu0 %3679, %v2510_v1  }
  0xa5   : > { %2541 = vperm.xlu1 %3680, %v2511_v2  }
  0xa7   : > { %2066 = vmatpush1.bf16.msra.mxu1 %v2043_v62 }
  0xa8   : > { %2546 = vperm.xlu0 %3679, %v2512_v3  }
  0xa9   : > { %3301 = vmatmul.mubr.msk.bf16.gmra.mxu1 %vm727_vm0, %v4658_v20  ;;  %3349 = vmatmul.mubr.msk.bf16.gmra.mxu0 %vm727_vm0, %v4658_v20 }
  0xaa   : > { %1247 = vmatprep.mubr.bf16.mxu1 %v4327_v0  ;;  %1680 = vmatprep.mubr.bf16.mxu0 %v4327_v0 }
  0xab   : > { %2551 = vperm.xlu1 %3680, %v2513_v4  }
  0xac   : > { %2556 = vperm.xlu0 %3679, %v2514_v5  }
  0xaf   : > { %2561 = vperm.xlu1 %3680, %v2515_v6  }
  0xb0   : > { %2566 = vperm.xlu0 %3679, %v2516_v7  }
  0xb1   : > { %3302 = vmatmul.mubr.msk.bf16.gmra.mxu1 %vm727_vm0, %v4686_v26  ;;  %3350 = vmatmul.mubr.msk.bf16.gmra.mxu0 %vm727_vm0, %v4686_v26 }
  0xb2   : > { %1257 = vmatprep.mubr.bf16.mxu1 %v4327_v0  ;;  %1690 = vmatprep.mubr.bf16.mxu0 %v4327_v0 }
  0xb3   : > { %2571 = vperm.xlu1 %3680, %v2517_v8  }
  0xb4   : > { %2576 = vperm.xlu0 %3679, %v2518_v9  }
  0xb7   : > { %2581 = vperm.xlu1 %3680, %v2519_v10  }
  0xb8   : > { %2586 = vperm.xlu0 %3679, %v2520_v11  }
  0xb9   : > { %3303 = vmatmul.mubr.msk.bf16.gmra.mxu1 %vm727_vm0, %v4591_v29  ;;  %3351 = vmatmul.mubr.msk.bf16.gmra.mxu0 %vm727_vm0, %v4591_v29 }
  0xba   : > { %1267 = vmatprep.mubr.bf16.mxu1 %v4327_v0  ;;  %1700 = vmatprep.mubr.bf16.mxu0 %v4327_v0 }
  0xbb   : > { %2591 = vperm.xlu1 %3680, %v2521_v12  }
  0xbc   : > { %2596 = vperm.xlu0 %3679, %v2522_v13  }
  0xbf   : > { %2601 = vperm.xlu1 %3680, %v2523_v14  }
  0xc1   : > { %3304 = vmatmul.mubr.msk.bf16.gmra.mxu1 %vm727_vm0, %v4622_v53  ;;  %3352 = vmatmul.mubr.msk.bf16.gmra.mxu0 %vm727_vm0, %v4622_v53 }
  0xc2   : > { %1277 = vmatprep.mubr.bf16.mxu1 %v4327_v0  ;;  %1710 = vmatprep.mubr.bf16.mxu0 %v4327_v0 }
  0xc9   : > { %3305 = vmatmul.mubr.msk.bf16.gmra.mxu1 %vm727_vm0, %v4663_v21  ;;  %3353 = vmatmul.mubr.msk.bf16.gmra.mxu0 %vm727_vm0, %v4663_v21 }
  0xca   : > { %1287 = vmatprep.mubr.bf16.mxu1 %v4327_v0  ;;  %1720 = vmatprep.mubr.bf16.mxu0 %v4327_v0 }
  0xd1   : > { %3306 = vmatmul.mubr.msk.bf16.gmra.mxu1 %vm727_vm0, %v4691_v27  ;;  %3354 = vmatmul.mubr.msk.bf16.gmra.mxu0 %vm727_vm0, %v4691_v27 }
  0xd2   : > { %2083 = vmatprep.mubr.bf16.mxu1 %v4327_v0 }
  0xd9   : > { %3395 = vmatmul.mubr.msk.bf16.vlgmr.msra.gmra.mxu1 %vm727_vm0, %v4586_v28 }
  0xda   : > { %2093 = vmatprep.mubr.bf16.mxu1 %v4327_v0 }
  0xe1   : > { %3396 = vmatmul.mubr.msk.bf16.gmra.mxu1 %vm727_vm0, %v4617_v52 }
  0xe2   : > { %2103 = vmatprep.mubr.bf16.mxu1 %v4327_v0 }
  0xe9   : > { %3397 = vmatmul.mubr.msk.bf16.gmra.mxu1 %vm727_vm0, %v4658_v20 }
  0xea   : > { %2113 = vmatprep.mubr.bf16.mxu1 %v4327_v0 }
  0xf1   : > { %3398 = vmatmul.mubr.msk.bf16.gmra.mxu1 %vm727_vm0, %v4686_v26 }
  0xf2   : > { %2123 = vmatprep.mubr.bf16.mxu1 %v4327_v0 }
  0xf3   : > { %v4856_v28 = vpop.permute.xlu0 %639 }
  0xf4   : > { %6453 = vst [vmem:[#allocation33_spill] sm:$0xff] %v4856_v28 }
  0xf7   : > { %v4860_v52 = vpop.permute.xlu1 %679 }
  0xf8   : > { %6454 = vst [vmem:[#allocation34_spill] sm:$0xff] %v4860_v52 }
  0xf9   : > { %3399 = vmatmul.mubr.msk.bf16.gmra.mxu1 %vm727_vm0, %v4591_v29  ;;  %v4862_v29 = vpop.permute.xlu0 %644 }
  0xfa   : > { %2133 = vmatprep.mubr.bf16.mxu1 %v4327_v0  ;;  %6455 = vst [vmem:[#allocation35_spill] sm:$0xff] %v4862_v29 }
  0xfb   : > { %v4864_v15 = vpop.permute.xlu1 %684 }
  0xfc   : > { %6456 = vst [vmem:[#allocation36_spill] sm:$0xff] %v4864_v15 }
 0x100   : > { %v4866_v16 = vpop.permute.xlu0 %629 }
 0x101   : > { %3400 = vmatmul.mubr.msk.bf16.gmra.mxu1 %vm727_vm0, %v4622_v53  ;;  %v4868_v53 = vpop.permute.xlu1 %634 }
 0x102   : > { %2143 = vmatprep.mubr.bf16.mxu1 %v4327_v0  ;;  %6457 = vst [vmem:[#allocation37_spill] sm:$0xff] %v4868_v53 }
 0x106   : > { %v4870_v17 = vpop.permute.xlu0 %669  ;;  %v4872_v18 = vpop.permute.xlu1 %674 }
 0x107   : > { %6458 = vst [vmem:[#allocation38_spill] sm:$0xff] %v4870_v17  ;;  %6459 = vst [vmem:[#allocation39_spill] sm:$0xff] %v4872_v18 }
 0x109   : > { %3401 = vmatmul.mubr.msk.bf16.gmra.mxu1 %vm727_vm0, %v4663_v21 }
 0x10a   : > { %2153 = vmatprep.mubr.bf16.mxu1 %v4327_v0  ;;  %v4874_v0 = vpop.permute.xlu0 %619  ;;  %v4876_v19 = vpop.permute.xlu1 %624 }
 0x10b   : > { %6460 = vst [vmem:[#allocation40_spill] sm:$0xff] %v4874_v0  ;;  %6461 = vst [vmem:[#allocation41_spill] sm:$0xff] %v4876_v19 }
 0x10e   : > { %v4878_v20 = vpop.permute.xlu0 %659  ;;  %v4880_v21 = vpop.permute.xlu1 %664 }
 0x10f   : > { %6462 = vst [vmem:[#allocation42_spill] sm:$0xff] %v4878_v20  ;;  %6463 = vst [vmem:[#allocation43_spill] sm:$0xff] %v4880_v21 }
 0x111   : > { %3402 = vmatmul.mubr.msk.bf16.gmra.mxu1 %vm727_vm0, %v4691_v27 }
 0x112   : > { %v4882_v22 = vpop.permute.xlu0 %609  ;;  %v4884_v23 = vpop.permute.xlu1 %614 }
 0x113   : > { %6464 = vst [vmem:[#allocation44_spill] sm:$0xff] %v4882_v22  ;;  %6465 = vst [vmem:[#allocation45_spill] sm:$0xff] %v4884_v23 }
 0x117   : > { %v4886_v24 = vpop.permute.xlu0 %649  ;;  %v4896_v35 = vpop.permute.xlu1 %654 }
 0x118   : > { %6466 = vst [vmem:[#allocation46_spill] sm:$0xff] %v4886_v24  ;;  %6467 = vst [vmem:[#allocation47_spill] sm:$0xff] %v4896_v35 }
 0x139   : > { %v786_v25 = vpop.f32.mrf.mxu0  ;;  %v826_v26 = vpop.f32.mrf.mxu1 }
 0x13a   : > { %v4889_v27 = vadd.f32 %v786_v25, %v4882_v22  ;;  %v4892_v30 = vadd.f32 %v826_v26, %v4886_v24 }
 0x13b   : > { %v788_v31 = vpop.f32.mrf.mxu0  ;;  %v828_v32 = vpop.f32.mrf.mxu1 }
 0x13c   : > { %v3259_v33 = vmul.f32 -1.442695, %v4889_v27  ;;  %v3275_v34 = vmul.f32 -1.442695, %v4892_v30  ;;  %v4935_v7 = vadd.f32 %v788_v31, %v4882_v22 }
 0x13d   : > { %v790_v36 = vpop.f32.mrf.mxu0  ;;  %v830_v37 = vpop.f32.mrf.mxu1 }
 0x13e   : > { %3713 = vpow2.f32 %v3259_v33  ;;  %v4899_v38 = vadd.f32 %v790_v36, %v4884_v23  ;;  %v4902_v39 = vadd.f32 %v830_v37, %v4896_v35  ;;  %v3260_v14 = vmul.f32 -1.442695, %v4935_v7 }
 0x13f   : > { %3715 = vpow2.f32 %v3275_v34  ;;  %v792_v40 = vpop.f32.mrf.mxu0  ;;  %v4904_v41 = vpop.f32.mrf.mxu1  ;;  %v4945_v37 = vadd.f32 %v828_v32, %v4886_v24 }
 0x140   : > { %v3261_v42 = vmul.f32 -1.442695, %v4899_v38  ;;  %v3277_v43 = vmul.f32 -1.442695, %v4902_v39 }
 0x141   : > { %v796_v44 = vpop.f32.mrf.mxu0  ;;  %v836_v45 = vpop.f32.mrf.mxu1 }
 0x142   : > { %3717 = vpow2.f32 %v3261_v42  ;;  %v4909_v46 = vadd.f32 %v796_v44, %v4874_v0  ;;  %v4912_v47 = vadd.f32 %v836_v45, %v4878_v20 }
 0x143   : > { %3719 = vpow2.f32 %v3277_v43  ;;  %v798_v48 = vpop.f32.mrf.mxu0  ;;  %v4914_v49 = vpop.f32.mrf.mxu1  ;;  %v4948_v43 = vadd.f32 %v792_v40, %v4884_v23  ;;  %v4961_v40 = vadd.f32 %v4904_v41, %v4896_v35 }
 0x144   : > { %v3263_v50 = vmul.f32 -1.442695, %v4909_v46  ;;  %v3279_v51 = vmul.f32 -1.442695, %v4912_v47 }
 0x145   : > { %v800_v54 = vpop.f32.mrf.mxu0  ;;  %v840_v55 = vpop.f32.mrf.mxu1 }
 0x146   : > { %3721 = vpow2.f32 %v3263_v50  ;;  %v4919_v56 = vadd.f32 %v800_v54, %v4876_v19  ;;  %v4922_v57 = vadd.f32 %v840_v55, %v4880_v21 }
 0x147   : > { %3723 = vpow2.f32 %v3279_v51  ;;  %v4924_v58 = vpop.f32.mrf.mxu0  ;;  %v4926_v59 = vpop.f32.mrf.mxu1 }
 0x148   : > { %v3265_v60 = vmul.f32 -1.442695, %v4919_v56  ;;  %v3281_v61 = vmul.f32 -1.442695, %v4922_v57 }
 0x149   : > { %v806_v62 = vpop.f32.mrf.mxu0  ;;  %v846_v63 = vpop.f32.mrf.mxu1 }
 0x14a   : > { %3725 = vpow2.f32 %v3265_v60  ;;  %v4951_v50 = vadd.f32 %v806_v62, %v4866_v16  ;;  %v4954_v54 = vadd.f32 %v846_v63, %v4870_v17  ;;  %v4965_v62 = vadd.f32 %v798_v48, %v4874_v0 }
 0x14b   : > { %v3714_v1 = vpop.eup %3713  ;;  %3727 = vpow2.f32 %v3281_v61  ;;  %v4930_v2 = vpop.f32.mrf.mxu0  ;;  %v3276_v61 = vmul.f32 -1.442695, %v4945_v37 }
 0x14c   : > { %v4932_v3 = vpop.f32.mrf.mxu1  ;;  %v3716_v4 = vpop.eup %3715  ;;  %v961_v5 = vadd.f32 1.0, %v3714_v1  ;;  %v3267_v63 = vmul.f32 -1.442695, %v4951_v50  ;;  %v3283_v41 = vmul.f32 -1.442695, %v4954_v54 }
 0x14d   : > { %v977_v6 = vadd.f32 1.0, %v3716_v4  ;;  %v810_v10 = vpop.f32.mrf.mxu0  ;;  %v3262_v4 = vmul.f32 -1.442695, %v4948_v43 }
 0x14e   : > { %v850_v8 = vpop.f32.mrf.mxu1  ;;  %3729 = vrcp.f32 %v961_v5 }
 0x14f   : > { %v3718_v9 = vpop.eup %3717  ;;  %3731 = vrcp.f32 %v977_v6  ;;  %v4940_v34 = vpop.f32.mrf.mxu0 }
 0x150   : > { %v4937_v11 = vpop.f32.mrf.mxu1  ;;  %v3720_v12 = vpop.eup %3719  ;;  %v963_v13 = vadd.f32 1.0, %v3718_v9  ;;  %v4971_v9 = vadd.f32 %v810_v10, %v4868_v53  ;;  %v3264_v10 = vmul.f32 -1.442695, %v4965_v62 }
 0x151   : > { %v979_v25 = vadd.f32 1.0, %v3720_v12  ;;  %v816_v55 = vpop.f32.mrf.mxu0 }
 0x152   : > { %v856_v26 = vpop.f32.mrf.mxu1  ;;  %3733 = vrcp.f32 %v963_v13  ;;  %v4975_v13 = vadd.f32 %v850_v8, %v4872_v18 }
 0x153   : > { %v3722_v33 = vpop.eup %3721  ;;  %3735 = vrcp.f32 %v979_v25 }
 0x154   : > { %v4942_v31 = vpop.f32.mrf.mxu1  ;;  %v3724_v36 = vpop.eup %3723  ;;  %v965_v42 = vadd.f32 1.0, %v3722_v33  ;;  %3737 = vpow2.f32 %v3260_v14  ;;  %v3278_v33 = vmul.f32 -1.442695, %v4961_v40 }
 0x155   : > { %v981_v44 = vadd.f32 1.0, %v3724_v36  ;;  %v4977_v14 = vpop.f32.mrf.mxu0  ;;  %v4984_v36 = vadd.f32 %v4914_v49, %v4878_v20 }
 0x156   : > { %v860_v45 = vpop.f32.mrf.mxu1  ;;  %3739 = vrcp.f32 %v965_v42  ;;  %v4989_v42 = vadd.f32 %v4924_v58, %v4876_v19  ;;  %v3285_v58 = vmul.f32 -1.442695, %v4975_v13 }
 0x157   : > { %v3726_v51 = vpop.eup %3725  ;;  %3741 = vrcp.f32 %v981_v44  ;;  %v3269_v44 = vmul.f32 -1.442695, %v4971_v9 }
 0x158   : > { %v4956_v60 = vpop.f32.mrf.mxu1  ;;  %v3728_v32 = vpop.eup %3727  ;;  %v967_v1 = vadd.f32 1.0, %v3726_v51  ;;  %v4995_v51 = vadd.f32 %v816_v55, %v4856_v28  ;;  %v3280_v55 = vmul.f32 -1.442695, %v4984_v36 }
 0x159   : > { %v983_v5 = vadd.f32 1.0, %v3728_v32  ;;  %v4998_v32 = vadd.f32 %v856_v26, %v4860_v52  ;;  %v5009_v26 = vadd.f32 %v4926_v59, %v4880_v21  ;;  %v5032_v21 = vadd.f32 %v4930_v2, %v4866_v16 }
 0x15a   : > { %v4967_v6 = vpop.f32.mrf.mxu1  ;;  %3743 = vrcp.f32 %v967_v1 }
 0x15b   : > { %v3730_v12 = vpop.eup %3729  ;;  %3745 = vrcp.f32 %v983_v5  ;;  %6470 = vst [vmem:[#allocation50_spill] sm:$0xff] %v5032_v21 }
 0x15c   : > { %v4979_v48 = vpop.f32.mrf.mxu1  ;;  %v3732_v25 = vpop.eup %3731  ;;  %3747 = vpow2.f32 %v3276_v61  ;;  %v1057_v61 = vmul.f32 %v3730_v12, %v4889_v27 }
 0x15d   : > { %3749 = vpow2.f32 %v3262_v4  ;;  %v1073_v1 = vmul.f32 %v3732_v25, %v4892_v30  ;;  %v820_v4 = vpop.f32.mrf.mxu0  ;;  %v3266_v30 = vmul.f32 -1.442695, %v4989_v42  ;;  %v3271_v25 = vmul.f32 -1.442695, %v4995_v51 }
 0x15e   : > { %v4991_v8 = vpop.f32.mrf.mxu1  ;;  %3751 = vpow2.f32 %v3267_v63 }
 0x15f   : > { %v3734_v49 = vpop.eup %3733  ;;  %3753 = vpow2.f32 %v3283_v41  ;;  %v5020_v35 = vadd.f32 %v1073_v1, %v1057_v61 }
 0x160   : > { %v5003_v5 = vpop.f32.mrf.mxu1  ;;  %v3736_v63 = vpop.eup %3735  ;;  %v1059_v20 = vmul.f32 %v3734_v49, %v4899_v38  ;;  %3755 = vpow2.f32 %v3278_v33  ;;  %v3287_v38 = vmul.f32 -1.442695, %v4998_v32  ;;  %v5018_v33 = vadd.f32 %v820_v4, %v4862_v29 }
 0x161   : > { %v1075_v27 = vmul.f32 %v3736_v63, %v4902_v39  ;;  %3757 = vpow2.f32 %v3264_v10  ;;  %v3738_v41 = vpop.eup %3737  ;;  %6468 = vst [vmem:[#allocation48_spill] sm:$0xff] %v5020_v35  ;;  %v5025_v39 = vadd.f32 %v860_v45, %v4864_v15 }
 0x162   : > { %v5013_v12 = vpop.f32.mrf.mxu1  ;;  %3759 = vpow2.f32 %v3269_v44  ;;  %v3282_v44 = vmul.f32 -1.442695, %v5009_v26  ;;  %v962_v4 = vadd.f32 1.0, %v3738_v41  ;;  %v3273_v1 = vmul.f32 -1.442695, %v5018_v33 }
 0x163   : > { %v3740_v49 = vpop.eup %3739  ;;  %v5022_v59 = vadd.f32 %v1075_v27, %v1059_v20  ;;  %3761 = vpow2.f32 %v3285_v58  ;;  %v5038_v20 = vadd.f32 %v4940_v34, %v4868_v53  ;;  %v3289_v27 = vmul.f32 -1.442695, %v5025_v39 }
 0x164   : > { %v5027_v10 = vpop.f32.mrf.mxu1  ;;  %v3742_v63 = vpop.eup %3741  ;;  %3763 = vpow2.f32 %v3280_v55  ;;  %v1061_v55 = vmul.f32 %v3740_v49, %v4909_v46  ;;  %v3268_v34 = vmul.f32 -1.442695, %v5032_v21 }
 0x165   : > { %6469 = vst [vmem:[#allocation49_spill] sm:$0xff] %v5022_v59  ;;  %3765 = vpow2.f32 %v3266_v30  ;;  %v1077_v2 = vmul.f32 %v3742_v63, %v4912_v47  ;;  %v3270_v47 = vmul.f32 -1.442695, %v5038_v20  ;;  %v822_v59 = vpop.f32.mrf.mxu0 }
 0x166   : > { %v5040_v45 = vpop.f32.mrf.mxu1  ;;  %3767 = vpow2.f32 %v3271_v25  ;;  %v5052_v25 = vadd.f32 %v4937_v11, %v4872_v18 }
 0x167   : > { %v3744_v58 = vpop.eup %3743  ;;  %3769 = vpow2.f32 %v3287_v38  ;;  %v5058_v38 = vadd.f32 %v4977_v14, %v4856_v28  ;;  %v5076_v28 = vpop.f32.mrf.mxu0 }
 0x168   : > { %v5046_v41 = vpop.f32.mrf.mxu1  ;;  %v3746_v30 = vpop.eup %3745  ;;  %v1063_v61 = vmul.f32 %v3744_v58, %v4919_v56  ;;  %3771 = vpow2.f32 %v3282_v44  ;;  %6471 = vst [vmem:[#allocation51_spill] sm:$0xff] %v5052_v25  ;;  %v5062_v44 = vadd.f32 %v1077_v2, %v1061_v55 }
 0x169   : > { %v3748_v35 = vpop.eup %3747  ;;  %3773 = vrcp.f32 %v962_v4  ;;  %v1079_v46 = vmul.f32 %v3746_v30, %v4922_v57  ;;  %6472 = vst [vmem:[#allocation52_spill] sm:$0xff] %v5058_v38  ;;  %v3286_v30 = vmul.f32 -1.442695, %v5052_v25 }
 0x16a   : > { %v5060_v49 = vpop.f32.mrf.mxu1  ;;  %v3750_v56 = vpop.eup %3749  ;;  %3775 = vpow2.f32 %v3273_v1  ;;  %6473 = vst [vmem:[#allocation53_spill] sm:$0xff] %v5062_v44  ;;  %v3272_v1 = vmul.f32 -1.442695, %v5058_v38 }
 0x16b   : > { %v3752_v63 = vpop.eup %3751  ;;  %v5064_v58 = vadd.f32 %v1079_v46, %v1063_v61  ;;  %3777 = vpow2.f32 %v3289_v27  ;;  %v978_v46 = vadd.f32 1.0, %v3748_v35  ;;  %v964_v18 = vadd.f32 1.0, %v3750_v56 }
 0x16c   : > { %v5066_v11 = vpop.f32.mrf.mxu1  ;;  %v3754_v4 = vpop.eup %3753  ;;  %v969_v57 = vadd.f32 1.0, %v3752_v63  ;;  %3779 = vpow2.f32 %v3268_v34 }
 0x16d   : > { %6474 = vst [vmem:[#allocation54_spill] sm:$0xff] %v5064_v58  ;;  %v3756_v14 = vpop.eup %3755  ;;  %v985_v24 = vadd.f32 1.0, %v3754_v4  ;;  %3781 = vpow2.f32 %v3270_v47 }
 0x16e   : > { %v5072_v55 = vpop.f32.mrf.mxu1  ;;  %v3758_v61 = vpop.eup %3757  ;;  %3783 = vrcp.f32 %v969_v57  ;;  %v980_v38 = vadd.f32 1.0, %v3756_v14 }
 0x16f   : > { %v3760_v2 = vpop.eup %3759  ;;  %3785 = vrcp.f32 %v985_v24  ;;  %v966_v25 = vadd.f32 1.0, %v3758_v61 }
 0x170   : > { %v5074_v27 = vpop.f32.mrf.mxu1  ;;  %v3762_v34 = vpop.eup %3761  ;;  %v971_v63 = vadd.f32 1.0, %v3760_v2  ;;  %3787 = vpow2.f32 %v3286_v30 }
 0x171   : > { %v3764_v21 = vpop.eup %3763  ;;  %v987_v4 = vadd.f32 1.0, %v3762_v34  ;;  %3789 = vpow2.f32 %v3272_v1  ;;  %v5082_v2 = vpop.f32.mrf.mxu0 }
 0x172   : > { %v5078_v47 = vpop.f32.mrf.mxu1  ;;  %v3766_v44 = vpop.eup %3765  ;;  %3791 = vrcp.f32 %v971_v63  ;;  %v982_v14 = vadd.f32 1.0, %v3764_v21  ;;  %v5105_v21 = vadd.f32 %v4932_v3, %v4870_v17 }
 0x173   : > { %6475 = vst [vmem:[#allocation55_spill] sm:$0xff] %v5078_v47  ;;  %v3768_v58 = vpop.eup %3767  ;;  %3793 = vrcp.f32 %v987_v4  ;;  %v5090_v4 = vadd.f32 %v4942_v31, %v4860_v52  ;;  %v1656_v61 = vpop.f32.mrf.mxu0 }
 0x174   : > { %v5080_v57 = vpop.f32.mrf.mxu1  ;;  %v3770_v24 = vpop.eup %3769  ;;  %3795 = vrcp.f32 %v978_v46  ;;  %v973_v35 = vadd.f32 1.0, %v3768_v58  ;;  %6480 = vst [vmem:[#allocation60_spill] sm:$0xff] %v5105_v21 }
 0x175   : > { %6476 = vst [vmem:[#allocation56_spill] sm:$0xff] %v5080_v57  ;;  %v3772_v30 = vpop.eup %3771  ;;  %3797 = vrcp.f32 %v964_v18  ;;  %v989_v56 = vadd.f32 1.0, %v3770_v24  ;;  %v5095_v18 = vadd.f32 %v822_v59, %v4862_v29 }
 0x176   : > { %v5084_v34 = vpop.f32.mrf.mxu1  ;;  %v5086_v1 = vpop.eup %3773  ;;  %3799 = vrcp.f32 %v973_v35 }
 0x177   : > { %6477 = vst [vmem:[#allocation57_spill] sm:$0xff] %v5084_v34  ;;  %v3776_v63 = vpop.eup %3775  ;;  %3801 = vrcp.f32 %v989_v56  ;;  %v968_v34 = vadd.f32 1.0, %v3766_v44  ;;  %v5099_v56 = vadd.f32 %v4956_v60, %v4864_v15  ;;  %v3274_v60 = vmul.f32 -1.442695, %v5095_v18 }
 0x178   : > { %v5092_v46 = vpop.f32.mrf.mxu1  ;;  %v3778_v58 = vpop.eup %3777  ;;  %3803 = vrcp.f32 %v980_v38  ;;  %v975_v57 = vadd.f32 1.0, %v3776_v63  ;;  %v3288_v38 = vmul.f32 -1.442695, %v5090_v4 }
 0x179   : > { %6478 = vst [vmem:[#allocation58_spill] sm:$0xff] %v5092_v46  ;;  %v3780_v24 = vpop.eup %3779  ;;  %3805 = vrcp.f32 %v966_v25  ;;  %v991_v35 = vadd.f32 1.0, %v3778_v58  ;;  %v984_v46 = vadd.f32 1.0, %v3772_v30  ;;  %v1658_v63 = vpop.f32.mrf.mxu0  ;;  %v3290_v30 = vmul.f32 -1.442695, %v5099_v56 }
 0x17a   : > { %v5101_v31 = vpop.f32.mrf.mxu1  ;;  %v3782_v52 = vpop.eup %3781  ;;  %3807 = vrcp.f32 %v975_v57  ;;  %v3284_v57 = vmul.f32 -1.442695, %v5105_v21 }
 0x17b   : > { %6479 = vst [vmem:[#allocation59_spill] sm:$0xff] %v5101_v31  ;;  %v3784_v59 = vpop.eup %3783  ;;  %3809 = vrcp.f32 %v991_v35  ;;  %v5117_v35 = vadd.f32 %v4967_v6, %v4882_v22  ;;  %v970_v31 = vadd.f32 1.0, %v3780_v24  ;;  %v972_v47 = vadd.f32 1.0, %v3782_v52  ;;  %v1662_v6 = vpop.f32.mrf.mxu0 }
 0x17c   : > { %v5108_v25 = vpop.f32.mrf.mxu1  ;;  %v3786_v44 = vpop.eup %3785  ;;  %3811 = vrcp.f32 %v982_v14  ;;  %v1065_v14 = vmul.f32 %v3784_v59, %v4951_v50 }
 0x17d   : > { %6481 = vst [vmem:[#allocation61_spill] sm:$0xff] %v5108_v25  ;;  %v3788_v58 = vpop.eup %3787  ;;  %3813 = vrcp.f32 %v968_v34  ;;  %v1081_v25 = vmul.f32 %v3786_v44, %v4954_v54  ;;  %v5133_v54 = vadd.f32 %v4979_v48, %v4882_v22 }
 0x17e   : > { %v5112_v15 = vpop.f32.mrf.mxu1  ;;  %v3790_v3 = vpop.eup %3789  ;;  %3815 = vrcp.f32 %v984_v46  ;;  %v5126_v46 = vadd.f32 %v5076_v28, %v4882_v22  ;;  %v988_v59 = vadd.f32 1.0, %v3788_v58  ;;  %v5141_v28 = vadd.f32 %v5082_v2, %v4882_v22 }
 0x17f   : > { %6482 = vst [vmem:[#allocation62_spill] sm:$0xff] %v5112_v15  ;;  %v3792_v17 = vpop.eup %3791  ;;  %3817 = vpow2.f32 %v3288_v38  ;;  %6483 = vst [vmem:[#allocation63_spill] sm:$0xff] %v5133_v54  ;;  %v974_v52 = vadd.f32 1.0, %v3790_v3  ;;  %v3307_v38 = vmul.f32 -1.442695, %v5117_v35  ;;  %v5156_v2 = vadd.f32 %v1656_v61, %v4884_v23 }
 0x180   : > { %v5121_v34 = vpop.f32.mrf.mxu1  ;;  %v3794_v29 = vpop.eup %3793  ;;  %v1067_v15 = vmul.f32 %v3792_v17, %v4971_v9  ;;  %3819 = vpow2.f32 %v3274_v60  ;;  %6484 = vst [vmem:[#allocation64_spill] sm:$0xff] %v5141_v28  ;;  %v5145_v9 = vadd.f32 %v4991_v8, %v4884_v23  ;;  %v3355_v58 = vmul.f32 -1.442695, %v5126_v46 }
 0x181   : > { %v5128_v21 = vpop.eup %3795  ;;  %v1083_v50 = vmul.f32 %v3794_v29, %v4975_v13  ;;  %3821 = vpow2.f32 %v3290_v30  ;;  %v5147_v13 = vadd.f32 %v1081_v25, %v1065_v14  ;;  %6488 = vst [vmem:[#allocation68_spill] sm:$0xff] %v5156_v2  ;;  %v1664_v30 = vpop.f32.mrf.mxu0  ;;  %v3356_v61 = vmul.f32 -1.442695, %v5141_v28 }
 0x182   : > { %v5135_v24 = vpop.f32.mrf.mxu1  ;;  %v5137_v17 = vpop.eup %3797  ;;  %3823 = vpow2.f32 %v3284_v57  ;;  %6485 = vst [vmem:[#allocation65_spill] sm:$0xff] %v5145_v9  ;;  %v3309_v57 = vmul.f32 -1.442695, %v5145_v9  ;;  %v5174_v14 = vadd.f32 %v1658_v63, %v4884_v23  ;;  %v3357_v22 = vmul.f32 -1.442695, %v5156_v2 }
 0x183   : > { %v3800_v29 = vpop.eup %3799  ;;  %6486 = vst [vmem:[#allocation66_spill] sm:$0xff] %v5147_v13  ;;  %3825 = vrcp.f32 %v970_v31  ;;  %v5149_v48 = vadd.f32 %v1083_v50, %v1067_v15  ;;  %v3308_v15 = vmul.f32 -1.442695, %v5133_v54  ;;  %v5165_v31 = vadd.f32 %v5003_v5, %v4884_v23  ;;  %v1666_v23 = vpop.f32.mrf.mxu0 }
 0x184   : > { %v5152_v44 = vpop.f32.mrf.mxu1  ;;  %v3802_v60 = vpop.eup %3801  ;;  %3827 = vrcp.f32 %v972_v47  ;;  %6490 = vst [vmem:[#allocation70_spill] sm:$0xff] %v5174_v14  ;;  %v5180_v5 = vadd.f32 %v5013_v12, %v4874_v0  ;;  %v5187_v63 = vadd.f32 %v1662_v6, %v4874_v0  ;;  %v3358_v6 = vmul.f32 -1.442695, %v5174_v14 }
 0x185   : > { %6487 = vst [vmem:[#allocation67_spill] sm:$0xff] %v5149_v48  ;;  %v5158_v8 = vpop.eup %3803  ;;  %3829 = vrcp.f32 %v988_v59  ;;  %6489 = vst [vmem:[#allocation69_spill] sm:$0xff] %v5165_v31  ;;  %v1069_v59 = vmul.f32 %v3800_v29, %v4995_v51  ;;  %v1085_v25 = vmul.f32 %v3802_v60, %v4998_v32  ;;  %v3310_v12 = vmul.f32 -1.442695, %v5165_v31  ;;  %v1668_v31 = vpop.f32.mrf.mxu0 }
 0x186   : > { %v5167_v3 = vpop.f32.mrf.mxu1  ;;  %v5169_v47 = vpop.eup %3805  ;;  %3831 = vrcp.f32 %v974_v52  ;;  %6491 = vst [vmem:[#allocation71_spill] sm:$0xff] %v5180_v5  ;;  %6492 = vst [vmem:[#allocation72_spill] sm:$0xff] %v5187_v63  ;;  %v5195_v29 = vadd.f32 %v5027_v10, %v4874_v0  ;;  %v5203_v60 = vadd.f32 %v1664_v30, %v4874_v0  ;;  %v3311_v10 = vmul.f32 -1.442695, %v5180_v5 }
 0x187   : > { %v3808_v50 = vpop.eup %3807  ;;  %3833 = vpow2.f32 %v3307_v38  ;;  %v5226_v5 = vadd.f32 %v1666_v23, %v4876_v19 }
 0x188   : > { %v5182_v13 = vpop.f32.mrf.mxu1  ;;  %v3810_v52 = vpop.eup %3809  ;;  %v1071_v48 = vmul.f32 %v3808_v50, %v5018_v33  ;;  %3835 = vpow2.f32 %v3355_v58  ;;  %6493 = vst [vmem:[#allocation73_spill] sm:$0xff] %v5195_v29  ;;  %6494 = vst [vmem:[#allocation74_spill] sm:$0xff] %v5203_v60 }
 0x189   : > { %v5189_v51 = vpop.eup %3811  ;;  %v1087_v32 = vmul.f32 %v3810_v52, %v5025_v39  ;;  %3837 = vpow2.f32 %v3308_v15  ;;  %v5207_v39 = vadd.f32 %v1085_v25, %v1069_v59  ;;  %v3312_v25 = vmul.f32 -1.442695, %v5195_v29  ;;  %6498 = vst [vmem:[#allocation78_spill] sm:$0xff] %v5226_v5 }
 0x18a   : > { %v5197_v38 = vpop.f32.mrf.mxu1  ;;  %v5199_v33 = vpop.eup %3813  ;;  %3839 = vpow2.f32 %v3356_v61  ;;  %v3359_v61 = vmul.f32 -1.442695, %v5187_v63 }
 0x18b   : > { %v5205_v58 = vpop.eup %3815  ;;  %6495 = vst [vmem:[#allocation75_spill] sm:$0xff] %v5207_v39  ;;  %v5209_v15 = vadd.f32 %v1087_v32, %v1071_v48  ;;  %3841 = vpow2.f32 %v3309_v57  ;;  %v3360_v48 = vmul.f32 -1.442695, %v5203_v60  ;;  %v5221_v57 = vadd.f32 %v5040_v45, %v4876_v19  ;;  %v5234_v60 = vpop.f32.mrf.mxu0 }
 0x18c   : > { %v5212_v50 = vpop.f32.mrf.mxu1  ;;  %v3818_v52 = vpop.eup %3817  ;;  %3843 = vpow2.f32 %v3357_v22 }
 0x18d   : > { %6496 = vst [vmem:[#allocation76_spill] sm:$0xff] %v5209_v15  ;;  %v3820_v14 = vpop.eup %3819  ;;  %3845 = vpow2.f32 %v3310_v12  ;;  %6497 = vst [vmem:[#allocation77_spill] sm:$0xff] %v5221_v57  ;;  %v990_v63 = vadd.f32 1.0, %v3818_v52  ;;  %v5239_v52 = vadd.f32 %v1668_v31, %v4876_v19  ;;  %v3313_v23 = vmul.f32 -1.442695, %v5221_v57 }
 0x18e   : > { %v3822_v59 = vpop.eup %3821  ;;  %3847 = vpow2.f32 %v3358_v6  ;;  %v5223_v32 = vpop.f32.mrf.mxu1  ;;  %v976_v12 = vadd.f32 1.0, %v3820_v14  ;;  %v5232_v6 = vadd.f32 %v5046_v41, %v4876_v19  ;;  %v3361_v41 = vmul.f32 -1.442695, %v5226_v5 }
 0x18f   : > { %v3824_v22 = vpop.eup %3823  ;;  %3849 = vpow2.f32 %v3311_v10  ;;  %v992_v39 = vadd.f32 1.0, %v3822_v59  ;;  %6500 = vst [vmem:[#allocation80_spill] sm:$0xff] %v5239_v52  ;;  %v3362_v31 = vmul.f32 -1.442695, %v5239_v52 }
 0x190   : > { %v5228_v30 = vpop.eup %3825  ;;  %3851 = vpow2.f32 %v3359_v61  ;;  %6499 = vst [vmem:[#allocation79_spill] sm:$0xff] %v5232_v6  ;;  %v5244_v14 = vpop.f32.mrf.mxu1  ;;  %v3314_v59 = vmul.f32 -1.442695, %v5232_v6 }
 0x191   : > { %v5236_v45 = vpop.eup %3827  ;;  %3853 = vpow2.f32 %v3312_v25  ;;  %v1674_v25 = vpop.f32.mrf.mxu0 }
 0x192   : > { %v5241_v10 = vpop.eup %3829  ;;  %3855 = vpow2.f32 %v3360_v48  ;;  %v986_v48 = vadd.f32 1.0, %v3824_v22  ;;  %v5251_v57 = vpop.f32.mrf.mxu1 }
 0x193   : > { %v5246_v61 = vpop.eup %3831  ;;  %3857 = vrcp.f32 %v990_v63  ;;  %v5253_v5 = vpop.f32.mrf.mxu0 }
 0x194   : > { %v3834_v15 = vpop.eup %3833  ;;  %3859 = vrcp.f32 %v976_v12  ;;  %v5255_v52 = vpop.f32.mrf.mxu1 }
 0x195   : > { %v3836_v29 = vpop.eup %3835  ;;  %3861 = vrcp.f32 %v992_v39  ;;  %v1394_v2 = vadd.f32 1.0, %v3834_v15  ;;  %v1058_v15 = vmul.f32 %v5086_v1, %v4935_v7  ;;  %v1062_v7 = vmul.f32 %v5169_v47, %v4965_v62 }
 0x196   : > { %v3838_v19 = vpop.eup %3837  ;;  %3863 = vpow2.f32 %v3313_v23  ;;  %v1827_v9 = vadd.f32 1.0, %v3836_v29  ;;  %v1074_v29 = vmul.f32 %v5128_v21, %v4945_v37  ;;  %v1078_v37 = vmul.f32 %v5189_v51, %v4984_v36  ;;  %v5271_v21 = vpop.f32.mrf.mxu1 }
 0x197   : > { %v3840_v0 = vpop.eup %3839  ;;  %3865 = vpow2.f32 %v3361_v41  ;;  %v1395_v6 = vadd.f32 1.0, %v3838_v19  ;;  %v1080_v62 = vmul.f32 %v5205_v58, %v5009_v26  ;;  %v5292_v26 = vadd.f32 %v1674_v25, %v4866_v16 }
 0x198   : > { %v3842_v63 = vpop.eup %3841  ;;  %3867 = vpow2.f32 %v3314_v59  ;;  %v1828_v39 = vadd.f32 1.0, %v3840_v0  ;;  %v5261_v59 = vpop.f32.mrf.mxu0  ;;  %v1060_v0 = vmul.f32 %v5137_v17, %v4948_v43  ;;  %v1064_v43 = vmul.f32 %v5199_v33, %v4989_v42 }
 0x199   : > { %v3844_v12 = vpop.eup %3843  ;;  %3869 = vpow2.f32 %v3362_v31  ;;  %v1396_v23 = vadd.f32 1.0, %v3842_v63  ;;  %v1076_v31 = vmul.f32 %v5158_v8, %v4961_v40  ;;  %v5277_v40 = vadd.f32 %v5060_v49, %v4866_v16  ;;  %6504 = vst [vmem:[#allocation84_spill] sm:$0xff] %v5292_v26  ;;  %v5294_v58 = vpop.f32.mrf.mxu1 }
 0x19a   : > { %v3846_v28 = vpop.eup %3845  ;;  %3871 = vrcp.f32 %v986_v48  ;;  %v1829_v41 = vadd.f32 1.0, %v3844_v12  ;;  %v5283_v8 = vadd.f32 %v5234_v60, %v4866_v16  ;;  %v5285_v47 = vpop.f32.mrf.mxu0  ;;  %v5296_v60 = vadd.f32 %v1074_v29, %v1058_v15 }
 0x19b   : > { %v3848_v22 = vpop.eup %3847  ;;  %3873 = vrcp.f32 %v1394_v2  ;;  %v1397_v2 = vadd.f32 1.0, %v3846_v28  ;;  %6501 = vst [vmem:[#allocation81_spill] sm:$0xff] %v5277_v40  ;;  %v5298_v63 = vadd.f32 %v1076_v31, %v1060_v0  ;;  %v3315_v12 = vmul.f32 -1.442695, %v5277_v40 }
 0x19c   : > { %v3850_v54 = vpop.eup %3849  ;;  %3875 = vrcp.f32 %v1827_v9  ;;  %v1830_v1 = vadd.f32 1.0, %v3848_v22  ;;  %6502 = vst [vmem:[#allocation82_spill] sm:$0xff] %v5283_v8  ;;  %6505 = vst [vmem:[#allocation85_spill] sm:$0xff] %v5296_v60  ;;  %v5301_v22 = vadd.f32 %v1078_v37, %v1062_v7  ;;  %v1684_v25 = vpop.f32.mrf.mxu0  ;;  %v5309_v15 = vadd.f32 %v5072_v55, %v4868_v53 }
 0x19d   : > { %v3852_v19 = vpop.eup %3851  ;;  %3877 = vrcp.f32 %v1395_v6  ;;  %v1398_v17 = vadd.f32 1.0, %v3850_v54  ;;  %v5289_v54 = vadd.f32 %v5066_v11, %v4866_v16  ;;  %6506 = vst [vmem:[#allocation86_spill] sm:$0xff] %v5298_v63  ;;  %v5303_v11 = vadd.f32 %v1080_v62, %v1064_v43  ;;  %v5320_v7 = vpop.f32.mrf.mxu1 }
 0x19e   : > { %v3854_v48 = vpop.eup %3853  ;;  %3879 = vrcp.f32 %v1828_v39  ;;  %v1831_v36 = vadd.f32 1.0, %v3852_v19  ;;  %6507 = vst [vmem:[#allocation87_spill] sm:$0xff] %v5301_v22  ;;  %6509 = vst [vmem:[#allocation89_spill] sm:$0xff] %v5309_v15  ;;  %v5313_v29 = vadd.f32 %v5253_v5, %v4868_v53  ;;  %v1068_v43 = vmul.f32 %v5236_v45, %v5038_v20  ;;  %v6515_v45 = vld [vmem:[#allocation60_spill] sm:$0xff] }
 0x19f   : > { %v3856_v9 = vpop.eup %3855  ;;  %3881 = vrcp.f32 %v1396_v23  ;;  %v1399_v42 = vadd.f32 1.0, %v3854_v48  ;;  %6503 = vst [vmem:[#allocation83_spill] sm:$0xff] %v5289_v54  ;;  %6508 = vst [vmem:[#allocation88_spill] sm:$0xff] %v5303_v11  ;;  %v3363_v23 = vmul.f32 -1.442695, %v5283_v8  ;;  %v5318_v48 = vadd.f32 %v5074_v27, %v4868_v53  ;;  %v1686_v27 = vpop.f32.mrf.mxu0 }
 0x1a0   : > { %v3858_v28 = vpop.eup %3857  ;;  %3883 = vrcp.f32 %v1829_v41  ;;  %v1832_v33 = vadd.f32 1.0, %v3856_v9  ;;  %v3316_v19 = vmul.f32 -1.442695, %v5289_v54  ;;  %6510 = vst [vmem:[#allocation90_spill] sm:$0xff] %v5313_v29 }
 0x1a1   : > { %v3860_v51 = vpop.eup %3859  ;;  %3885 = vrcp.f32 %v1397_v2  ;;  %v3364_v2 = vmul.f32 -1.442695, %v5292_v26  ;;  %6511 = vst [vmem:[#allocation91_spill] sm:$0xff] %v5318_v48 }
 0x1a2   : > { %v3862_v49 = vpop.eup %3861  ;;  %3887 = vrcp.f32 %v1830_v1  ;;  %v1072_v1 = vmul.f32 %v3860_v51, %v5095_v18 }
 0x1a3   : > { %v3864_v6 = vpop.eup %3863  ;;  %3889 = vrcp.f32 %v1398_v17  ;;  %v1088_v55 = vmul.f32 %v3862_v49, %v5099_v56  ;;  %v6512_v17 = vld [vmem:[#allocation51_spill] sm:$0xff]  ;;  %v1086_v56 = vmul.f32 %v3858_v28, %v5090_v4  ;;  %v3317_v4 = vmul.f32 -1.442695, %v5309_v15  ;;  %v6518_v28 = vld [vmem:[#allocation33_spill] sm:$0xff] }
 0x1a4   : > { %v3866_v39 = vpop.eup %3865  ;;  %3891 = vrcp.f32 %v1831_v36  ;;  %v1400_v31 = vadd.f32 1.0, %v3864_v6  ;;  %v1084_v62 = vmul.f32 %v5241_v10, %v6512_v17  ;;  %v6514_v6 = vld [vmem:[#allocation50_spill] sm:$0xff]  ;;  %v5342_v10 = vadd.f32 %v5261_v59, %v4868_v53  ;;  %v6524_v17 = vld [vmem:[#allocation56_spill] sm:$0xff] }
 0x1a5   : > { %v3868_v41 = vpop.eup %3867  ;;  %3893 = vrcp.f32 %v1399_v42  ;;  %v1833_v9 = vadd.f32 1.0, %v3866_v39  ;;  %v1066_v20 = vmul.f32 %v5228_v30, %v6514_v6  ;;  %v5344_v39 = vpop.f32.mrf.mxu1  ;;  %v3365_v59 = vmul.f32 -1.442695, %v5313_v29  ;;  %v6534_v29 = vld [vmem:[#allocation58_spill] sm:$0xff] }
 0x1a6   : > { %v3870_v0 = vpop.eup %3869  ;;  %3895 = vrcp.f32 %v1832_v33  ;;  %v1401_v36 = vadd.f32 1.0, %v3868_v41  ;;  %v6513_v33 = vld [vmem:[#allocation52_spill] sm:$0xff]  ;;  %6516 = vst [vmem:[#allocation51_spill] sm:$0xff] %v5342_v10  ;;  %v6519_v41 = vld [vmem:[#allocation55_spill] sm:$0xff] }
 0x1a7   : > { %v3872_v37 = vpop.eup %3871  ;;  %3897 = vpow2.f32 %v3315_v12  ;;  %v1070_v18 = vmul.f32 %v5246_v61, %v6513_v33  ;;  %v1834_v51 = vadd.f32 1.0, %v3870_v0  ;;  %v5348_v61 = vadd.f32 %v1088_v55, %v1072_v1  ;;  %v5381_v6 = vpop.f32.mrf.mxu1 }
 0x1a8   : > { %v5324_v5 = vpop.eup %3873  ;;  %3899 = vpow2.f32 %v3363_v23  ;;  %v1082_v12 = vmul.f32 %v3872_v37, %v6515_v45  ;;  %v5357_v0 = vadd.f32 %v1084_v62, %v1068_v43  ;;  %v1688_v37 = vpop.f32.mrf.mxu0  ;;  %v5371_v33 = vadd.f32 %v6524_v17, %v6518_v28  ;;  %v6529_v45 = vld [vmem:[#allocation57_spill] sm:$0xff] }
 0x1a9   : > { %v5330_v42 = vpop.eup %3875  ;;  %3901 = vpow2.f32 %v3316_v19  ;;  %6517 = vst [vmem:[#allocation52_spill] sm:$0xff] %v5348_v61  ;;  %v5353_v19 = vadd.f32 %v6519_v41, %v6518_v28  ;;  %v5366_v55 = vadd.f32 %v1086_v56, %v1070_v18 }
 0x1aa   : > { %v5335_v49 = vpop.eup %3877  ;;  %3903 = vrcp.f32 %v1400_v31  ;;  %6521 = vst [vmem:[#allocation60_spill] sm:$0xff] %v5357_v0  ;;  %v5362_v31 = vadd.f32 %v5285_v47, %v6518_v28  ;;  %6525 = vst [vmem:[#allocation56_spill] sm:$0xff] %v5371_v33  ;;  %v5375_v62 = vadd.f32 %v1082_v12, %v1066_v20  ;;  %v3366_v47 = vmul.f32 -1.442695, %v5342_v10  ;;  %v1692_v17 = vpop.f32.mrf.mxu0 }
 0x1ab   : > { %v5346_v23 = vpop.eup %3879  ;;  %3905 = vrcp.f32 %v1833_v9  ;;  %6520 = vst [vmem:[#allocation50_spill] sm:$0xff] %v5353_v19  ;;  %6523 = vst [vmem:[#allocation92_spill] sm:$0xff] %v5366_v55  ;;  %v3318_v9 = vmul.f32 -1.442695, %v5318_v48  ;;  %v3319_v56 = vmul.f32 -1.442695, %v5353_v19 }
 0x1ac   : > { %v5355_v30 = vpop.eup %3881  ;;  %3907 = vrcp.f32 %v1401_v36  ;;  %6522 = vst [vmem:[#allocation55_spill] sm:$0xff] %v5362_v31  ;;  %6526 = vst [vmem:[#allocation93_spill] sm:$0xff] %v5375_v62  ;;  %v5379_v36 = vadd.f32 %v1684_v25, %v6518_v28  ;;  %v3367_v25 = vmul.f32 -1.442695, %v5362_v31 }
 0x1ad   : > { %v5364_v1 = vpop.eup %3883  ;;  %3909 = vrcp.f32 %v1834_v51  ;;  %v6528_v51 = vld [vmem:[#allocation35_spill] sm:$0xff] }
 0x1ae   : > { %v5373_v43 = vpop.eup %3885  ;;  %3911 = vpow2.f32 %v3364_v2  ;;  %6527 = vst [vmem:[#allocation94_spill] sm:$0xff] %v5379_v36  ;;  %v5388_v41 = vadd.f32 %v6529_v45, %v6528_v51  ;;  %v5396_v12 = vadd.f32 %v1686_v27, %v6528_v51  ;;  %v3320_v45 = vmul.f32 -1.442695, %v5371_v33 }
 0x1af   : > { %v5383_v18 = vpop.eup %3887  ;;  %3913 = vpow2.f32 %v3317_v4  ;;  %v5405_v20 = vadd.f32 %v6534_v29, %v6528_v51  ;;  %v3368_v27 = vmul.f32 -1.442695, %v5379_v36  ;;  %v5413_v26 = vadd.f32 %v1688_v37, %v6528_v51  ;;  %v5415_v4 = vpop.f32.mrf.mxu1 }
 0x1b0   : > { %6530 = vst [vmem:[#allocation57_spill] sm:$0xff] %v5388_v41  ;;  %v5392_v2 = vpop.eup %3889  ;;  %3915 = vpow2.f32 %v3365_v59  ;;  %6532 = vst [vmem:[#allocation96_spill] sm:$0xff] %v5396_v12  ;;  %v3369_v59 = vmul.f32 -1.442695, %v5396_v12 }
 0x1b1   : > { %6531 = vst [vmem:[#allocation95_spill] sm:$0xff] %v5392_v2  ;;  %v5400_v8 = vpop.eup %3891  ;;  %3917 = vpow2.f32 %v3318_v9  ;;  %6535 = vst [vmem:[#allocation58_spill] sm:$0xff] %v5405_v20  ;;  %v3322_v37 = vmul.f32 -1.442695, %v5405_v20  ;;  %v3370_v11 = vmul.f32 -1.442695, %v5413_v26  ;;  %v5429_v0 = vpop.f32.mrf.mxu1 }
 0x1b2   : > { %6533 = vst [vmem:[#allocation97_spill] sm:$0xff] %v5400_v8  ;;  %v5409_v31 = vpop.eup %3893  ;;  %3919 = vpow2.f32 %v3366_v47  ;;  %6536 = vst [vmem:[#allocation98_spill] sm:$0xff] %v5413_v26  ;;  %v3321_v8 = vmul.f32 -1.442695, %v5388_v41  ;;  %v1694_v47 = vpop.f32.mrf.mxu0 }
 0x1b3   : > { %v5417_v9 = vpop.eup %3895  ;;  %3921 = vpow2.f32 %v3319_v56  ;;  %v6539_v56 = vld [vmem:[#allocation59_spill] sm:$0xff] }
 0x1b4   : > { %6537 = vst [vmem:[#allocation99_spill] sm:$0xff] %v5417_v9  ;;  %v3898_v10 = vpop.eup %3897  ;;  %3923 = vpow2.f32 %v3367_v25  ;;  %v6538_v9 = vld [vmem:[#allocation46_spill] sm:$0xff]  ;;  %v1696_v63 = vpop.f32.mrf.mxu0 }
 0x1b5   : > { %v3900_v22 = vpop.eup %3899  ;;  %3925 = vpow2.f32 %v3320_v45  ;;  %v5427_v62 = vadd.f32 %v6539_v56, %v6538_v9  ;;  %v1402_v25 = vadd.f32 1.0, %v3898_v10  ;;  %v5434_v12 = vadd.f32 %v1692_v17, %v6538_v9  ;;  %v6545_v17 = vld [vmem:[#allocation47_spill] sm:$0xff] }
 0x1b6   : > { %v3902_v36 = vpop.eup %3901  ;;  %3927 = vpow2.f32 %v3368_v27  ;;  %v1835_v60 = vadd.f32 1.0, %v3900_v22  ;;  %v6542_v27 = vld [vmem:[#allocation61_spill] sm:$0xff]  ;;  %v5445_v61 = vadd.f32 %v1694_v47, %v6538_v9  ;;  %v6546_v22 = vld [vmem:[#allocation62_spill] sm:$0xff] }
 0x1b7   : > { %v5431_v29 = vpop.eup %3903  ;;  %3929 = vpow2.f32 %v3321_v8  ;;  %v5440_v26 = vadd.f32 %v6542_v27, %v6538_v9  ;;  %v1403_v55 = vadd.f32 1.0, %v3902_v36  ;;  %v3323_v10 = vmul.f32 -1.442695, %v5427_v62 }
 0x1b8   : > { %6540 = vst [vmem:[#allocation59_spill] sm:$0xff] %v5431_v29  ;;  %v5436_v45 = vpop.eup %3905  ;;  %3931 = vpow2.f32 %v3369_v59  ;;  %v5452_v59 = vadd.f32 %v6546_v22, %v6545_v17  ;;  %v3371_v2 = vmul.f32 -1.442695, %v5434_v12  ;;  %v5458_v36 = vadd.f32 %v1696_v63, %v6545_v17 }
 0x1b9   : > { %6541 = vst [vmem:[#allocation100_spill] sm:$0xff] %v5436_v45  ;;  %v5442_v56 = vpop.eup %3907  ;;  %3933 = vpow2.f32 %v3322_v37  ;;  %v5454_v45 = vpop.f32.mrf.mxu1  ;;  %v3324_v37 = vmul.f32 -1.442695, %v5440_v26  ;;  %v3372_v9 = vmul.f32 -1.442695, %v5445_v61 }
 0x1ba   : > { %6543 = vst [vmem:[#allocation61_spill] sm:$0xff] %v5442_v56  ;;  %v5447_v8 = vpop.eup %3909  ;;  %3935 = vpow2.f32 %v3370_v11  ;;  %v5463_v11 = vadd.f32 %v5121_v34, %v6545_v17  ;;  %v3325_v63 = vmul.f32 -1.442695, %v5452_v59  ;;  %v3373_v41 = vmul.f32 -1.442695, %v5458_v36 }
 0x1bb   : > { %6544 = vst [vmem:[#allocation101_spill] sm:$0xff] %v5447_v8  ;;  %v3912_v27 = vpop.eup %3911  ;;  %3937 = vrcp.f32 %v1402_v25  ;;  %v1698_v8 = vpop.f32.mrf.mxu0 }
 0x1bc   : > { %v3914_v47 = vpop.eup %3913  ;;  %3939 = vrcp.f32 %v1835_v60  ;;  %v5467_v25 = vadd.f32 %v1698_v8, %v6545_v17  ;;  %v5470_v20 = vpop.f32.mrf.mxu1  ;;  %v3326_v33 = vmul.f32 -1.442695, %v5463_v11  ;;  %v1836_v17 = vadd.f32 1.0, %v3912_v27 }
 0x1bd   : > { %v3916_v22 = vpop.eup %3915  ;;  %3941 = vrcp.f32 %v1403_v55  ;;  %6547 = vst [vmem:[#allocation62_spill] sm:$0xff] %v5470_v20  ;;  %v1404_v54 = vadd.f32 1.0, %v3914_v47  ;;  %v1702_v27 = vpop.f32.mrf.mxu0 }
 0x1be   : > { %v3918_v15 = vpop.eup %3917  ;;  %3943 = vpow2.f32 %v3323_v10  ;;  %v3374_v19 = vmul.f32 -1.442695, %v5467_v25  ;;  %v5475_v10 = vpop.f32.mrf.mxu1  ;;  %v1837_v40 = vadd.f32 1.0, %v3916_v22 }
 0x1bf   : > { %v3920_v60 = vpop.eup %3919  ;;  %3945 = vpow2.f32 %v3371_v2  ;;  %v1405_v56 = vadd.f32 1.0, %v3918_v15  ;;  %v1704_v22 = vpop.f32.mrf.mxu0 }
 0x1c0   : > { %v3922_v34 = vpop.eup %3921  ;;  %3947 = vpow2.f32 %v3324_v37  ;;  %v1838_v51 = vadd.f32 1.0, %v3920_v60  ;;  %v5489_v28 = vpop.f32.mrf.mxu1 }
 0x1c1   : > { %v3924_v55 = vpop.eup %3923  ;;  %3949 = vpow2.f32 %v3372_v9  ;;  %v6548_v9 = vld [vmem:[#allocation42_spill] sm:$0xff]  ;;  %v1406_v47 = vadd.f32 1.0, %v3922_v34 }
 0x1c2   : > { %v3926_v8 = vpop.eup %3925  ;;  %3951 = vpow2.f32 %v3325_v63  ;;  %v5485_v29 = vadd.f32 %v5135_v24, %v6548_v9  ;;  %v1839_v15 = vadd.f32 1.0, %v3924_v55  ;;  %v5503_v34 = vadd.f32 %v1702_v27, %v6548_v9 }
 0x1c3   : > { %v5477_v48 = vpop.eup %3927  ;;  %3953 = vpow2.f32 %v3373_v41 }
 0x1c4   : > { %v5479_v2 = vpop.eup %3929  ;;  %3955 = vpow2.f32 %v3326_v33  ;;  %6549 = vst [vmem:[#allocation102_spill] sm:$0xff] %v5485_v29  ;;  %v3327_v24 = vmul.f32 -1.442695, %v5485_v29  ;;  %6554 = vst [vmem:[#allocation107_spill] sm:$0xff] %v5503_v34 }
 0x1c5   : > { %v5481_v37 = vpop.eup %3931  ;;  %3957 = vpow2.f32 %v3374_v19 }
 0x1c6   : > { %v5487_v63 = vpop.eup %3933  ;;  %3959 = vrcp.f32 %v1836_v17  ;;  %v5500_v17 = vpop.f32.mrf.mxu1 }
 0x1c7   : > { %v5491_v41 = vpop.eup %3935  ;;  %3961 = vrcp.f32 %v1404_v54  ;;  %6553 = vst [vmem:[#allocation106_spill] sm:$0xff] %v5500_v17 }
 0x1c8   : > { %v5493_v33 = vpop.eup %3937  ;;  %3963 = vrcp.f32 %v1837_v40 }
 0x1c9   : > { %6550 = vst [vmem:[#allocation103_spill] sm:$0xff] %v5493_v33  ;;  %v5495_v19 = vpop.eup %3939  ;;  %3965 = vrcp.f32 %v1405_v56  ;;  %v1706_v56 = vpop.f32.mrf.mxu0 }
 0x1ca   : > { %6551 = vst [vmem:[#allocation104_spill] sm:$0xff] %v5495_v19  ;;  %v5498_v53 = vpop.eup %3941  ;;  %3967 = vrcp.f32 %v1838_v51  ;;  %v5505_v33 = vpop.f32.mrf.mxu1 }
 0x1cb   : > { %6552 = vst [vmem:[#allocation105_spill] sm:$0xff] %v5498_v53  ;;  %v3944_v60 = vpop.eup %3943  ;;  %3969 = vrcp.f32 %v1406_v47  ;;  %6555 = vst [vmem:[#allocation108_spill] sm:$0xff] %v5505_v33  ;;  %v1407_v33 = vadd.f32 1.0, %v3926_v8 }
 0x1cc   : > { %v3946_v20 = vpop.eup %3945  ;;  %3971 = vrcp.f32 %v1839_v15  ;;  %v1410_v54 = vadd.f32 1.0, %v3944_v60  ;;  %v3375_v15 = vmul.f32 -1.442695, %v5503_v34 }
 0x1cd   : > { %v3948_v40 = vpop.eup %3947  ;;  %v1843_v55 = vadd.f32 1.0, %v3946_v20  ;;  %3973 = vpow2.f32 %v3327_v24  ;;  %v5510_v20 = vadd.f32 %v5152_v44, %v6548_v9  ;;  %v5513_v24 = vadd.f32 %v1704_v22, %v6548_v9 }
 0x1ce   : > { %v3950_v19 = vpop.eup %3949  ;;  %3975 = vrcp.f32 %v1410_v54  ;;  %v1411_v29 = vadd.f32 1.0, %v3948_v40  ;;  %v1708_v54 = vpop.f32.mrf.mxu0 }
 0x1cf   : > { %v3952_v51 = vpop.eup %3951  ;;  %3977 = vrcp.f32 %v1843_v55  ;;  %v1844_v53 = vadd.f32 1.0, %v3950_v19  ;;  %6556 = vst [vmem:[#allocation109_spill] sm:$0xff] %v5510_v20  ;;  %6557 = vst [vmem:[#allocation110_spill] sm:$0xff] %v5513_v24  ;;  %v6558_v55 = vld [vmem:[#allocation43_spill] sm:$0xff] }
 0x1d0   : > { %v3954_v17 = vpop.eup %3953  ;;  %3979 = vrcp.f32 %v1411_v29  ;;  %v1412_v47 = vadd.f32 1.0, %v3952_v51  ;;  %v5517_v29 = vadd.f32 %v5167_v3, %v6558_v55  ;;  %v5519_v51 = vpop.f32.mrf.mxu1  ;;  %v5524_v44 = vadd.f32 %v1706_v56, %v6558_v55 }
 0x1d1   : > { %v3956_v60 = vpop.eup %3955  ;;  %3981 = vrcp.f32 %v1844_v53  ;;  %v1845_v27 = vadd.f32 1.0, %v3954_v17  ;;  %v5528_v22 = vadd.f32 %v5182_v13, %v6558_v55  ;;  %v5534_v3 = vadd.f32 %v1708_v54, %v6558_v55 }
 0x1d2   : > { %v3958_v40 = vpop.eup %3957  ;;  %3983 = vrcp.f32 %v1412_v47  ;;  %v1413_v19 = vadd.f32 1.0, %v3956_v60  ;;  %6559 = vst [vmem:[#allocation111_spill] sm:$0xff] %v5517_v29  ;;  %6561 = vst [vmem:[#allocation113_spill] sm:$0xff] %v5524_v44  ;;  %v1840_v47 = vadd.f32 1.0, %v5477_v48  ;;  %v6565_v60 = vld [vmem:[#allocation38_spill] sm:$0xff] }
 0x1d3   : > { %v5521_v53 = vpop.eup %3959  ;;  %3985 = vrcp.f32 %v1845_v27  ;;  %v1846_v17 = vadd.f32 1.0, %v3958_v40  ;;  %6562 = vst [vmem:[#allocation114_spill] sm:$0xff] %v5528_v22  ;;  %6564 = vst [vmem:[#allocation116_spill] sm:$0xff] %v5534_v3  ;;  %v5538_v34 = vadd.f32 %v5212_v50, %v6565_v60  ;;  %v3328_v56 = vmul.f32 -1.442695, %v5510_v20  ;;  %v6568_v40 = vld [vmem:[#allocation39_spill] sm:$0xff] }
 0x1d4   : > { %6560 = vst [vmem:[#allocation112_spill] sm:$0xff] %v5521_v53  ;;  %v5530_v8 = vpop.eup %3961  ;;  %3987 = vrcp.f32 %v1413_v19  ;;  %v5545_v13 = vadd.f32 %v5223_v32, %v6568_v40  ;;  %v3376_v48 = vmul.f32 -1.442695, %v5513_v24  ;;  %v3329_v54 = vmul.f32 -1.442695, %v5517_v29  ;;  %v5555_v19 = vpop.f32.mrf.mxu1  ;;  %v6577_v20 = vld [vmem:[#allocation63_spill] sm:$0xff] }
 0x1d5   : > { %6563 = vst [vmem:[#allocation115_spill] sm:$0xff] %v5530_v8  ;;  %6566 = vst [vmem:[#allocation38_spill] sm:$0xff] %v5538_v34  ;;  %v5540_v27 = vpop.eup %3963  ;;  %3989 = vrcp.f32 %v1846_v17  ;;  %v5553_v50 = vadd.f32 %v5244_v14, %v6568_v40  ;;  %v5562_v32 = vadd.f32 %v5197_v38, %v6565_v60  ;;  %v3330_v14 = vmul.f32 -1.442695, %v5528_v22 }
 0x1d6   : > { %6567 = vst [vmem:[#allocation117_spill] sm:$0xff] %v5540_v27  ;;  %6569 = vst [vmem:[#allocation118_spill] sm:$0xff] %v5545_v13  ;;  %v5547_v53 = vpop.eup %3965  ;;  %3991 = vrcp.f32 %v1407_v33  ;;  %v3377_v27 = vmul.f32 -1.442695, %v5524_v44  ;;  %v6573_v33 = vld [vmem:[#allocation34_spill] sm:$0xff]  ;;  %v1490_v44 = vmul.f32 %v5324_v5, %v5117_v35  ;;  %v1923_v38 = vmul.f32 %v5330_v42, %v5126_v46  ;;  %v5591_v35 = vpop.f32.mrf.mxu1  ;;  %v6578_v5 = vld [vmem:[#allocation64_spill] sm:$0xff] }
 0x1d7   : > { %6570 = vst [vmem:[#allocation119_spill] sm:$0xff] %v5547_v53  ;;  %6571 = vst [vmem:[#allocation120_spill] sm:$0xff] %v5553_v50  ;;  %v5557_v17 = vpop.eup %3967  ;;  %3993 = vpow2.f32 %v3375_v15  ;;  %v5566_v24 = vadd.f32 %v5251_v57, %v6573_v33  ;;  %v3378_v9 = vmul.f32 -1.442695, %v5534_v3  ;;  %v5579_v57 = vpop.f32.mrf.mxu0  ;;  %v5582_v29 = vmul.f32 -1.442695, %v5545_v13 }
 0x1d8   : > { %6572 = vst [vmem:[#allocation121_spill] sm:$0xff] %v5557_v17  ;;  %v5568_v55 = vpop.eup %3969  ;;  %3995 = vrcp.f32 %v1840_v47  ;;  %v3332_v17 = vmul.f32 -1.442695, %v5538_v34  ;;  %v1491_v3 = vmul.f32 %v5335_v49, %v6577_v20  ;;  %v3334_v8 = vmul.f32 -1.442695, %v5553_v50  ;;  %v6579_v49 = vld [vmem:[#allocation65_spill] sm:$0xff] }
 0x1d9   : > { %6574 = vst [vmem:[#allocation122_spill] sm:$0xff] %v5566_v24  ;;  %6575 = vst [vmem:[#allocation123_spill] sm:$0xff] %v5568_v55  ;;  %v5573_v15 = vpop.eup %3971  ;;  %3997 = vpow2.f32 %v3328_v56  ;;  %v1924_v42 = vmul.f32 %v5346_v23, %v6578_v5  ;;  %v1408_v56 = vadd.f32 1.0, %v5479_v2  ;;  %v3335_v13 = vmul.f32 -1.442695, %v5566_v24  ;;  %v6581_v55 = vld [vmem:[#allocation68_spill] sm:$0xff]  ;;  %v5608_v5 = vpop.f32.mrf.mxu0 }
 0x1da   : > { %6576 = vst [vmem:[#allocation124_spill] sm:$0xff] %v5573_v15  ;;  %v3974_v47 = vpop.eup %3973  ;;  %3999 = vpow2.f32 %v3376_v48  ;;  %v5589_v15 = vadd.f32 %v5255_v52, %v6573_v33  ;;  %v1492_v20 = vmul.f32 %v5355_v30, %v6579_v49  ;;  %v1841_v48 = vadd.f32 1.0, %v5481_v37  ;;  %v6580_v52 = vld [vmem:[#allocation36_spill] sm:$0xff]  ;;  %v6582_v30 = vld [vmem:[#allocation69_spill] sm:$0xff]  ;;  %v5614_v49 = vpop.f32.mrf.mxu1 }
 0x1db   : > { %v3976_v46 = vpop.eup %3975  ;;  %4001 = vpow2.f32 %v3329_v54  ;;  %v5602_v34 = vadd.f32 %v5271_v21, %v6580_v52  ;;  %v1925_v23 = vmul.f32 %v5364_v1, %v6581_v55  ;;  %v1409_v2 = vadd.f32 1.0, %v5487_v63  ;;  %v6583_v1 = vld [vmem:[#allocation70_spill] sm:$0xff] }
 0x1dc   : > { %v3978_v22 = vpop.eup %3977  ;;  %4003 = vpow2.f32 %v3377_v27  ;;  %v1493_v37 = vmul.f32 %v5373_v43, %v6582_v30  ;;  %v1506_v27 = vmul.f32 %v3976_v46, %v5427_v62  ;;  %v3336_v21 = vmul.f32 -1.442695, %v5589_v15 }
 0x1dd   : > { %v3980_v50 = vpop.eup %3979  ;;  %v1939_v54 = vmul.f32 %v3978_v22, %v5434_v12  ;;  %4005 = vpow2.f32 %v3330_v14  ;;  %v1926_v63 = vmul.f32 %v5383_v18, %v6583_v1  ;;  %v1842_v12 = vadd.f32 1.0, %v5491_v41  ;;  %v1716_v41 = vpop.f32.mrf.mxu0 }
 0x1de   : > { %v3982_v24 = vpop.eup %3981  ;;  %4007 = vpow2.f32 %v3378_v9  ;;  %v1507_v43 = vmul.f32 %v3980_v50, %v5440_v26  ;;  %v5624_v9 = vadd.f32 %v5294_v58, %v6580_v52 }
 0x1df   : > { %v3984_v53 = vpop.eup %3983  ;;  %4009 = vrcp.f32 %v1408_v56  ;;  %v1940_v55 = vmul.f32 %v3982_v24, %v5445_v61  ;;  %v5626_v46 = vadd.f32 %v1939_v54, %v1923_v38  ;;  %v1414_v56 = vadd.f32 1.0, %v3974_v47 }
 0x1e0   : > { %v3986_v22 = vpop.eup %3985  ;;  %4011 = vrcp.f32 %v1841_v48  ;;  %v1508_v62 = vmul.f32 %v3984_v53, %v5452_v59  ;;  %v5629_v61 = vadd.f32 %v1506_v27, %v1490_v44  ;;  %v5634_v59 = vpop.f32.mrf.mxu1  ;;  %v5643_v47 = vadd.f32 %v1507_v43, %v1491_v3 }
 0x1e1   : > { %v3988_v14 = vpop.eup %3987  ;;  %4013 = vrcp.f32 %v1409_v2  ;;  %6584 = vst [vmem:[#allocation63_spill] sm:$0xff] %v5626_v46  ;;  %v1941_v18 = vmul.f32 %v3986_v22, %v5458_v36  ;;  %v5638_v53 = vadd.f32 %v1940_v55, %v1924_v42  ;;  %v3331_v48 = vmul.f32 -1.442695, %v5562_v32 }
 0x1e2   : > { %v3990_v30 = vpop.eup %3989  ;;  %v5631_v24 = vadd.f32 %v1508_v62, %v1492_v20  ;;  %v1509_v26 = vmul.f32 %v3988_v14, %v5463_v11  ;;  %4015 = vpow2.f32 %v3332_v17  ;;  %v3337_v3 = vmul.f32 -1.442695, %v5602_v34  ;;  %v5657_v2 = vpop.f32.mrf.mxu1 }
 0x1e3   : > { %v5636_v58 = vpop.eup %3991  ;;  %4017 = vrcp.f32 %v1842_v12  ;;  %6585 = vst [vmem:[#allocation64_spill] sm:$0xff] %v5638_v53  ;;  %v5640_v50 = vadd.f32 %v1941_v18, %v1925_v23  ;;  %v1942_v36 = vmul.f32 %v3990_v30, %v5467_v25  ;;  %v1718_v25 = vpop.f32.mrf.mxu0  ;;  %v5675_v30 = vadd.f32 %v5608_v5, %v6565_v60  ;;  %v3691_v5 = vld [vmem:[%s6305_s6 + $0x4] ss:$8 sps:$4 sm:$0xff]  }
 0x1e4   : > { %v3994_v38 = vpop.eup %3993  ;;  %v5647_v20 = vadd.f32 %v1509_v26, %v1493_v37  ;;  %4019 = vpow2.f32 %v3334_v8  ;;  %v5665_v62 = vpop.f32.mrf.mxu1  ;;  %2876 = vmatprep.mubr.bf16.mxu0 %v3691_v5 }
 0x1e5   : > { %6586 = vst [vmem:[#allocation65_spill] sm:$0xff] %v5640_v50  ;;  %v5649_v11 = vpop.eup %3995  ;;  %v5653_v42 = vadd.f32 %v1942_v36, %v1926_v63  ;;  %4021 = vrcp.f32 %v1414_v56  ;;  %v1847_v37 = vadd.f32 1.0, %v3994_v38  ;;  %v3338_v63 = vmul.f32 -1.442695, %v5624_v9  ;;  %v1722_v55 = vpop.f32.mrf.mxu0  ;;  %6590 = vst [vmem:[#allocation125_spill] sm:$0xff] %v5675_v30 }
 0x1e6   : > { %6587 = vst [vmem:[#allocation68_spill] sm:$0xff] %v5649_v11  ;;  %v3998_v23 = vpop.eup %3997  ;;  %4023 = vpow2.f32 %v3335_v13  ;;  %v5680_v38 = vadd.f32 %v1716_v41, %v6568_v40  ;;  %v3380_v41 = vmul.f32 -1.442695, %v5675_v30  ;;  %v5702_v44 = vadd.f32 %v1722_v55, %v6573_v33  ;;  %v6622_v11 = vld [vmem:[#allocation108_spill] sm:$0xff] }
 0x1e7   : > { %6588 = vst [vmem:[#allocation69_spill] sm:$0xff] %v5653_v42  ;;  %v4000_v54 = vpop.eup %3999  ;;  %4025 = vpow2.f32 %v5582_v29  ;;  %v1415_v13 = vadd.f32 1.0, %v3998_v23  ;;  %v5669_v29 = vadd.f32 %v5579_v57, %v6565_v60  ;;  %v6609_v42 = vld [vmem:[#allocation41_spill] sm:$0xff] }
 0x1e8   : > { %v4002_v1 = vpop.eup %4001  ;;  %4027 = vpow2.f32 %v3336_v21  ;;  %v1848_v43 = vadd.f32 1.0, %v4000_v54  ;;  %6592 = vst [vmem:[#allocation127_spill] sm:$0xff] %v5680_v38  ;;  %6595 = vst [vmem:[#allocation130_spill] sm:$0xff] %v5702_v44 }
 0x1e9   : > { %v4004_v12 = vpop.eup %4003  ;;  %4029 = vpow2.f32 %v3331_v48  ;;  %v1416_v18 = vadd.f32 1.0, %v4002_v1  ;;  %6589 = vst [vmem:[#allocation70_spill] sm:$0xff] %v5669_v29  ;;  %v1724_v48 = vpop.f32.mrf.mxu0 }
 0x1ea   : > { %v4006_v22 = vpop.eup %4005  ;;  %4031 = vpow2.f32 %v3337_v3  ;;  %v1849_v21 = vadd.f32 1.0, %v4004_v12  ;;  %v5684_v3 = vpop.f32.mrf.mxu1  ;;  %v3381_v12 = vmul.f32 -1.442695, %v5680_v38 }
 0x1eb   : > { %v4008_v14 = vpop.eup %4007  ;;  %4033 = vrcp.f32 %v1847_v37  ;;  %v1417_v36 = vadd.f32 1.0, %v4006_v22  ;;  %v3379_v37 = vmul.f32 -1.442695, %v5669_v29  ;;  %v6612_v29 = vld [vmem:[#allocation73_spill] sm:$0xff] }
 0x1ec   : > { %v5671_v56 = vpop.eup %4009  ;;  %4035 = vpow2.f32 %v3338_v63  ;;  %v1850_v57 = vadd.f32 1.0, %v4008_v14  ;;  %v5697_v14 = vadd.f32 %v1718_v25, %v6568_v40 }
 0x1ed   : > { %v5677_v26 = vpop.eup %4011  ;;  %4037 = vrcp.f32 %v1415_v13  ;;  %v1726_v13 = vpop.f32.mrf.mxu0 }
 0x1ee   : > { %6591 = vst [vmem:[#allocation126_spill] sm:$0xff] %v5677_v26  ;;  %v5682_v23 = vpop.eup %4013  ;;  %4039 = vrcp.f32 %v1848_v43  ;;  %6594 = vst [vmem:[#allocation129_spill] sm:$0xff] %v5697_v14 }
 0x1ef   : > { %v4016_v54 = vpop.eup %4015  ;;  %4041 = vrcp.f32 %v1416_v18  ;;  %v5699_v18 = vpop.f32.mrf.mxu1 }
 0x1f0   : > { %v5690_v1 = vpop.eup %4017  ;;  %4043 = vrcp.f32 %v1849_v21  ;;  %v1419_v43 = vadd.f32 1.0, %v4016_v54  ;;  %v1728_v8 = vpop.f32.mrf.mxu0 }
 0x1f1   : > { %6593 = vst [vmem:[#allocation128_spill] sm:$0xff] %v5690_v1  ;;  %v4020_v63 = vpop.eup %4019  ;;  %4045 = vrcp.f32 %v1417_v36  ;;  %v5705_v54 = vpop.f32.mrf.mxu1  ;;  %v6632_v1 = vld [vmem:[#allocation59_spill] sm:$0xff] }
 0x1f2   : > { %v5694_v22 = vpop.eup %4021  ;;  %4047 = vrcp.f32 %v1850_v57  ;;  %v1421_v21 = vadd.f32 1.0, %v4020_v63  ;;  %v3382_v57 = vmul.f32 -1.442695, %v5697_v14  ;;  %v5716_v63 = vadd.f32 %v1728_v8, %v6580_v52  ;;  %v6621_v14 = vld [vmem:[#allocation37_spill] sm:$0xff] }
 0x1f3   : > { %v4024_v17 = vpop.eup %4023  ;;  %4049 = vpow2.f32 %v3379_v37  ;;  %v5708_v37 = vadd.f32 %v1724_v48, %v6573_v33  ;;  %v3383_v48 = vmul.f32 -1.442695, %v5702_v44  ;;  %v6647_v33 = vld [vmem:[#allocation57_spill] sm:$0xff] }
 0x1f4   : > { %v4026_v27 = vpop.eup %4025  ;;  %4051 = vpow2.f32 %v3380_v41  ;;  %v1422_v36 = vadd.f32 1.0, %v4024_v17  ;;  %v5711_v41 = vadd.f32 %v1726_v13, %v6580_v52  ;;  %6599 = vst [vmem:[#allocation134_spill] sm:$0xff] %v5716_v63  ;;  %v1504_v40 = vmul.f32 %v5671_v56, %v6647_v33  ;;  %v6652_v56 = vld [vmem:[#allocation118_spill] sm:$0xff] }
 0x1f5   : > { %v4028_v5 = vpop.eup %4027  ;;  %4053 = vpow2.f32 %v3381_v12  ;;  %v1420_v53 = vadd.f32 1.0, %v4026_v27  ;;  %6596 = vst [vmem:[#allocation131_spill] sm:$0xff] %v5708_v37  ;;  %v6600_v12 = vld [vmem:[#allocation44_spill] sm:$0xff] }
 0x1f6   : > { %v4030_v46 = vpop.eup %4029  ;;  %4055 = vrcp.f32 %v1419_v43  ;;  %v1423_v25 = vadd.f32 1.0, %v4028_v5  ;;  %6597 = vst [vmem:[#allocation132_spill] sm:$0xff] %v5711_v41  ;;  %v5720_v43 = vadd.f32 %v5320_v7, %v6600_v12  ;;  %v5725_v13 = vadd.f32 %v5344_v39, %v6600_v12 }
 0x1f7   : > { %v4032_v50 = vpop.eup %4031  ;;  %4057 = vrcp.f32 %v1421_v21  ;;  %v1418_v27 = vadd.f32 1.0, %v4030_v46  ;;  %v5737_v46 = vpop.f32.mrf.mxu1  ;;  %v5742_v39 = vmul.f32 -1.442695, %v5708_v37  ;;  %v5745_v12 = vmul.f32 -1.442695, %v5711_v41  ;;  %v6631_v37 = vld [vmem:[#allocation77_spill] sm:$0xff] }
 0x1f8   : > { %v5713_v17 = vpop.eup %4033  ;;  %4059 = vrcp.f32 %v1423_v25  ;;  %v1424_v55 = vadd.f32 1.0, %v4032_v50  ;;  %6601 = vst [vmem:[#allocation44_spill] sm:$0xff] %v5720_v43  ;;  %6602 = vst [vmem:[#allocation135_spill] sm:$0xff] %v5725_v13  ;;  %v6603_v25 = vld [vmem:[#allocation45_spill] sm:$0xff]  ;;  %v5798_v41 = vadd.f32 %v6622_v11, %v6621_v14 }
 0x1f9   : > { %6598 = vst [vmem:[#allocation133_spill] sm:$0xff] %v5713_v17  ;;  %v4036_v5 = vpop.eup %4035  ;;  %4061 = vrcp.f32 %v1422_v36  ;;  %v5731_v8 = vadd.f32 %v5381_v6, %v6603_v25  ;;  %v5735_v7 = vadd.f32 %v5415_v4, %v6603_v25  ;;  %v5754_v4 = vmul.f32 -1.442695, %v5716_v63  ;;  %v6635_v63 = vld [vmem:[#allocation61_spill] sm:$0xff] }
 0x1fa   : > { %v5727_v21 = vpop.eup %4037  ;;  %4063 = vrcp.f32 %v1424_v55  ;;  %v1425_v50 = vadd.f32 1.0, %v4036_v5  ;;  %v6607_v55 = vld [vmem:[#allocation40_spill] sm:$0xff]  ;;  %v3403_v25 = vmul.f32 -1.442695, %v5720_v43  ;;  %6623 = vst [vmem:[#allocation37_spill] sm:$0xff] %v5798_v41 }
 0x1fb   : > { %6604 = vst [vmem:[#allocation45_spill] sm:$0xff] %v5731_v8  ;;  %6605 = vst [vmem:[#allocation136_spill] sm:$0xff] %v5735_v7  ;;  %v5739_v36 = vpop.eup %4039  ;;  %4065 = vrcp.f32 %v1420_v53  ;;  %v5749_v5 = vadd.f32 %v5454_v45, %v6607_v55  ;;  %v5759_v53 = vadd.f32 %v5475_v10, %v6609_v42  ;;  %v3404_v45 = vmul.f32 -1.442695, %v5725_v13 }
 0x1fc   : > { %6606 = vst [vmem:[#allocation137_spill] sm:$0xff] %v5739_v36  ;;  %v5751_v6 = vpop.eup %4041  ;;  %4067 = vrcp.f32 %v1425_v50  ;;  %v5765_v36 = vmul.f32 %v5409_v31, %v6612_v29  ;;  %v5770_v50 = vadd.f32 %v5429_v0, %v6607_v55  ;;  %v3405_v30 = vmul.f32 -1.442695, %v5731_v8  ;;  %v5780_v31 = vpop.f32.mrf.mxu1  ;;  %v6616_v0 = vld [vmem:[#allocation62_spill] sm:$0xff] }
 0x1fd   : > { %6608 = vst [vmem:[#allocation40_spill] sm:$0xff] %v5749_v5  ;;  %6610 = vst [vmem:[#allocation41_spill] sm:$0xff] %v5759_v53  ;;  %v5761_v17 = vpop.eup %4043  ;;  %4069 = vrcp.f32 %v1418_v27  ;;  %v3406_v10 = vmul.f32 -1.442695, %v5735_v7  ;;  %v3408_v27 = vmul.f32 -1.442695, %v5749_v5  ;;  %v5787_v55 = vadd.f32 %v6616_v0, %v6609_v42 }
 0x1fe   : > { %6611 = vst [vmem:[#allocation138_spill] sm:$0xff] %v5761_v17  ;;  %6613 = vst [vmem:[#allocation73_spill] sm:$0xff] %v5770_v50  ;;  %v5772_v38 = vpop.eup %4045  ;;  %4071 = vpow2.f32 %v3382_v57  ;;  %v5778_v17 = vadd.f32 %v5489_v28, %v4866_v16  ;;  %v6618_v57 = vld [vmem:[#allocation106_spill] sm:$0xff]  ;;  %v3410_v28 = vmul.f32 -1.442695, %v5759_v53  ;;  %v6625_v42 = vld [vmem:[#allocation33_spill] sm:$0xff] }
 0x1ff   : > { %v5782_v29 = vpop.eup %4047  ;;  %4073 = vpow2.f32 %v3383_v48  ;;  %6617 = vst [vmem:[#allocation62_spill] sm:$0xff] %v5787_v55  ;;  %v5791_v44 = vadd.f32 %v6618_v57, %v4866_v16  ;;  %v5802_v48 = vadd.f32 %v5519_v51, %v6621_v14  ;;  %v5806_v0 = vadd.f32 %v5555_v19, %v6625_v42  ;;  %v6643_v8 = vld [vmem:[#allocation50_spill] sm:$0xff] }
 0x200   : > { %6614 = vst [vmem:[#allocation139_spill] sm:$0xff] %v5778_v17  ;;  %6615 = vst [vmem:[#allocation140_spill] sm:$0xff] %v5782_v29  ;;  %v5793_v26 = vpop.eup %4049  ;;  %4075 = vpow2.f32 %v3403_v25  ;;  %v5810_v16 = vadd.f32 %v5591_v35, %v6625_v42  ;;  %v6628_v25 = vld [vmem:[#allocation35_spill] sm:$0xff]  ;;  %v5820_v51 = vmul.f32 %v6632_v1, %v6631_v37  ;;  %v3411_v14 = vmul.f32 -1.442695, %v5778_v17 }
 0x201   : > { %6619 = vst [vmem:[#allocation106_spill] sm:$0xff] %v5791_v44  ;;  %6620 = vst [vmem:[#allocation141_spill] sm:$0xff] %v5793_v26  ;;  %v4052_v29 = vpop.eup %4051  ;;  %4077 = vpow2.f32 %v3404_v45  ;;  %v5814_v57 = vadd.f32 %v5614_v49, %v6628_v25  ;;  %v5825_v19 = vadd.f32 %v5634_v59, %v6628_v25  ;;  %v5827_v45 = vpop.f32.mrf.mxu1  ;;  %v6634_v42 = vld [vmem:[#allocation79_spill] sm:$0xff]  ;;  %v3407_v5 = vmul.f32 -1.442695, %v5770_v50  ;;  %v6636_v50 = vld [vmem:[#allocation81_spill] sm:$0xff] }
 0x202   : > { %6624 = vst [vmem:[#allocation108_spill] sm:$0xff] %v5802_v48  ;;  %6626 = vst [vmem:[#allocation33_spill] sm:$0xff] %v5806_v0  ;;  %v5816_v11 = vpop.eup %4053  ;;  %4079 = vpow2.f32 %v3405_v30  ;;  %v5831_v49 = vmul.f32 %v6635_v63, %v6634_v42  ;;  %v3412_v1 = vmul.f32 -1.442695, %v5791_v44  ;;  %v3409_v30 = vmul.f32 -1.442695, %v5787_v55 }
 0x203   : > { %6627 = vst [vmem:[#allocation142_spill] sm:$0xff] %v5810_v16  ;;  %6629 = vst [vmem:[#allocation35_spill] sm:$0xff] %v5814_v57  ;;  %v4056_v35 = vpop.eup %4055  ;;  %4081 = vpow2.f32 %v3406_v10  ;;  %v3413_v17 = vmul.f32 -1.442695, %v5798_v41  ;;  %v3414_v59 = vmul.f32 -1.442695, %v5802_v48 }
 0x204   : > { %6630 = vst [vmem:[#allocation143_spill] sm:$0xff] %v5816_v11  ;;  %6633 = vst [vmem:[#allocation77_spill] sm:$0xff] %v5825_v19  ;;  %v4058_v37 = vpop.eup %4057  ;;  %4083 = vpow2.f32 %v3408_v27  ;;  %v3415_v53 = vmul.f32 -1.442695, %v5806_v0  ;;  %v5840_v63 = vmul.f32 -1.442695, %v5810_v16 }
 0x205   : > { %v4060_v25 = vpop.eup %4059  ;;  %4085 = vpow2.f32 %v3410_v28  ;;  %v5843_v10 = vmul.f32 -1.442695, %v5814_v57  ;;  %v6637_v44 = vld [vmem:[#allocation103_spill] sm:$0xff]  ;;  %v6639_v55 = vld [vmem:[#allocation105_spill] sm:$0xff]  ;;  %v5850_v41 = vmul.f32 -1.442695, %v5825_v19  ;;  %v5852_v28 = vpop.f32.mrf.mxu1 }
 0x206   : > { %v4062_v42 = vpop.eup %4061  ;;  %v1498_v27 = vmul.f32 %v6637_v44, %v6636_v50  ;;  %v6638_v26 = vld [vmem:[#allocation83_spill] sm:$0xff]  ;;  %4087 = vpow2.f32 %v3411_v14  ;;  %6640 = vst [vmem:[#allocation59_spill] sm:$0xff] %v5852_v28  ;;  %v6645_v11 = vld [vmem:[#allocation56_spill] sm:$0xff] }
 0x207   : > { %v1499_v7 = vmul.f32 %v6639_v55, %v6638_v26  ;;  %v4064_v0 = vpop.eup %4063  ;;  %v6641_v48 = vld [vmem:[#allocation91_spill] sm:$0xff]  ;;  %v1503_v52 = vmul.f32 %v5636_v58, %v6645_v11  ;;  %4089 = vpow2.f32 %v3412_v1  ;;  %v6646_v50 = vld [vmem:[#allocation120_spill] sm:$0xff]  ;;  %v1519_v55 = vmul.f32 %v4060_v25, %v5589_v15  ;;  %v6650_v11 = vld [vmem:[#allocation38_spill] sm:$0xff] }
 0x208   : > { %v6642_v16 = vld [vmem:[#allocation119_spill] sm:$0xff]  ;;  %v4066_v44 = vpop.eup %4065  ;;  %v1517_v26 = vmul.f32 %v4058_v37, %v6646_v50  ;;  %v1520_v14 = vmul.f32 %v4064_v0, %v5602_v34  ;;  %4091 = vpow2.f32 %v3413_v17  ;;  %v1515_v1 = vmul.f32 %v4056_v35, %v6650_v11  ;;  %v5871_v34 = vpop.f32.mrf.mxu1  ;;  %v6651_v0 = vld [vmem:[#allocation114_spill] sm:$0xff] }
 0x209   : > { %v1501_v13 = vmul.f32 %v6642_v16, %v6641_v48  ;;  %v6644_v57 = vld [vmem:[#allocation123_spill] sm:$0xff]  ;;  %v4068_v19 = vpop.eup %4067  ;;  %v1852_v48 = vadd.f32 1.0, %v4052_v29  ;;  %v6648_v16 = vld [vmem:[#allocation122_spill] sm:$0xff]  ;;  %4093 = vpow2.f32 %v3414_v59  ;;  %v1513_v33 = vmul.f32 %v5772_v38, %v6651_v0 }
 0x20a   : > { %v1502_v43 = vmul.f32 %v6644_v57, %v6643_v8  ;;  %v1518_v28 = vmul.f32 %v4062_v42, %v6648_v16  ;;  %v4070_v8 = vpop.eup %4069  ;;  %v6649_v57 = vld [vmem:[#allocation58_spill] sm:$0xff]  ;;  %4095 = vpow2.f32 %v5742_v39  ;;  %v1521_v15 = vmul.f32 %v4068_v19, %v5624_v9  ;;  %v6653_v39 = vld [vmem:[#allocation89_spill] sm:$0xff]  ;;  %v6654_v19 = vld [vmem:[#allocation115_spill] sm:$0xff] }
 0x20b   : > { %v1505_v58 = vmul.f32 %v5682_v23, %v6649_v57  ;;  %v5873_v17 = vpop.eup %4071  ;;  %v1516_v29 = vmul.f32 %v4066_v44, %v6652_v56  ;;  %v1536_v37 = vadd.f32 %v1520_v14, %v1504_v40  ;;  %4097 = vpow2.f32 %v5745_v12  ;;  %v6655_v44 = vld [vmem:[#allocation109_spill] sm:$0xff]  ;;  %v6658_v11 = vld [vmem:[#allocation71_spill] sm:$0xff] }
 0x20c   : > { %v5879_v59 = vpop.eup %4073  ;;  %v1533_v23 = vadd.f32 %v1517_v26, %v1501_v13  ;;  %v1535_v35 = vadd.f32 %v1519_v55, %v1503_v52  ;;  %4099 = vpow2.f32 %v5754_v4  ;;  %v1500_v42 = vmul.f32 %v6654_v19, %v6653_v39  ;;  %v5887_v13 = vpop.f32.mrf.mxu1  ;;  %v6656_v26 = vld [vmem:[#allocation111_spill] sm:$0xff] }
 0x20d   : > { %v1537_v25 = vadd.f32 %v1521_v15, %v1505_v58  ;;  %v4076_v9 = vpop.eup %4075  ;;  %v1514_v50 = vmul.f32 %v4070_v8, %v5562_v32  ;;  %4101 = vrcp.f32 %v1852_v48  ;;  %v1534_v38 = vadd.f32 %v1518_v28, %v1502_v43 }
 0x20e   : > { %v4078_v16 = vpop.eup %4077  ;;  %v1511_v40 = vmul.f32 %v5727_v21, %v6655_v44  ;;  %v1531_v12 = vadd.f32 %v1515_v1, %v1499_v7  ;;  %4103 = vpow2.f32 %v3407_v5  ;;  %v1512_v4 = vmul.f32 %v5751_v6, %v6656_v26  ;;  %v6657_v7 = vld [vmem:[#allocation102_spill] sm:$0xff]  ;;  %v6659_v1 = vld [vmem:[#allocation95_spill] sm:$0xff] }
 0x20f   : > { %v3548_v14 = vpack.c.bf16 %v1537_v25, %v1535_v35  ;;  %v4080_v52 = vpop.eup %4079  ;;  %v1532_v55 = vadd.f32 %v1516_v29, %v1500_v42  ;;  %v3547_v57 = vpack.c.bf16 %v1536_v37, %v1534_v38  ;;  %4105 = vpow2.f32 %v3409_v30  ;;  %v6660_v25 = vld [vmem:[#allocation46_spill] sm:$0xff] }
 0x210   : > { %v4082_v58 = vpop.eup %4081  ;;  %v1529_v32 = vadd.f32 %v1513_v33, %v5831_v49  ;;  %v2260_v43 = vadd.f32 1.0, %v4076_v9  ;;  %4107 = vpow2.f32 %v3415_v53  ;;  %v3546_v28 = vpack.c.bf16 %v1533_v23, %v1531_v12  ;;  %v5899_v53 = vpop.f32.mrf.mxu1 }
 0x211   : > { %2844 = vmatprep.subr.bf16.mxu0 %v3548_v14  ;;  %v4084_v21 = vpop.eup %4083  ;;  %v1510_v5 = vmul.f32 %v5694_v22, %v6657_v7  ;;  %v1530_v48 = vadd.f32 %v1514_v50, %v1498_v27  ;;  %v2261_v8 = vadd.f32 1.0, %v4078_v16  ;;  %4109 = vpow2.f32 %v5840_v63  ;;  %v6661_v16 = vld [vmem:[#allocation47_spill] sm:$0xff] }
 0x212   : > { %2845 = vmatpush1.bf16.msra.mxu0 %v3547_v57  ;;  %v4086_v6 = vpop.eup %4085  ;;  %v1494_v30 = vmul.f32 %v6659_v1, %v6658_v11  ;;  %v1527_v15 = vadd.f32 %v1511_v40, %v5765_v36  ;;  %v2262_v49 = vadd.f32 1.0, %v4080_v52  ;;  %4111 = vpow2.f32 %v5843_v10  ;;  %v6662_v52 = vld [vmem:[#allocation42_spill] sm:$0xff] }
 0x213   : > { %2846 = vmatprep.subr.bf16.mxu0 %v3546_v28  ;;  %v4088_v0 = vpop.eup %4087  ;;  %v1528_v22 = vadd.f32 %v1512_v4, %v5820_v51  ;;  %v3545_v27 = vpack.c.bf16 %v1532_v55, %v1530_v48  ;;  %v2263_v33 = vadd.f32 1.0, %v4082_v58  ;;  %4113 = vpow2.f32 %v5850_v41  ;;  %v2155_v51 = vpop.f32.mrf.mxu1  ;;  %v6667_v48 = vld [vmem:[#allocation52_spill] sm:$0xff] }
 0x214   : > { %v4090_v63 = vpop.eup %4089  ;;  %4115 = vrcp.f32 %v2260_v43  ;;  %v2265_v56 = vadd.f32 1.0, %v4084_v21  ;;  %v3544_v29 = vpack.c.bf16 %v1529_v32, %v1527_v15  ;;  %v1526_v23 = vadd.f32 %v1510_v5, %v1494_v30  ;;  %v6664_v32 = vld [vmem:[#allocation43_spill] sm:$0xff] }
 0x215   : > { %v4092_v37 = vpop.eup %4091  ;;  %4117 = vrcp.f32 %v2261_v8  ;;  %v2267_v36 = vadd.f32 1.0, %v4086_v6  ;;  %v2268_v35 = vadd.f32 1.0, %v4088_v0  ;;  %v5905_v9 = vadd.f32 %v5657_v2, %v6660_v25  ;;  %v2157_v4 = vpop.f32.mrf.mxu1  ;;  %v6668_v8 = vld [vmem:[#allocation92_spill] sm:$0xff]  ;;  %v6670_v15 = vld [vmem:[#allocation39_spill] sm:$0xff] }
 0x216   : > { %2847 = vmatpush1.bf16.msra.mxu0 %v3545_v27  ;;  %v4094_v10 = vpop.eup %4093  ;;  %4119 = vrcp.f32 %v2262_v49  ;;  %v3543_v41 = vpack.c.bf16 %v1528_v22, %v1526_v23  ;;  %v2269_v19 = vadd.f32 1.0, %v4090_v63  ;;  %v5911_v42 = vadd.f32 %v5665_v62, %v6660_v25  ;;  %v6676_v23 = vld [vmem:[#allocation93_spill] sm:$0xff] }
 0x217   : > { %2848 = vmatprep.subr.bf16.mxu0 %v3544_v29  ;;  %v5907_v39 = vpop.eup %4095  ;;  %4121 = vrcp.f32 %v2263_v33  ;;  %v2270_v38 = vadd.f32 1.0, %v4092_v37  ;;  %v5917_v44 = vadd.f32 %v5684_v3, %v6661_v16  ;;  %v2271_v40 = vadd.f32 1.0, %v4094_v10  ;;  %v2159_v11 = vpop.f32.mrf.mxu1  ;;  %v6675_v37 = vld [vmem:[#allocation60_spill] sm:$0xff] }
 0x218   : > { %v5913_v50 = vpop.eup %4097  ;;  %4123 = vrcp.f32 %v2265_v56  ;;  %v5923_v12 = vadd.f32 %v5699_v18, %v6661_v16  ;;  %v3419_v62 = vmul.f32 -1.442695, %v5905_v9  ;;  %v5930_v26 = vadd.f32 %v5705_v54, %v6662_v52 }
 0x219   : > { %v5919_v2 = vpop.eup %4099  ;;  %4125 = vrcp.f32 %v2267_v36  ;;  %v6663_v3 = vpack.c.bf16 %v5647_v20, %v5643_v47  ;;  %v3420_v18 = vmul.f32 -1.442695, %v5911_v42  ;;  %v5940_v57 = vadd.f32 %v5737_v46, %v6662_v52  ;;  %v2161_v10 = vpop.f32.mrf.mxu1  ;;  %v6680_v52 = vld [vmem:[#allocation66_spill] sm:$0xff] }
 0x21a   : > { %2849 = vmatpush1.bf16.msra.mxu0 %v3543_v41  ;;  %v5925_v14 = vpop.eup %4101  ;;  %4127 = vrcp.f32 %v2268_v35  ;;  %v3421_v54 = vmul.f32 -1.442695, %v5917_v44  ;;  %v5947_v43 = vadd.f32 %v5780_v31, %v6664_v32  ;;  %v3422_v20 = vmul.f32 -1.442695, %v5923_v12  ;;  %v6666_v31 = vld [vmem:[#allocation59_spill] sm:$0xff] }
 0x21b   : > { %2850 = vmatprep.subr.bf16.mxu0 %v6663_v3  ;;  %v5935_v55 = vpop.eup %4103  ;;  %4129 = vrcp.f32 %v2269_v19  ;;  %v5954_v28 = vadd.f32 %v5827_v45, %v6664_v32  ;;  %v6665_v46 = vpack.c.bf16 %v5631_v24, %v5629_v61  ;;  %v3423_v7 = vmul.f32 -1.442695, %v5930_v26  ;;  %v6682_v32 = vld [vmem:[#allocation88_spill] sm:$0xff] }
 0x21c   : > { %v5942_v58 = vpop.eup %4105  ;;  %4131 = vrcp.f32 %v2270_v38  ;;  %v5964_v5 = vadd.f32 %v6666_v31, %v6565_v60  ;;  %v6669_v6 = vpack.c.bf16 %v6667_v48, %v6668_v8  ;;  %v3424_v61 = vmul.f32 -1.442695, %v5940_v57 }
 0x21d   : > { %v5949_v47 = vpop.eup %4107  ;;  %4133 = vrcp.f32 %v2271_v40  ;;  %v5974_v24 = vadd.f32 %v5871_v34, %v6565_v60  ;;  %v3425_v30 = vmul.f32 -1.442695, %v5947_v43  ;;  %v5981_v49 = vadd.f32 %v5887_v13, %v6670_v15  ;;  %v6671_v60 = vld [vmem:[#allocation76_spill] sm:$0xff]  ;;  %v6672_v34 = vld [vmem:[#allocation75_spill] sm:$0xff]  ;;  %v6674_v13 = vld [vmem:[#allocation34_spill] sm:$0xff] }
 0x21e   : > { %2851 = vmatpush1.bf16.msra.mxu0 %v6665_v46  ;;  %v5959_v21 = vpop.eup %4109  ;;  %4135 = vpow2.f32 %v3419_v62  ;;  %v3426_v22 = vmul.f32 -1.442695, %v5954_v28  ;;  %v5988_v27 = vadd.f32 %v5899_v53, %v6670_v15  ;;  %v6673_v33 = vpack.c.bf16 %v6671_v60, %v6672_v34  ;;  %v6679_v62 = vld [vmem:[#allocation67_spill] sm:$0xff]  ;;  %v6688_v60 = vld [vmem:[#allocation86_spill] sm:$0xff]  ;;  %v6689_v34 = vld [vmem:[#allocation85_spill] sm:$0xff] }
 0x21f   : > { %2852 = vmatprep.subr.bf16.mxu0 %v6669_v6  ;;  %v5969_v45 = vpop.eup %4111  ;;  %4137 = vpow2.f32 %v3420_v18  ;;  %v3427_v56 = vmul.f32 -1.442695, %v5964_v5  ;;  %v5997_v29 = vadd.f32 %v2155_v51, %v6674_v13  ;;  %v6677_v36 = vpack.c.bf16 %v6675_v37, %v6676_v23  ;;  %v6678_v51 = vld [vmem:[#allocation36_spill] sm:$0xff] }
 0x220   : > { %v5976_v1 = vpop.eup %4113  ;;  %4139 = vpow2.f32 %v3421_v54  ;;  %v3428_v53 = vmul.f32 -1.442695, %v5974_v24  ;;  %v6006_v25 = vadd.f32 %v2157_v4, %v6674_v13  ;;  %v3429_v19 = vmul.f32 -1.442695, %v5981_v49 }
 0x221   : > { %v5983_v0 = vpop.eup %4115  ;;  %4141 = vpow2.f32 %v3422_v20  ;;  %v6012_v38 = vadd.f32 %v2159_v11, %v6678_v51  ;;  %v3430_v40 = vmul.f32 -1.442695, %v5988_v27  ;;  %v6681_v3 = vpack.c.bf16 %v6679_v62, %v6680_v52  ;;  %v6683_v20 = vld [vmem:[#allocation87_spill] sm:$0xff] }
 0x222   : > { %2853 = vmatpush1.bf16.msra.mxu0 %v6673_v33  ;;  %v5993_v63 = vpop.eup %4117  ;;  %4143 = vpow2.f32 %v3423_v7  ;;  %v6021_v4 = vadd.f32 %v2161_v10, %v6678_v51  ;;  %v3431_v54 = vmul.f32 -1.442695, %v5997_v29  ;;  %v6684_v46 = vpack.c.bf16 %v6682_v32, %v6683_v20  ;;  %v6691_v10 = vld [vmem:[#allocation49_spill] sm:$0xff] }
 0x223   : > { %2854 = vmatprep.subr.bf16.mxu0 %v6677_v36  ;;  %v6002_v35 = vpop.eup %4119  ;;  %4145 = vpow2.f32 %v3424_v61  ;;  %v3432_v31 = vmul.f32 -1.442695, %v6006_v25  ;;  %v3433_v8 = vmul.f32 -1.442695, %v6012_v38  ;;  %v6685_v61 = vld [vmem:[#allocation54_spill] sm:$0xff]  ;;  %v6690_v33 = vpack.c.bf16 %v6688_v60, %v6689_v34 }
 0x224   : > { %v6008_v41 = vpop.eup %4121  ;;  %4147 = vpow2.f32 %v3425_v30  ;;  %v3434_v11 = vmul.f32 -1.442695, %v6021_v4  ;;  %v6686_v30 = vld [vmem:[#allocation53_spill] sm:$0xff]  ;;  %v2274_v20 = vadd.f32 1.0, %v5969_v45 }
 0x225   : > { %v6014_v16 = vpop.eup %4123  ;;  %4149 = vpow2.f32 %v3426_v22  ;;  %v6687_v15 = vpack.c.bf16 %v6685_v61, %v6686_v30 }
 0x226   : > { %2855 = vmatpush1.bf16.msra.mxu0 %v6681_v3  ;;  %v6023_v18 = vpop.eup %4125  ;;  %4151 = vpow2.f32 %v3427_v56  ;;  %v2273_v3 = vadd.f32 1.0, %v5959_v21 }
 0x227   : > { %2856 = vmatprep.subr.bf16.mxu0 %v6684_v46  ;;  %v6029_v7 = vpop.eup %4127  ;;  %4153 = vpow2.f32 %v3428_v53  ;;  %v6692_v53 = vld [vmem:[#allocation48_spill] sm:$0xff] }
 0x228   : > { %v6032_v48 = vpop.eup %4129  ;;  %4155 = vpow2.f32 %v3429_v19  ;;  %v6693_v19 = vpack.c.bf16 %v6691_v10, %v6692_v53 }
 0x229   : > { %v6035_v6 = vpop.eup %4131  ;;  %4157 = vpow2.f32 %v3430_v40  ;;  %v2272_v40 = vadd.f32 1.0, %v5949_v47 }
 0x22a   : > { %2857 = vmatpush1.bf16.msra.mxu0 %v6687_v15  ;;  %v6041_v22 = vpop.eup %4133  ;;  %4159 = vpow2.f32 %v3431_v54 }
 0x22b   : > { %2858 = vmatprep.subr.bf16.mxu0 %v6690_v33  ;;  %v4136_v56 = vpop.eup %4135  ;;  %4161 = vpow2.f32 %v3432_v31  ;;  %v2275_v31 = vadd.f32 1.0, %v5976_v1 }
 0x22c   : > { %v4138_v13 = vpop.eup %4137  ;;  %v2276_v37 = vadd.f32 1.0, %v4136_v56  ;;  %4163 = vpow2.f32 %v3433_v8 }
 0x22d   : > { %v4140_v23 = vpop.eup %4139  ;;  %v2277_v36 = vadd.f32 1.0, %v4138_v13  ;;  %4165 = vpow2.f32 %v3434_v11 }
 0x22e   : > { %2859 = vmatpush1.bf16.msra.mxu0 %v6693_v19  ;;  %v4142_v51 = vpop.eup %4141  ;;  %4167 = vrcp.f32 %v2276_v37  ;;  %v2278_v62 = vadd.f32 1.0, %v4140_v23 }
 0x22f   : > { %v4144_v52 = vpop.eup %4143  ;;  %4169 = vrcp.f32 %v2277_v36  ;;  %v2279_v54 = vadd.f32 1.0, %v4142_v51 }
 0x230   : > { %v4146_v32 = vpop.eup %4145  ;;  %4171 = vrcp.f32 %v2278_v62 }
 0x231   : > { %v4148_v46 = vpop.eup %4147  ;;  %4173 = vrcp.f32 %v2279_v54  ;;  %v2281_v53 = vadd.f32 1.0, %v4146_v32  ;;  %v6696_v32 = vld [vmem:[#allocation45_spill] sm:$0xff] }
 0x232   : > { %v4150_v8 = vpop.eup %4149  ;;  %4175 = vrcp.f32 %v2272_v40  ;;  %v6694_v40 = vld [vmem:[#allocation143_spill] sm:$0xff]  ;;  %v2282_v54 = vadd.f32 1.0, %v4148_v46 }
 0x233   : > { %v4152_v11 = vpop.eup %4151  ;;  %4177 = vrcp.f32 %v2273_v3  ;;  %v2283_v47 = vadd.f32 1.0, %v4150_v8  ;;  %v1853_v62 = vadd.f32 1.0, %v6694_v40  ;;  %v6697_v46 = vld [vmem:[#allocation135_spill] sm:$0xff]  ;;  %v6699_v40 = vld [vmem:[#allocation141_spill] sm:$0xff] }
 0x234   : > { %v4154_v61 = vpop.eup %4153  ;;  %4179 = vrcp.f32 %v2274_v20  ;;  %v2284_v23 = vadd.f32 1.0, %v4152_v11 }
 0x235   : > { %v4156_v30 = vpop.eup %4155  ;;  %4181 = vrcp.f32 %v2275_v31  ;;  %v2285_v21 = vadd.f32 1.0, %v4154_v61  ;;  %v6695_v31 = vld [vmem:[#allocation44_spill] sm:$0xff] }
 0x236   : > { %v4158_v15 = vpop.eup %4157  ;;  %4183 = vrcp.f32 %v2283_v47  ;;  %v2286_v60 = vadd.f32 1.0, %v4156_v30  ;;  %v2356_v8 = vmul.f32 %v5983_v0, %v6695_v31  ;;  %v2266_v47 = vadd.f32 1.0, %v5942_v58 }
 0x237   : > { %v4160_v34 = vpop.eup %4159  ;;  %4185 = vrcp.f32 %v2285_v21  ;;  %v2287_v45 = vadd.f32 1.0, %v4158_v15  ;;  %v2358_v30 = vmul.f32 %v6002_v35, %v6696_v32  ;;  %v2280_v15 = vadd.f32 1.0, %v4144_v52 }
 0x238   : > { %v4162_v33 = vpop.eup %4161  ;;  %4187 = vrcp.f32 %v2286_v60  ;;  %v2288_v1 = vadd.f32 1.0, %v4160_v34  ;;  %v2357_v60 = vmul.f32 %v5993_v63, %v6697_v46  ;;  %v6698_v34 = vld [vmem:[#allocation136_spill] sm:$0xff]  ;;  %v1858_v52 = vadd.f32 1.0, %v5919_v2  ;;  %v6704_v46 = vld [vmem:[#allocation106_spill] sm:$0xff] }
 0x239   : > { %v4164_v56 = vpop.eup %4163  ;;  %4189 = vrcp.f32 %v2287_v45  ;;  %v2289_v13 = vadd.f32 1.0, %v4162_v33  ;;  %v2359_v0 = vmul.f32 %v6008_v41, %v6698_v34  ;;  %v2264_v45 = vadd.f32 1.0, %v5935_v55 }
 0x23a   : > { %v4166_v37 = vpop.eup %4165  ;;  %4191 = vrcp.f32 %v2288_v1  ;;  %v2290_v36 = vadd.f32 1.0, %v4164_v56 }
 0x23b   : > { %v4168_v10 = vpop.eup %4167  ;;  %4193 = vrcp.f32 %v2289_v13  ;;  %v2291_v19 = vadd.f32 1.0, %v4166_v37  ;;  %v1856_v13 = vadd.f32 1.0, %v5907_v39  ;;  %v1851_v39 = vadd.f32 1.0, %v6699_v40 }
 0x23c   : > { %v4170_v51 = vpop.eup %4169  ;;  %v2372_v3 = vmul.f32 %v4168_v10, %v5905_v9  ;;  %4195 = vrcp.f32 %v2290_v36  ;;  %v1855_v10 = vadd.f32 1.0, %v5879_v59  ;;  %v6701_v59 = vld [vmem:[#allocation35_spill] sm:$0xff] }
 0x23d   : > { %v4172_v20 = vpop.eup %4171  ;;  %v2373_v11 = vmul.f32 %v4170_v51, %v5911_v42  ;;  %4197 = vrcp.f32 %v2291_v19 }
 0x23e   : > { %v4174_v61 = vpop.eup %4173  ;;  %v2374_v21 = vmul.f32 %v4172_v20, %v5917_v44  ;;  %4199 = vrcp.f32 %v2284_v23  ;;  %v6068_v33 = vadd.f32 %v2372_v3, %v2356_v8  ;;  %v1857_v23 = vadd.f32 1.0, %v5913_v50 }
 0x23f   : > { %v4176_v9 = vpop.eup %4175  ;;  %v2375_v58 = vmul.f32 %v4174_v61, %v5923_v12  ;;  %4201 = vrcp.f32 %v2281_v53  ;;  %v6073_v1 = vadd.f32 %v2373_v11, %v2357_v60  ;;  %v1854_v12 = vadd.f32 1.0, %v5873_v17  ;;  %v6702_v61 = vld [vmem:[#allocation142_spill] sm:$0xff] }
 0x240   : > { %v4178_v42 = vpop.eup %4177  ;;  %v6070_v35 = vadd.f32 %v2374_v21, %v2358_v30  ;;  %4203 = vrcp.f32 %v2282_v54  ;;  %v6700_v54 = vld [vmem:[#allocation108_spill] sm:$0xff]  ;;  %v6703_v30 = vld [vmem:[#allocation77_spill] sm:$0xff]  ;;  %v2365_v60 = vmul.f32 %v6032_v48, %v6704_v46 }
 0x241   : > { %v4180_v44 = vpop.eup %4179  ;;  %4205 = vrcp.f32 %v2266_v47  ;;  %v6075_v63 = vadd.f32 %v2375_v58, %v2359_v0  ;;  %v2367_v20 = vmul.f32 %v6041_v22, %v6700_v54  ;;  %v2369_v32 = vmul.f32 %v4178_v42, %v6702_v61  ;;  %v6705_v22 = vld [vmem:[#allocation33_spill] sm:$0xff] }
 0x242   : > { %v4182_v41 = vpop.eup %4181  ;;  %v3557_v56 = vpack.c.bf16 %v6070_v35, %v6068_v33  ;;  %4207 = vrcp.f32 %v2280_v15  ;;  %v2370_v31 = vmul.f32 %v4180_v44, %v6701_v59  ;;  %v2368_v34 = vmul.f32 %v4176_v9, %v6705_v22  ;;  %v6711_v54 = vld [vmem:[#allocation73_spill] sm:$0xff]  ;;  %v6717_v22 = vld [vmem:[#allocation94_spill] sm:$0xff] }
 0x243   : > { %v4184_v55 = vpop.eup %4183  ;;  %4209 = vrcp.f32 %v1853_v62  ;;  %v3558_v37 = vpack.c.bf16 %v6075_v63, %v6073_v1  ;;  %v2371_v21 = vmul.f32 %v4182_v41, %v6703_v30  ;;  %v6713_v30 = vld [vmem:[#allocation98_spill] sm:$0xff]  ;;  %v6740_v1 = vld [vmem:[#allocation117_spill] sm:$0xff] }
 0x244   : > { %v4186_v2 = vpop.eup %4185  ;;  %4211 = vrcp.f32 %v2264_v45 }
 0x245   : > { %v4188_v36 = vpop.eup %4187  ;;  %4213 = vrcp.f32 %v1858_v52  ;;  %v2381_v15 = vmul.f32 %v4186_v2, %v5974_v24  ;;  %v6706_v24 = vld [vmem:[#allocation37_spill] sm:$0xff] }
 0x246   : > { %v4190_v17 = vpop.eup %4189  ;;  %4215 = vrcp.f32 %v1854_v12  ;;  %v2382_v0 = vmul.f32 %v4188_v36, %v5981_v49 }
 0x247   : > { %v4192_v53 = vpop.eup %4191  ;;  %4217 = vrcp.f32 %v1856_v13  ;;  %v2383_v62 = vmul.f32 %v4190_v17, %v5988_v27  ;;  %v6707_v13 = vld [vmem:[#allocation41_spill] sm:$0xff]  ;;  %v2397_v2 = vadd.f32 %v2381_v15, %v2365_v60  ;;  %v6715_v15 = vld [vmem:[#allocation131_spill] sm:$0xff] }
 0x248   : > { %v4194_v19 = vpop.eup %4193  ;;  %4219 = vrcp.f32 %v1857_v23  ;;  %v2384_v8 = vmul.f32 %v4192_v53, %v5997_v29  ;;  %v2363_v9 = vmul.f32 %v6023_v18, %v6707_v13  ;;  %v6725_v13 = vld [vmem:[#allocation80_spill] sm:$0xff] }
 0x249   : > { %v4196_v51 = vpop.eup %4195  ;;  %4221 = vrcp.f32 %v1855_v10  ;;  %v2385_v3 = vmul.f32 %v4194_v19, %v6006_v25  ;;  %v2399_v45 = vadd.f32 %v2383_v62, %v2367_v20  ;;  %v6709_v19 = vld [vmem:[#allocation40_spill] sm:$0xff] }
 0x24a   : > { %v4198_v50 = vpop.eup %4197  ;;  %v2386_v47 = vmul.f32 %v4196_v51, %v6012_v38  ;;  %v2379_v38 = vmul.f32 %v4184_v55, %v5954_v28  ;;  %4223 = vrcp.f32 %v1851_v39  ;;  %v2400_v12 = vadd.f32 %v2384_v8, %v2368_v34  ;;  %v6708_v55 = vld [vmem:[#allocation139_spill] sm:$0xff]  ;;  %v6710_v39 = vld [vmem:[#allocation62_spill] sm:$0xff]  ;;  %v6718_v34 = vld [vmem:[#allocation68_spill] sm:$0xff] }
 0x24b   : > { %v4200_v11 = vpop.eup %4199  ;;  %v2387_v27 = vmul.f32 %v4198_v50, %v6021_v4  ;;  %v2401_v42 = vadd.f32 %v2385_v3, %v2369_v32  ;;  %v2366_v4 = vmul.f32 %v6035_v6, %v6706_v24  ;;  %v2364_v36 = vmul.f32 %v6029_v7, %v6708_v55  ;;  %v6723_v24 = vld [vmem:[#allocation126_spill] sm:$0xff] }
 0x24c   : > { %v4202_v25 = vpop.eup %4201  ;;  %v2402_v29 = vadd.f32 %v2386_v47, %v2370_v31  ;;  %v2380_v41 = vmul.f32 %v4200_v11, %v5964_v5  ;;  %v2361_v5 = vmul.f32 %v6014_v16, %v6709_v19  ;;  %v2395_v51 = vadd.f32 %v2379_v38, %v2363_v9  ;;  %v6712_v16 = vld [vmem:[#allocation134_spill] sm:$0xff]  ;;  %v6726_v9 = vld [vmem:[#allocation101_spill] sm:$0xff] }
 0x24d   : > { %v4204_v58 = vpop.eup %4203  ;;  %v2403_v44 = vadd.f32 %v2387_v27, %v2371_v21  ;;  %v2377_v49 = vmul.f32 %v4202_v25, %v5940_v57  ;;  %v2398_v17 = vadd.f32 %v2382_v0, %v2366_v4  ;;  %v3562_v40 = vpack.c.bf16 %v2399_v45, %v2397_v2  ;;  %v6714_v21 = vld [vmem:[#allocation128_spill] sm:$0xff]  ;;  %v6720_v45 = vld [vmem:[#allocation74_spill] sm:$0xff]  ;;  %v6727_v2 = vld [vmem:[#allocation51_spill] sm:$0xff] }
 0x24e   : > { %v4206_v52 = vpop.eup %4205  ;;  %v2378_v10 = vmul.f32 %v4204_v58, %v5947_v43  ;;  %v3563_v53 = vpack.c.bf16 %v2402_v29, %v2400_v12  ;;  %v2396_v3 = vadd.f32 %v2380_v41, %v2364_v36  ;;  %v6716_v25 = vld [vmem:[#allocation132_spill] sm:$0xff]  ;;  %v1936_v0 = vmul.f32 %v6718_v34, %v6717_v22  ;;  %v6719_v29 = vld [vmem:[#allocation129_spill] sm:$0xff]  ;;  %v6724_v41 = vld [vmem:[#allocation130_spill] sm:$0xff] }
 0x24f   : > { %v4208_v48 = vpop.eup %4207  ;;  %v3564_v23 = vpack.c.bf16 %v2403_v44, %v2401_v42  ;;  %v2362_v57 = vmul.f32 %v4206_v52, %v6710_v39  ;;  %v2393_v7 = vadd.f32 %v2377_v49, %v2361_v5  ;;  %v6721_v42 = vld [vmem:[#allocation99_spill] sm:$0xff]  ;;  %v6722_v52 = vld [vmem:[#allocation96_spill] sm:$0xff]  ;;  %v1930_v49 = vmul.f32 %v6726_v9, %v6725_v13  ;;  %v6729_v36 = vld [vmem:[#allocation125_spill] sm:$0xff] }
 0x250   : > { %v4210_v28 = vpop.eup %4209  ;;  %v2376_v62 = vmul.f32 %v4208_v48, %v5930_v26  ;;  %v3561_v31 = vpack.c.bf16 %v2398_v17, %v2396_v3  ;;  %v1938_v26 = vmul.f32 %v6714_v21, %v6713_v30  ;;  %v1928_v44 = vmul.f32 %v6721_v42, %v6720_v45  ;;  %v6732_v5 = vld [vmem:[#allocation55_spill] sm:$0xff]  ;;  %v6736_v3 = vld [vmem:[#allocation137_spill] sm:$0xff]  ;;  %v6746_v30 = vld [vmem:[#allocation82_spill] sm:$0xff] }
 0x251   : > { %v4212_v6 = vpop.eup %4211  ;;  %2860 = vmatprep.subr.bf16.mxu0 %v3564_v23  ;;  %v2394_v59 = vadd.f32 %v2378_v10, %v2362_v57  ;;  %v3560_v11 = vpack.c.bf16 %v2395_v51, %v2393_v7  ;;  %v1937_v4 = vmul.f32 %v6723_v24, %v6722_v52  ;;  %v6728_v23 = vld [vmem:[#allocation121_spill] sm:$0xff]  ;;  %v1948_v10 = vmul.f32 %v5925_v14, %v6729_v36  ;;  %v6733_v51 = vld [vmem:[#allocation124_spill] sm:$0xff]  ;;  %v6751_v22 = vld [vmem:[#allocation138_spill] sm:$0xff] }
 0x252   : > { %v4214_v18 = vpop.eup %4213  ;;  %2861 = vmatpush2.bf16.msra.mxu0 %v3563_v53  ;;  %v2360_v20 = vmul.f32 %v4212_v6, %v6711_v54  ;;  %v1934_v55 = vmul.f32 %v6728_v23, %v6727_v2  ;;  %v6730_v53 = vld [vmem:[#allocation84_spill] sm:$0xff]  ;;  %v6756_v13 = vld [vmem:[#allocation63_spill] sm:$0xff]  ;;  %v3695_v23 = vld [vmem:[%s6305_s6 + $0x24] ss:$8 sps:$4 sm:$0xff]  }
 0x253   : > { %v4216_v50 = vpop.eup %4215  ;;  %2862 = vmatprep.subr.bf16.mxu0 %v3562_v40  ;;  %v1954_v47 = vmul.f32 %v4214_v18, %v6712_v16  ;;  %v6731_v6 = vld [vmem:[#allocation112_spill] sm:$0xff]  ;;  %v1935_v40 = vmul.f32 %v6733_v51, %v6732_v5  ;;  %v6734_v18 = vld [vmem:[#allocation127_spill] sm:$0xff]  ;;  %v6743_v16 = vld [vmem:[#allocation97_spill] sm:$0xff] }
 0x254   : > { %v4218_v43 = vpop.eup %4217  ;;  %v2392_v32 = vadd.f32 %v2376_v62, %v2360_v20  ;;  %v1950_v58 = vmul.f32 %v4216_v50, %v6719_v29  ;;  %v1932_v19 = vmul.f32 %v6731_v6, %v6730_v53  ;;  %v1949_v39 = vmul.f32 %v4210_v28, %v6734_v18  ;;  %v6735_v62 = vld [vmem:[#allocation110_spill] sm:$0xff]  ;;  %v6737_v7 = vld [vmem:[#allocation116_spill] sm:$0xff] }
 0x255   : > { %v4220_v8 = vpop.eup %4219  ;;  %v1952_v27 = vmul.f32 %v4218_v43, %v6715_v15  ;;  %v1970_v38 = vadd.f32 %v1954_v47, %v1938_v26  ;;  %v1944_v50 = vmul.f32 %v6736_v3, %v6735_v62  ;;  %v6738_v43 = vld [vmem:[#allocation140_spill] sm:$0xff]  ;;  %v3703_v53 = vld [vmem:[%s6305_s6 + $0x40] ss:$8 sps:$4 sm:$0xff]   ;;  %v3707_v5 = vld [vmem:[%s6305_s6 + $0x64] ss:$8 sps:$4 sm:$0xff]  }
 0x256   : > { %v4222_v61 = vpop.eup %4221  ;;  %2863 = vmatpush2.bf16.msra.mxu0 %v3561_v31  ;;  %v1953_v46 = vmul.f32 %v4220_v8, %v6716_v25  ;;  %v3559_v60 = vpack.c.bf16 %v2394_v59, %v2392_v32  ;;  %v1946_v14 = vmul.f32 %v6738_v43, %v6737_v7  ;;  %v1966_v54 = vadd.f32 %v1950_v58, %v1934_v55  ;;  %v6739_v59 = vld [vmem:[#allocation90_spill] sm:$0xff]  ;;  %v6742_v28 = vld [vmem:[#allocation72_spill] sm:$0xff]  ;;  %v6749_v25 = vld [vmem:[#allocation133_spill] sm:$0xff]  ;;  %v2532_v7 = vpop.permute.xlu1 %2531 }
 0x257   : > { %2864 = vmatprep.subr.bf16.mxu0 %v3560_v11  ;;  %v1951_v12 = vmul.f32 %v4222_v61, %v6724_v41  ;;  %v4224_v48 = vpop.eup %4223  ;;  %v1968_v17 = vadd.f32 %v1952_v27, %v1936_v0  ;;  %v1933_v63 = vmul.f32 %v6740_v1, %v6739_v59  ;;  %v1927_v47 = vmul.f32 %v6743_v16, %v6742_v28  ;;  %v6744_v11 = vld [vmem:[#allocation78_spill] sm:$0xff]  ;;  %v6745_v61 = vld [vmem:[#allocation100_spill] sm:$0xff]  ;;  %v6748_v27 = vld [vmem:[#allocation107_spill] sm:$0xff] }
 0x258   : > { %v1969_v57 = vadd.f32 %v1953_v46, %v1937_v4  ;;  %v1929_v32 = vmul.f32 %v6745_v61, %v6744_v11  ;;  %v6747_v21 = vld [vmem:[#allocation104_spill] sm:$0xff]  ;;  %v1964_v15 = vadd.f32 %v1948_v10, %v1932_v19  ;;  %v1943_v46 = vmul.f32 %v6749_v25, %v6748_v27  ;;  %v6752_v4 = vld [vmem:[#allocation69_spill] sm:$0xff] }
 0x259   : > { %v3556_v20 = vpack.c.bf16 %v1970_v38, %v1968_v17  ;;  %v1967_v8 = vadd.f32 %v1951_v12, %v1935_v40  ;;  %v1931_v26 = vmul.f32 %v6747_v21, %v6746_v30  ;;  %v1965_v0 = vadd.f32 %v1949_v39, %v1933_v63  ;;  %v6753_v41 = vld [vmem:[#allocation64_spill] sm:$0xff]  ;;  %v3697_v55 = vld [vmem:[%s6305_s6 + $0x20] ss:$8 sps:$4 sm:$0xff]   ;;  %v3701_v17 = vld [vmem:[%s6305_s6 + $0x44] ss:$8 sps:$4 sm:$0xff]   ;;  %v2527_v39 = vpop.permute.xlu0 %2526 }
 0x25a   : > { %2865 = vmatpush2.bf16.msra.mxu0 %v3559_v60  ;;  %v6750_v60 = vld [vmem:[#allocation113_spill] sm:$0xff]  ;;  %v1960_v35 = vadd.f32 %v1944_v50, %v1928_v44  ;;  %v3554_v29 = vpack.c.bf16 %v1966_v54, %v1964_v15  ;;  %v1959_v38 = vadd.f32 %v1943_v46, %v1927_v47  ;;  %v6754_v12 = vpack.c.bf16 %v6752_v4, %v6753_v41  ;;  %v3694_v2 = vld [vmem:[%s6305_s6 + $0x10] ss:$8 sps:$4 sm:$0xff]   ;;  %v3698_v36 = vld [vmem:[%s6305_s6 + $0x34] ss:$8 sps:$4 sm:$0xff]  }
 0x25b   : > { %2866 = vmatprep.subr.bf16.mxu0 %v3558_v37  ;;  %v6741_v37 = vld [vmem:[#allocation70_spill] sm:$0xff]  ;;  %v1945_v34 = vmul.f32 %v6751_v22, %v6750_v60  ;;  %v3555_v33 = vpack.c.bf16 %v1969_v57, %v1967_v8  ;;  %v3700_v10 = vld [vmem:[%s6305_s6 + $0x30] ss:$8 sps:$4 sm:$0xff]   ;;  %v3704_v6 = vld [vmem:[%s6305_s6 + $0x54] ss:$8 sps:$4 sm:$0xff]   ;;  %v2542_v8 = vpop.permute.xlu1 %2541 }
 0x25c   : > { %v1947_v31 = vmul.f32 %v4224_v48, %v6741_v37  ;;  %v3689_v44 = vld [vmem:[%s6305_s6] ss:$8 sps:$4 sm:$0xff]   ;;  %v3706_v19 = vld [vmem:[%s6305_s6 + $0x50] ss:$8 sps:$4 sm:$0xff]   ;;  %v3710_v40 = vld [vmem:[%s6305_s6 + $0x74] ss:$8 sps:$4 sm:$0xff]  }
 0x25d   : > { %v1961_v45 = vadd.f32 %v1945_v34, %v1929_v32  ;;  %v6755_v48 = vld [vmem:[#allocation65_spill] sm:$0xff]  ;;  %v3712_v18 = vld [vmem:[%s6305_s6 + $0x70] ss:$8 sps:$4 sm:$0xff]   ;;  %v2537_v59 = vpop.permute.xlu0 %2536 }
 0x25e   : > { %2867 = vmatpush2.bf16.msra.mxu0 %v3557_v56  ;;  %v1962_v56 = vadd.f32 %v1946_v14, %v1930_v49  ;;  %v1963_v58 = vadd.f32 %v1947_v31, %v1931_v26  ;;  %v6757_v9 = vpack.c.bf16 %v6755_v48, %v6756_v13  ;;  %v3692_v49 = vld [vmem:[%s6305_s6 + $0x14] ss:$8 sps:$4 sm:$0xff]   ;;  %v3709_v51 = vld [vmem:[%s6305_s6 + $0x60] ss:$8 sps:$4 sm:$0xff]  }
 0x25f   : > { %2868 = vmatprep.subr.bf16.mxu0 %v3556_v20  ;;  %v3551_v24 = vpack.c.bf16 %v1961_v45, %v1959_v38  ;;  %v2552_v15 = vpop.permute.xlu1 %2551 }
 0x260   : > { %v3553_v42 = vpack.c.bf16 %v1965_v0, %v1963_v58  ;;  %v3552_v52 = vpack.c.bf16 %v1962_v56, %v1960_v35 }
 0x261   : > { %v2547_v61 = vpop.permute.xlu0 %2546 }
 0x262   : > { %2869 = vmatpush2.bf16.msra.mxu0 %v3555_v33 }
 0x263   : > { %2870 = vmatprep.subr.bf16.mxu0 %v3554_v29  ;;  %v2562_v56 = vpop.permute.xlu1 %2561 }
 0x265   : > { %v2557_v22 = vpop.permute.xlu0 %2556 }
 0x266   : > { %2871 = vmatpush2.bf16.msra.mxu0 %v3553_v42 }
 0x267   : > { %2872 = vmatprep.subr.bf16.mxu0 %v3552_v52 }
 0x269   : > { %v2567_v42 = vpop.permute.xlu0 %2566 }
 0x26a   : > { %2873 = vmatpush2.bf16.msra.mxu0 %v3551_v24 }
 0x26b   : > { %2874 = vmatprep.subr.bf16.mxu0 %v6754_v12  ;;  %v2572_v12 = vpop.permute.xlu1 %2571 }
 0x26e   : > { %2875 = vmatpush2.bf16.msra.mxu0 %v6757_v9 }
 0x271   : > { %2877 = vmatmul.mubr.bf16.vlgmr.msra.gmra.mxu0 %v3689_v44 }
 0x272   : > { %2886 = vmatprep.mubr.bf16.mxu0 %v3692_v49  ;;  %v2577_v49 = vpop.permute.xlu0 %2576 }
 0x279   : > { %2887 = vmatmul.mubr.bf16.gmra.mxu0 %v3694_v2 }
 0x27a   : > { %2896 = vmatprep.mubr.bf16.mxu0 %v3695_v23 }
 0x281   : > { %2897 = vmatmul.mubr.bf16.gmra.mxu0 %v3697_v55 }
 0x282   : > { %2906 = vmatprep.mubr.bf16.mxu0 %v3698_v36 }
 0x289   : > { %2907 = vmatmul.mubr.bf16.gmra.mxu0 %v3700_v10  ;;  %v2582_v10 = vpop.permute.xlu1 %2581 }
 0x28a   : > { %2916 = vmatprep.mubr.bf16.mxu0 %v3701_v17 }
 0x291   : > { %2917 = vmatmul.mubr.bf16.gmra.mxu0 %v3703_v53 }
 0x292   : > { %2926 = vmatprep.mubr.bf16.mxu0 %v3704_v6 }
 0x299   : > { %2927 = vmatmul.mubr.bf16.gmra.mxu0 %v3706_v19 }
 0x29a   : > { %2936 = vmatprep.mubr.bf16.mxu0 %v3707_v5  ;;  %v2587_v5 = vpop.permute.xlu0 %2586 }
 0x2a1   : > { %2937 = vmatmul.mubr.bf16.gmra.mxu0 %v3709_v51 }
 0x2a2   : > { %2946 = vmatprep.mubr.bf16.mxu0 %v3710_v40 }
 0x2a9   : > { %2947 = vmatmul.mubr.bf16.gmra.mxu0 %v3712_v18 }
 0x331   : > { %v2878_v57 = vpop.f32.mrf.mxu0 }
 0x332   : > { %v2879_v62 = vadd.f32 %v2878_v57, %v2527_v39  ;;  %v2592_v57 = vpop.permute.xlu1 %2591 }
 0x333   : > { %v2880_v3 = vpop.f32.mrf.mxu0 }
 0x334   : > { %v2881_v50 = vadd.f32 %v2880_v3, %v2527_v39  ;;  %2957 = vxpose.xlu0.b32.start [1/16] %v2879_v62, 128 }
 0x335   : > { %v2882_v43 = vpop.f32.mrf.mxu0 }
 0x336   : > { %v2883_v14 = vadd.f32 %v2882_v43, %v2532_v7  ;;  %2989 = vxpose.xlu1.b32.start [1/16] %v2881_v50, 128  ;;  %v2597_v43 = vpop.permute.xlu0 %2596 }
 0x337   : > { %v2884_v54 = vpop.f32.mrf.mxu0 }
 0x338   : > { %v2885_v20 = vadd.f32 %v2884_v54, %v2532_v7  ;;  %2958 = vxpose.xlu0.b32.cont [2/16] %v2883_v14, 128 }
 0x339   : > { %v2888_v1 = vpop.f32.mrf.mxu0 }
 0x33a   : > { %v2889_v63 = vadd.f32 %v2888_v1, %v2537_v59  ;;  %2990 = vxpose.xlu1.b32.cont [2/16] %v2885_v20, 128  ;;  %v2602_v1 = vpop.permute.xlu1 %2601 }
 0x33b   : > { %v2890_v37 = vpop.f32.mrf.mxu0 }
 0x33c   : > { %v2891_v31 = vadd.f32 %v2890_v37, %v2537_v59  ;;  %2959 = vxpose.xlu0.b32.cont [3/16] %v2889_v63, 128 }
 0x33d   : > { %v2892_v28 = vpop.f32.mrf.mxu0 }
 0x33e   : > { %v2893_v16 = vadd.f32 %v2892_v28, %v2542_v8  ;;  %2991 = vxpose.xlu1.b32.cont [3/16] %v2891_v31, 128 }
 0x33f   : > { %v2894_v47 = vpop.f32.mrf.mxu0 }
 0x340   : > { %v2895_v11 = vadd.f32 %v2894_v47, %v2542_v8  ;;  %2960 = vxpose.xlu0.b32.cont [4/16] %v2893_v16, 128 }
 0x341   : > { %v2898_v32 = vpop.f32.mrf.mxu0 }
 0x342   : > { %v2899_v30 = vadd.f32 %v2898_v32, %v2547_v61  ;;  %2992 = vxpose.xlu1.b32.cont [4/16] %v2895_v11, 128 }
 0x343   : > { %v2900_v21 = vpop.f32.mrf.mxu0 }
 0x344   : > { %v2901_v26 = vadd.f32 %v2900_v21, %v2547_v61  ;;  %2961 = vxpose.xlu0.b32.cont [5/16] %v2899_v30, 128 }
 0x345   : > { %v2902_v27 = vpop.f32.mrf.mxu0 }
 0x346   : > { %v2903_v25 = vadd.f32 %v2902_v27, %v2552_v15  ;;  %2993 = vxpose.xlu1.b32.cont [5/16] %v2901_v26, 128 }
 0x347   : > { %v2904_v46 = vpop.f32.mrf.mxu0 }
 0x348   : > { %v2905_v60 = vadd.f32 %v2904_v46, %v2552_v15  ;;  %2962 = vxpose.xlu0.b32.cont [6/16] %v2903_v25, 128 }
 0x349   : > { %v2908_v34 = vpop.f32.mrf.mxu0 }
 0x34a   : > { %v2909_v0 = vadd.f32 %v2908_v34, %v2557_v22  ;;  %2994 = vxpose.xlu1.b32.cont [6/16] %v2905_v60, 128 }
 0x34b   : > { %v2910_v33 = vpop.f32.mrf.mxu0 }
 0x34c   : > { %v2911_v35 = vadd.f32 %v2910_v33, %v2557_v22  ;;  %2963 = vxpose.xlu0.b32.cont [7/16] %v2909_v0, 128 }
 0x34d   : > { %v2912_v29 = vpop.f32.mrf.mxu0 }
 0x34e   : > { %v2913_v58 = vadd.f32 %v2912_v29, %v2562_v56  ;;  %2995 = vxpose.xlu1.b32.cont [7/16] %v2911_v35, 128 }
 0x34f   : > { %v2914_v38 = vpop.f32.mrf.mxu0 }
 0x350   : > { %v2915_v45 = vadd.f32 %v2914_v38, %v2562_v56  ;;  %2964 = vxpose.xlu0.b32.cont [8/16] %v2913_v58, 128 }
 0x351   : > { %v2918_v52 = vpop.f32.mrf.mxu0 }
 0x352   : > { %v2919_v24 = vadd.f32 %v2918_v52, %v2567_v42  ;;  %2996 = vxpose.xlu1.b32.cont [8/16] %v2915_v45, 128 }
 0x353   : > { %v2920_v4 = vpop.f32.mrf.mxu0 }
 0x354   : > { %v2921_v41 = vadd.f32 %v2920_v4, %v2567_v42  ;;  %2965 = vxpose.xlu0.b32.cont [9/16] %v2919_v24, 128 }
 0x355   : > { %v2922_v44 = vpop.f32.mrf.mxu0 }
 0x356   : > { %v2923_v48 = vadd.f32 %v2922_v44, %v2572_v12  ;;  %2997 = vxpose.xlu1.b32.cont [9/16] %v2921_v41, 128 }
 0x357   : > { %v2924_v13 = vpop.f32.mrf.mxu0 }
 0x358   : > { %v2925_v9 = vadd.f32 %v2924_v13, %v2572_v12  ;;  %2966 = vxpose.xlu0.b32.cont [10/16] %v2923_v48, 128 }
 0x359   : > { %v2928_v2 = vpop.f32.mrf.mxu0 }
 0x35a   : > { %v2929_v23 = vadd.f32 %v2928_v2, %v2577_v49  ;;  %2998 = vxpose.xlu1.b32.cont [10/16] %v2925_v9, 128 }
 0x35b   : > { %v2930_v55 = vpop.f32.mrf.mxu0 }
 0x35c   : > { %v2931_v36 = vadd.f32 %v2930_v55, %v2577_v49  ;;  %2967 = vxpose.xlu0.b32.cont [11/16] %v2929_v23, 128 }
 0x35d   : > { %v2932_v17 = vpop.f32.mrf.mxu0 }
 0x35e   : > { %v2933_v53 = vadd.f32 %v2932_v17, %v2582_v10  ;;  %2999 = vxpose.xlu1.b32.cont [11/16] %v2931_v36, 128 }
 0x35f   : > { %v2934_v6 = vpop.f32.mrf.mxu0 }
 0x360   : > { %v2935_v19 = vadd.f32 %v2934_v6, %v2582_v10  ;;  %2968 = vxpose.xlu0.b32.cont [12/16] %v2933_v53, 128 }
 0x361   : > { %v2938_v51 = vpop.f32.mrf.mxu0 }
 0x362   : > { %v2939_v40 = vadd.f32 %v2938_v51, %v2587_v5  ;;  %3000 = vxpose.xlu1.b32.cont [12/16] %v2935_v19, 128 }
 0x363   : > { %v2940_v18 = vpop.f32.mrf.mxu0 }
 0x364   : > { %v2941_v39 = vadd.f32 %v2940_v18, %v2587_v5  ;;  %2969 = vxpose.xlu0.b32.cont [13/16] %v2939_v40, 128 }
 0x365   : > { %v2942_v62 = vpop.f32.mrf.mxu0 }
 0x366   : > { %v2943_v3 = vadd.f32 %v2942_v62, %v2592_v57  ;;  %3001 = vxpose.xlu1.b32.cont [13/16] %v2941_v39, 128 }
 0x367   : > { %v2944_v50 = vpop.f32.mrf.mxu0 }
 0x368   : > { %v2945_v7 = vadd.f32 %v2944_v50, %v2592_v57  ;;  %2970 = vxpose.xlu0.b32.cont [14/16] %v2943_v3, 128 }
 0x369   : > { %v2948_v14 = vpop.f32.mrf.mxu0 }
 0x36a   : > { %v2949_v54 = vadd.f32 %v2948_v14, %v2597_v43  ;;  %3002 = vxpose.xlu1.b32.cont [14/16] %v2945_v7, 128 }
 0x36b   : > { %v2950_v20 = vpop.f32.mrf.mxu0 }
 0x36c   : > { %v2951_v59 = vadd.f32 %v2950_v20, %v2597_v43  ;;  %2971 = vxpose.xlu0.b32.cont [15/16] %v2949_v54, 128 }
 0x36d   : > { %v2952_v63 = vpop.f32.mrf.mxu0 }
 0x36e   : > { %v2953_v37 = vadd.f32 %v2952_v63, %v2602_v1  ;;  %3003 = vxpose.xlu1.b32.cont [15/16] %v2951_v59, 128 }
 0x36f   : > { %v2954_v31 = vpop.f32.mrf.mxu0 }
 0x370   : > { %v2955_v8 = vadd.f32 %v2954_v31, %v2602_v1  ;;  %2972 = vxpose.xlu0.b32.end [16/16] %v2953_v37, 128 }
 0x372   : > { %3004 = vxpose.xlu1.b32.end [16/16] %v2955_v8, 128 }
 0x3b0   : > { %v2973_v28 = vpop.trf.xlu0 }
 0x3b1   : > { %3021 = vst [vmem:[%s6215_s29] sm:$0xff] %v2973_v28 }
 0x3b2   : > { %v3005_v16 = vpop.trf.xlu1 }
 0x3b3   : > { %3037 = vst [vmem:[%s6215_s29 + $0x80] sm:$0xff] %v3005_v16 }
 0x3b4   : > { %v2974_v47 = vpop.trf.xlu0 }
 0x3b5   : > { %3022 = vst [vmem:[%s6215_s29 + $0x8] sm:$0xff] %v2974_v47 }
 0x3b6   : > { %v3006_v11 = vpop.trf.xlu1 }
 0x3b7   : > { %3038 = vst [vmem:[%s6215_s29 + $0x88] sm:$0xff] %v3006_v11 }
 0x3b8   : > { %v2975_v61 = vpop.trf.xlu0 }
 0x3b9   : > { %3023 = vst [vmem:[%s6215_s29 + $0x10] sm:$0xff] %v2975_v61 }
 0x3ba   : > { %v3007_v32 = vpop.trf.xlu1 }
 0x3bb   : > { %3039 = vst [vmem:[%s6215_s29 + $0x90] sm:$0xff] %v3007_v32 }
 0x3bc   : > { %v2976_v30 = vpop.trf.xlu0 }
 0x3bd   : > { %3024 = vst [vmem:[%s6215_s29 + $0x18] sm:$0xff] %v2976_v30 }
 0x3be   : > { %v3008_v21 = vpop.trf.xlu1 }
 0x3bf   : > { %3040 = vst [vmem:[%s6215_s29 + $0x98] sm:$0xff] %v3008_v21 }
 0x3c0   : > { %v2977_v26 = vpop.trf.xlu0 }
 0x3c1   : > { %3025 = vst [vmem:[%s6215_s29 + $0x20] sm:$0xff] %v2977_v26 }
 0x3c2   : > { %v3009_v15 = vpop.trf.xlu1 }
 0x3c3   : > { %3041 = vst [vmem:[%s6215_s29 + $0xa0] sm:$0xff] %v3009_v15 }
 0x3c4   : > { %v2978_v27 = vpop.trf.xlu0 }
 0x3c5   : > { %3026 = vst [vmem:[%s6215_s29 + $0x28] sm:$0xff] %v2978_v27 }
 0x3c6   : > { %v3010_v25 = vpop.trf.xlu1 }
 0x3c7   : > { %3042 = vst [vmem:[%s6215_s29 + $0xa8] sm:$0xff] %v3010_v25 }
 0x3c8   : > { %v2979_v46 = vpop.trf.xlu0 }
 0x3c9   : > { %3027 = vst [vmem:[%s6215_s29 + $0x30] sm:$0xff] %v2979_v46 }
 0x3ca   : > { %v3011_v60 = vpop.trf.xlu1 }
 0x3cb   : > { %3043 = vst [vmem:[%s6215_s29 + $0xb0] sm:$0xff] %v3011_v60 }
 0x3cc   : > { %v2980_v22 = vpop.trf.xlu0 }
 0x3cd   : > { %3028 = vst [vmem:[%s6215_s29 + $0x38] sm:$0xff] %v2980_v22 }
 0x3ce   : > { %v3012_v34 = vpop.trf.xlu1 }
 0x3cf   : > { %3044 = vst [vmem:[%s6215_s29 + $0xb8] sm:$0xff] %v3012_v34 }
 0x3d0   : > { %v2981_v0 = vpop.trf.xlu0 }
 0x3d1   : > { %3029 = vst [vmem:[%s6215_s29 + $0x40] sm:$0xff] %v2981_v0 }
 0x3d2   : > { %v3013_v33 = vpop.trf.xlu1 }
 0x3d3   : > { %3045 = vst [vmem:[%s6215_s29 + $0xc0] sm:$0xff] %v3013_v33 }
 0x3d4   : > { %v2982_v35 = vpop.trf.xlu0 }
 0x3d5   : > { %3030 = vst [vmem:[%s6215_s29 + $0x48] sm:$0xff] %v2982_v35 }
 0x3d6   : > { %v3014_v56 = vpop.trf.xlu1 }
 0x3d7   : > { %3046 = vst [vmem:[%s6215_s29 + $0xc8] sm:$0xff] %v3014_v56 }
 0x3d8   : > { %v2983_v29 = vpop.trf.xlu0 }
 0x3d9   : > { %3031 = vst [vmem:[%s6215_s29 + $0x50] sm:$0xff] %v2983_v29 }
 0x3da   : > { %v3015_v58 = vpop.trf.xlu1 }
 0x3db   : > { %3047 = vst [vmem:[%s6215_s29 + $0xd0] sm:$0xff] %v3015_v58 }
 0x3dc   : > { %v2984_v38 = vpop.trf.xlu0 }
 0x3dd   : > { %3032 = vst [vmem:[%s6215_s29 + $0x58] sm:$0xff] %v2984_v38 }
 0x3de   : > { %v3016_v45 = vpop.trf.xlu1 }
 0x3df   : > { %3048 = vst [vmem:[%s6215_s29 + $0xd8] sm:$0xff] %v3016_v45 }
 0x3e0   : > { %v2985_v42 = vpop.trf.xlu0 }
 0x3e1   : > { %3033 = vst [vmem:[%s6215_s29 + $0x60] sm:$0xff] %v2985_v42 }
 0x3e2   : > { %v3017_v52 = vpop.trf.xlu1 }
 0x3e3   : > { %3049 = vst [vmem:[%s6215_s29 + $0xe0] sm:$0xff] %v3017_v52 }
 0x3e4   : > { %v2986_v24 = vpop.trf.xlu0 }
 0x3e5   : > { %3034 = vst [vmem:[%s6215_s29 + $0x68] sm:$0xff] %v2986_v24 }
 0x3e6   : > { %v3018_v4 = vpop.trf.xlu1 }
 0x3e7   : > { %3050 = vst [vmem:[%s6215_s29 + $0xe8] sm:$0xff] %v3018_v4 }
 0x3e8   : > { %v2987_v41 = vpop.trf.xlu0 }
 0x3e9   : > { %3035 = vst [vmem:[%s6215_s29 + $0x70] sm:$0xff] %v2987_v41 }
 0x3ea   : > { %v3019_v12 = vpop.trf.xlu1 }
 0x3eb   : > { %3051 = vst [vmem:[%s6215_s29 + $0xf0] sm:$0xff] %v3019_v12 }
 0x3ec   : > { %v2988_v44 = vpop.trf.xlu0 }
 0x3ed   : > { %3036 = vst [vmem:[%s6215_s29 + $0x78] sm:$0xff] %v2988_v44 }
 0x3ee   : > { %v3020_v48 = vpop.trf.xlu1 }
 0x3ef   : > { %3052 = vst [vmem:[%s6215_s29 + $0xf8] sm:$0xff] %v3020_v48 }
 0x3f0   : > { %4238 = shalt.err (!%p4235_p7)
}
 0x3f1   : > { %s4239_s11 = scalar_lea.hbm %s6252_s15, 4096  ;;  %s4243_s20 = scalar_lea.hbm %s6307_s8, 8192 }
 0x3f2   : > { %p4240_p8 = scmp.ne.s32.totalorder %s6252_s15, %s4239_s11  ;;  %p4244_p0 = scmp.lt.s32.totalorder %s6252_s15, %s6307_s8 }
 0x3f3   : > { %p4245_p1 = scmp.lt.s32.totalorder %s4243_s20, %s4239_s11 }
 0x3f4   : > { %p4241_p12 = pnand %p4240_p8, %p4424_p9 }
 0x3f5   : > { %p4246_p2 = por %p4245_p1, %p4244_p0 }
 0x3f6   : > { %p4242_p13 = pneg %p4241_p12 }
 0x3f8   : > { %p4247_p3 = pnand %p4246_p2, %p4242_p13 }
 0x3fa   : > { %4250 = shalt.err (!%p4247_p3)
}
 0x3fb   : > { %s4329_s26 = smov 128   ;;  %s4330_s12 = smov 8  }
 0x3fc   : > { %3609 = dma.vmem_to_hbm [thread:$0]  (%p4424_p9), %s6254_s22, 4096, %s6252_s15, %s3054_s19, %s4329_s26, %s4329_s26, %s4330_s12  }
 0x3fd PF: > { %s3082_s0 = sand.u32 1, %s4285_s27   ;;  %p3612_p4 = pnand %p3216_p11, %p4428_p10 }
 0x3fe   : > { %s3083_s23 = scalar_lea.sflag [#allocation6], %s3082_s0 }
 0x3ff   : > { %p3613_p5 = pneg %p3612_p4 }
 0x401   : > { %4280 = dma.done.wait (%p3613_p5), %s3083_s23, 4096  }
 0x402   : > { %4282 = vsyncadd (%p3613_p5), %s3083_s23, 4294963200  ;;  %s6759_s30 = sld [smem:[#allocation30_spill]]  ;;  %s6762_s27 = smov %s4289_s28 }
 0x403   : > { %s6760_s25 = sld [smem:[#allocation29_spill]] }
 0x404   : > { %s6761_s29 = sld [smem:[#allocation31_spill]] }
 0x408   : > { %p27_p6 = scmp.ge.s32.totalorder %s6759_s30, 4  }
 0x409   : > { %s6763_s28 = smov %s6760_s25 }
 0x40a   :  { %29 = sbr.rel (!%p27_p6) target bundleno = 12 (0xc), region = 154 }
 0x40f   :  { %3088 = vsyncpa [#allocation5], 1 }
 0x410   :  { %3090 = vsyncpa [#allocation5 + $0x1], 1 }
 0x411   :  { %3091 = vsyncpa [#allocation8], 1 }
 0x412   :  { %3093 = vsyncpa [#allocation8 + $0x1], 1 }
 0x413   :  { %3094 = vsyncpa [#allocation11], 1 }
 0x414   :  { %3096 = vsyncpa [#allocation11 + $0x1], 1 }
 0x415   :  { %3097 = vsyncpa [#allocation6], 1 }
 0x416   :  { %3099 = vsyncpa [#allocation6 + $0x1], 1 }

</bundles_post_ra>
